<compile_context>
chip_gen: v6e
topology: v6e:2x2x1
jax: 0.10.0
libtpu: 0.0.40
codegen_flags: <defaults>
</compile_context>

<pallas_src>
import functools

import jax
import jax.numpy as jnp
from jax.experimental import pallas as pl
from jax.experimental.pallas import tpu as pltpu

KS = 7
PAD = KS // 2

# Per-grid-step VMEM budget for the (double-buffered) x/out blocks. Kept well
# under the default scoped VMEM limit on all generations (v5e 16 MiB,
# v6e/v7x 32 MiB) to leave headroom for in-kernel temporaries.
_BLOCK_VMEM_BUDGET = 4 * 1024 * 1024


def _cbam_spatial_kernel(w_ref, row_ref, col_ref, x_ref, o_ref, *, H, W):
    """One grid step: gate a (TN, C, H*W) block of x.

    w_ref:   (2*KS*KS,) f32 conv weights (OIHW flattened, O=1) in SMEM.
    row_ref: (1, H*W) int32 row index of every flattened pixel.
    col_ref: (1, H*W) int32 col index of every flattened pixel.
    x_ref:   (TN, C, H*W) input block in VMEM.
    o_ref:   (TN, C, H*W) output block in VMEM.
    """
    HW = H * W
    xv = x_ref[...]                                 # (TN, C, HW)
    xf = xv.astype(jnp.float32)

    # Channel reduction (lane-dense: HW on lanes, C on sublanes).
    avg = jnp.mean(xf, axis=1)                      # (TN, HW)
    mx = jnp.max(xf, axis=1)                        # (TN, HW)

    row = row_ref[...]                              # (1, HW) int32
    col = col_ref[...]                              # (1, HW) int32

    # Per-offset validity masks (replaces explicit zero padding).
    row_ok = []
    col_ok = []
    for k in range(KS):
        d = k - PAD
        row_ok.append((row + d >= 0) & (row + d < H))
        col_ok.append((col + d >= 0) & (col + d < W))

    # Read each conv weight exactly once from SMEM (hoisted out of tap loop).
    w = [w_ref[i] for i in range(2 * KS * KS)]

    # 2 -> 1 channel 7x7 cross-correlation, fully unrolled. A tap offset
    # (dy, dx) on the row-major flattened map is a lane roll by dy*W + dx;
    # taps that fall outside the feature map (including row wrap-around) are
    # masked off.
    acc = jnp.zeros_like(avg)
    for ky in range(KS):
        dy = ky - PAD
        for kx in range(KS):
            dx = kx - PAD
            off = dy * W + dx
            if off == 0:
                sa, sm = avg, mx
            else:
                shift = (-off) % HW                 # roll: out[f] = in[f+off]
                sa = pltpu.roll(avg, shift, 1)
                sm = pltpu.roll(mx, shift, 1)
            tap = w[ky * KS + kx] * sa + w[KS * KS + ky * KS + kx] * sm
            acc = acc + jnp.where(row_ok[ky] & col_ok[kx], tap, 0.0)

    gate = jax.nn.sigmoid(acc)                      # (TN, HW)
    # Gate in the input dtype so bf16 inputs keep bf16 on the bulk multiply.
    o_ref[...] = (xv * gate.astype(xv.dtype)[:, None, :]).astype(o_ref.dtype)


def cbam_spatial_attention(x, weight):
    """x: (N, C, H, W); weight: (1, 2, KS, KS) float32, no bias."""
    N, C, H, W = x.shape
    HW = H * W
    x_flat = x.reshape(N, C, HW)                    # lane-dense layout
    w_flat = weight.reshape(-1).astype(jnp.float32)

    rows = jnp.repeat(jnp.arange(H, dtype=jnp.int32), W).reshape(1, HW)
    cols = jnp.tile(jnp.arange(W, dtype=jnp.int32), H).reshape(1, HW)

    # Batch tile: largest divisor of N whose in+out, double-buffered block
    # footprint fits the VMEM budget.
    bytes_per_batch = 4 * C * HW * x.dtype.itemsize
    tn = max(1, min(N, _BLOCK_VMEM_BUDGET // max(bytes_per_batch, 1)))
    while N % tn:
        tn -= 1

    kernel = functools.partial(_cbam_spatial_kernel, H=H, W=W)
    out_flat = pl.pallas_call(
        kernel,
        out_shape=jax.ShapeDtypeStruct((N, C, HW), x.dtype),
        grid_spec=pltpu.PrefetchScalarGridSpec(
            num_scalar_prefetch=0,
            grid=(N // tn,),
            in_specs=[
                pl.BlockSpec(memory_space=pltpu.MemorySpace.SMEM),   # weights
                pl.BlockSpec((1, HW), lambda n: (0, 0)),             # row idx
                pl.BlockSpec((1, HW), lambda n: (0, 0)),             # col idx
                pl.BlockSpec((tn, C, HW), lambda n: (n, 0, 0)),      # x
            ],
            out_specs=pl.BlockSpec((tn, C, HW), lambda n: (n, 0, 0)),
        ),
        compiler_params=pltpu.CompilerParams(
            dimension_semantics=("parallel",),   # disjoint per-step outputs
        ),
    )(w_flat, rows, cols, x_flat)
    return out_flat.reshape(N, C, H, W)


def cbam_spatial_attention_ref(x, weight):
    """Pure-JAX reference matching the PyTorch forward."""
    avg = jnp.mean(x, axis=1, keepdims=True)
    mx = jnp.max(x, axis=1, keepdims=True)
    cat = jnp.concatenate([avg, mx], axis=1)        # (N, 2, H, W)
    out = jax.lax.conv_general_dilated(
        cat, weight, window_strides=(1, 1),
        padding=[(PAD, PAD), (PAD, PAD)],
        dimension_numbers=("NCHW", "OIHW", "NCHW"),
    )
    return x * jax.nn.sigmoid(out)


if __name__ == "__main__":
    key = jax.random.PRNGKey(0)
    kx, kw = jax.random.split(key)

    # Small shapes consistent with the module: N=2, C=4, H=W=16.
    x = jax.random.normal(kx, (2, 4, 16, 16), jnp.float32)
    # Deterministic synthetic conv weight, shape (out=1, in=2, 7, 7), no bias.
    weight = jax.random.normal(kw, (1, 2, KS, KS), jnp.float32) * 0.1

    out = cbam_spatial_attention(x, weight)
    jax.block_until_ready(out)

    ref = cbam_spatial_attention_ref(x, weight)
    err = float(jnp.max(jnp.abs(out - ref)))
    assert err < 1e-4, f"mismatch vs reference, max abs err = {err}"

    print("KERNEL_OK")
</pallas_src>

<mosaic_0001>
module attributes {stable_mosaic.version = 11 : i64} {
  func.func @_cbam_spatial_kernel(%arg0: i32, %arg1: memref<98xf32, #tpu.memory_space<smem>>, %arg2: memref<1x256xi32, #tpu.memory_space<vmem>>, %arg3: memref<1x256xi32, #tpu.memory_space<vmem>>, %arg4: memref<2x4x256xf32, #tpu.memory_space<vmem>>, %arg5: memref<2x4x256xf32, #tpu.memory_space<vmem>>) attributes {dimension_semantics = [#tpu.dimension_semantics<parallel>], iteration_bounds = array<i64: 1>, scalar_prefetch = 0 : i64, scratch_operands = 0 : i64, tpu.core_type = #tpu.core_type<tc>, window_params = [{transform_indices = @transform_0, window_bounds = array<i64: 98>}, {pipeline_mode = #tpu.pipeline_mode<synchronous>, transform_indices = @transform_1, window_bounds = array<i64: 1, 256>}, {pipeline_mode = #tpu.pipeline_mode<synchronous>, transform_indices = @transform_2, window_bounds = array<i64: 1, 256>}, {transform_indices = @transform_3, window_bounds = array<i64: 2, 4, 256>}, {transform_indices = @transform_4, window_bounds = array<i64: 2, 4, 256>}]} {
    %c0 = arith.constant 0 : index
    %c0_0 = arith.constant 0 : index
    %c0_1 = arith.constant 0 : index
    %0 = vector.load %arg4[%c0, %c0_0, %c0_1] : memref<2x4x256xf32, #tpu.memory_space<vmem>>, vector<2x4x256xf32>
    %cst = arith.constant dense<0.000000e+00> : vector<2x256xf32>
    %1 = vector.multi_reduction <add>, %0, %cst [1] : vector<2x4x256xf32> to vector<2x256xf32>
    %cst_2 = arith.constant 4.000000e+00 : f32
    %2 = vector.broadcast %cst_2 : f32 to vector<2x256xf32>
    %3 = arith.divf %1, %2 : vector<2x256xf32>
    %cst_3 = arith.constant dense<0xFF800000> : vector<2x256xf32>
    %4 = vector.multi_reduction <maximumf>, %0, %cst_3 [1] : vector<2x4x256xf32> to vector<2x256xf32>
    %c0_4 = arith.constant 0 : index
    %c0_5 = arith.constant 0 : index
    %5 = vector.load %arg2[%c0_4, %c0_5] : memref<1x256xi32, #tpu.memory_space<vmem>>, vector<1x256xi32>
    %c0_6 = arith.constant 0 : index
    %c0_7 = arith.constant 0 : index
    %6 = vector.load %arg3[%c0_6, %c0_7] : memref<1x256xi32, #tpu.memory_space<vmem>>, vector<1x256xi32>
    %c-3_i32 = arith.constant -3 : i32
    %7 = vector.broadcast %c-3_i32 : i32 to vector<1x256xi32>
    %8 = arith.addi %5, %7 : vector<1x256xi32>
    %c0_i32 = arith.constant 0 : i32
    %9 = vector.broadcast %c0_i32 : i32 to vector<1x256xi32>
    %10 = arith.cmpi sge, %8, %9 : vector<1x256xi32>
    %c-3_i32_8 = arith.constant -3 : i32
    %11 = vector.broadcast %c-3_i32_8 : i32 to vector<1x256xi32>
    %12 = arith.addi %5, %11 : vector<1x256xi32>
    %c16_i32 = arith.constant 16 : i32
    %13 = vector.broadcast %c16_i32 : i32 to vector<1x256xi32>
    %14 = arith.cmpi slt, %12, %13 : vector<1x256xi32>
    %15 = arith.andi %10, %14 : vector<1x256xi1>
    %c-3_i32_9 = arith.constant -3 : i32
    %16 = vector.broadcast %c-3_i32_9 : i32 to vector<1x256xi32>
    %17 = arith.addi %6, %16 : vector<1x256xi32>
    %c0_i32_10 = arith.constant 0 : i32
    %18 = vector.broadcast %c0_i32_10 : i32 to vector<1x256xi32>
    %19 = arith.cmpi sge, %17, %18 : vector<1x256xi32>
    %c-3_i32_11 = arith.constant -3 : i32
    %20 = vector.broadcast %c-3_i32_11 : i32 to vector<1x256xi32>
    %21 = arith.addi %6, %20 : vector<1x256xi32>
    %c16_i32_12 = arith.constant 16 : i32
    %22 = vector.broadcast %c16_i32_12 : i32 to vector<1x256xi32>
    %23 = arith.cmpi slt, %21, %22 : vector<1x256xi32>
    %24 = arith.andi %19, %23 : vector<1x256xi1>
    %c-2_i32 = arith.constant -2 : i32
    %25 = vector.broadcast %c-2_i32 : i32 to vector<1x256xi32>
    %26 = arith.addi %5, %25 : vector<1x256xi32>
    %c0_i32_13 = arith.constant 0 : i32
    %27 = vector.broadcast %c0_i32_13 : i32 to vector<1x256xi32>
    %28 = arith.cmpi sge, %26, %27 : vector<1x256xi32>
    %c-2_i32_14 = arith.constant -2 : i32
    %29 = vector.broadcast %c-2_i32_14 : i32 to vector<1x256xi32>
    %30 = arith.addi %5, %29 : vector<1x256xi32>
    %c16_i32_15 = arith.constant 16 : i32
    %31 = vector.broadcast %c16_i32_15 : i32 to vector<1x256xi32>
    %32 = arith.cmpi slt, %30, %31 : vector<1x256xi32>
    %33 = arith.andi %28, %32 : vector<1x256xi1>
    %c-2_i32_16 = arith.constant -2 : i32
    %34 = vector.broadcast %c-2_i32_16 : i32 to vector<1x256xi32>
    %35 = arith.addi %6, %34 : vector<1x256xi32>
    %c0_i32_17 = arith.constant 0 : i32
    %36 = vector.broadcast %c0_i32_17 : i32 to vector<1x256xi32>
    %37 = arith.cmpi sge, %35, %36 : vector<1x256xi32>
    %c-2_i32_18 = arith.constant -2 : i32
    %38 = vector.broadcast %c-2_i32_18 : i32 to vector<1x256xi32>
    %39 = arith.addi %6, %38 : vector<1x256xi32>
    %c16_i32_19 = arith.constant 16 : i32
    %40 = vector.broadcast %c16_i32_19 : i32 to vector<1x256xi32>
    %41 = arith.cmpi slt, %39, %40 : vector<1x256xi32>
    %42 = arith.andi %37, %41 : vector<1x256xi1>
    %c-1_i32 = arith.constant -1 : i32
    %43 = vector.broadcast %c-1_i32 : i32 to vector<1x256xi32>
    %44 = arith.addi %5, %43 : vector<1x256xi32>
    %c0_i32_20 = arith.constant 0 : i32
    %45 = vector.broadcast %c0_i32_20 : i32 to vector<1x256xi32>
    %46 = arith.cmpi sge, %44, %45 : vector<1x256xi32>
    %c-1_i32_21 = arith.constant -1 : i32
    %47 = vector.broadcast %c-1_i32_21 : i32 to vector<1x256xi32>
    %48 = arith.addi %5, %47 : vector<1x256xi32>
    %c16_i32_22 = arith.constant 16 : i32
    %49 = vector.broadcast %c16_i32_22 : i32 to vector<1x256xi32>
    %50 = arith.cmpi slt, %48, %49 : vector<1x256xi32>
    %51 = arith.andi %46, %50 : vector<1x256xi1>
    %c-1_i32_23 = arith.constant -1 : i32
    %52 = vector.broadcast %c-1_i32_23 : i32 to vector<1x256xi32>
    %53 = arith.addi %6, %52 : vector<1x256xi32>
    %c0_i32_24 = arith.constant 0 : i32
    %54 = vector.broadcast %c0_i32_24 : i32 to vector<1x256xi32>
    %55 = arith.cmpi sge, %53, %54 : vector<1x256xi32>
    %c-1_i32_25 = arith.constant -1 : i32
    %56 = vector.broadcast %c-1_i32_25 : i32 to vector<1x256xi32>
    %57 = arith.addi %6, %56 : vector<1x256xi32>
    %c16_i32_26 = arith.constant 16 : i32
    %58 = vector.broadcast %c16_i32_26 : i32 to vector<1x256xi32>
    %59 = arith.cmpi slt, %57, %58 : vector<1x256xi32>
    %60 = arith.andi %55, %59 : vector<1x256xi1>
    %c0_i32_27 = arith.constant 0 : i32
    %61 = vector.broadcast %c0_i32_27 : i32 to vector<1x256xi32>
    %62 = arith.addi %5, %61 : vector<1x256xi32>
    %c0_i32_28 = arith.constant 0 : i32
    %63 = vector.broadcast %c0_i32_28 : i32 to vector<1x256xi32>
    %64 = arith.cmpi sge, %62, %63 : vector<1x256xi32>
    %c0_i32_29 = arith.constant 0 : i32
    %65 = vector.broadcast %c0_i32_29 : i32 to vector<1x256xi32>
    %66 = arith.addi %5, %65 : vector<1x256xi32>
    %c16_i32_30 = arith.constant 16 : i32
    %67 = vector.broadcast %c16_i32_30 : i32 to vector<1x256xi32>
    %68 = arith.cmpi slt, %66, %67 : vector<1x256xi32>
    %69 = arith.andi %64, %68 : vector<1x256xi1>
    %c0_i32_31 = arith.constant 0 : i32
    %70 = vector.broadcast %c0_i32_31 : i32 to vector<1x256xi32>
    %71 = arith.addi %6, %70 : vector<1x256xi32>
    %c0_i32_32 = arith.constant 0 : i32
    %72 = vector.broadcast %c0_i32_32 : i32 to vector<1x256xi32>
    %73 = arith.cmpi sge, %71, %72 : vector<1x256xi32>
    %c0_i32_33 = arith.constant 0 : i32
    %74 = vector.broadcast %c0_i32_33 : i32 to vector<1x256xi32>
    %75 = arith.addi %6, %74 : vector<1x256xi32>
    %c16_i32_34 = arith.constant 16 : i32
    %76 = vector.broadcast %c16_i32_34 : i32 to vector<1x256xi32>
    %77 = arith.cmpi slt, %75, %76 : vector<1x256xi32>
    %78 = arith.andi %73, %77 : vector<1x256xi1>
    %c1_i32 = arith.constant 1 : i32
    %79 = vector.broadcast %c1_i32 : i32 to vector<1x256xi32>
    %80 = arith.addi %5, %79 : vector<1x256xi32>
    %c0_i32_35 = arith.constant 0 : i32
    %81 = vector.broadcast %c0_i32_35 : i32 to vector<1x256xi32>
    %82 = arith.cmpi sge, %80, %81 : vector<1x256xi32>
    %c1_i32_36 = arith.constant 1 : i32
    %83 = vector.broadcast %c1_i32_36 : i32 to vector<1x256xi32>
    %84 = arith.addi %5, %83 : vector<1x256xi32>
    %c16_i32_37 = arith.constant 16 : i32
    %85 = vector.broadcast %c16_i32_37 : i32 to vector<1x256xi32>
    %86 = arith.cmpi slt, %84, %85 : vector<1x256xi32>
    %87 = arith.andi %82, %86 : vector<1x256xi1>
    %c1_i32_38 = arith.constant 1 : i32
    %88 = vector.broadcast %c1_i32_38 : i32 to vector<1x256xi32>
    %89 = arith.addi %6, %88 : vector<1x256xi32>
    %c0_i32_39 = arith.constant 0 : i32
    %90 = vector.broadcast %c0_i32_39 : i32 to vector<1x256xi32>
    %91 = arith.cmpi sge, %89, %90 : vector<1x256xi32>
    %c1_i32_40 = arith.constant 1 : i32
    %92 = vector.broadcast %c1_i32_40 : i32 to vector<1x256xi32>
    %93 = arith.addi %6, %92 : vector<1x256xi32>
    %c16_i32_41 = arith.constant 16 : i32
    %94 = vector.broadcast %c16_i32_41 : i32 to vector<1x256xi32>
    %95 = arith.cmpi slt, %93, %94 : vector<1x256xi32>
    %96 = arith.andi %91, %95 : vector<1x256xi1>
    %c2_i32 = arith.constant 2 : i32
    %97 = vector.broadcast %c2_i32 : i32 to vector<1x256xi32>
    %98 = arith.addi %5, %97 : vector<1x256xi32>
    %c0_i32_42 = arith.constant 0 : i32
    %99 = vector.broadcast %c0_i32_42 : i32 to vector<1x256xi32>
    %100 = arith.cmpi sge, %98, %99 : vector<1x256xi32>
    %c2_i32_43 = arith.constant 2 : i32
    %101 = vector.broadcast %c2_i32_43 : i32 to vector<1x256xi32>
    %102 = arith.addi %5, %101 : vector<1x256xi32>
    %c16_i32_44 = arith.constant 16 : i32
    %103 = vector.broadcast %c16_i32_44 : i32 to vector<1x256xi32>
    %104 = arith.cmpi slt, %102, %103 : vector<1x256xi32>
    %105 = arith.andi %100, %104 : vector<1x256xi1>
    %c2_i32_45 = arith.constant 2 : i32
    %106 = vector.broadcast %c2_i32_45 : i32 to vector<1x256xi32>
    %107 = arith.addi %6, %106 : vector<1x256xi32>
    %c0_i32_46 = arith.constant 0 : i32
    %108 = vector.broadcast %c0_i32_46 : i32 to vector<1x256xi32>
    %109 = arith.cmpi sge, %107, %108 : vector<1x256xi32>
    %c2_i32_47 = arith.constant 2 : i32
    %110 = vector.broadcast %c2_i32_47 : i32 to vector<1x256xi32>
    %111 = arith.addi %6, %110 : vector<1x256xi32>
    %c16_i32_48 = arith.constant 16 : i32
    %112 = vector.broadcast %c16_i32_48 : i32 to vector<1x256xi32>
    %113 = arith.cmpi slt, %111, %112 : vector<1x256xi32>
    %114 = arith.andi %109, %113 : vector<1x256xi1>
    %c3_i32 = arith.constant 3 : i32
    %115 = vector.broadcast %c3_i32 : i32 to vector<1x256xi32>
    %116 = arith.addi %5, %115 : vector<1x256xi32>
    %c0_i32_49 = arith.constant 0 : i32
    %117 = vector.broadcast %c0_i32_49 : i32 to vector<1x256xi32>
    %118 = arith.cmpi sge, %116, %117 : vector<1x256xi32>
    %c3_i32_50 = arith.constant 3 : i32
    %119 = vector.broadcast %c3_i32_50 : i32 to vector<1x256xi32>
    %120 = arith.addi %5, %119 : vector<1x256xi32>
    %c16_i32_51 = arith.constant 16 : i32
    %121 = vector.broadcast %c16_i32_51 : i32 to vector<1x256xi32>
    %122 = arith.cmpi slt, %120, %121 : vector<1x256xi32>
    %123 = arith.andi %118, %122 : vector<1x256xi1>
    %c3_i32_52 = arith.constant 3 : i32
    %124 = vector.broadcast %c3_i32_52 : i32 to vector<1x256xi32>
    %125 = arith.addi %6, %124 : vector<1x256xi32>
    %c0_i32_53 = arith.constant 0 : i32
    %126 = vector.broadcast %c0_i32_53 : i32 to vector<1x256xi32>
    %127 = arith.cmpi sge, %125, %126 : vector<1x256xi32>
    %c3_i32_54 = arith.constant 3 : i32
    %128 = vector.broadcast %c3_i32_54 : i32 to vector<1x256xi32>
    %129 = arith.addi %6, %128 : vector<1x256xi32>
    %c16_i32_55 = arith.constant 16 : i32
    %130 = vector.broadcast %c16_i32_55 : i32 to vector<1x256xi32>
    %131 = arith.cmpi slt, %129, %130 : vector<1x256xi32>
    %132 = arith.andi %127, %131 : vector<1x256xi1>
    %c0_56 = arith.constant 0 : index
    %133 = memref.load %arg1[%c0_56] : memref<98xf32, #tpu.memory_space<smem>>
    %c1 = arith.constant 1 : index
    %134 = memref.load %arg1[%c1] : memref<98xf32, #tpu.memory_space<smem>>
    %c2 = arith.constant 2 : index
    %135 = memref.load %arg1[%c2] : memref<98xf32, #tpu.memory_space<smem>>
    %c3 = arith.constant 3 : index
    %136 = memref.load %arg1[%c3] : memref<98xf32, #tpu.memory_space<smem>>
    %c4 = arith.constant 4 : index
    %137 = memref.load %arg1[%c4] : memref<98xf32, #tpu.memory_space<smem>>
    %c5 = arith.constant 5 : index
    %138 = memref.load %arg1[%c5] : memref<98xf32, #tpu.memory_space<smem>>
    %c6 = arith.constant 6 : index
    %139 = memref.load %arg1[%c6] : memref<98xf32, #tpu.memory_space<smem>>
    %c7 = arith.constant 7 : index
    %140 = memref.load %arg1[%c7] : memref<98xf32, #tpu.memory_space<smem>>
    %c8 = arith.constant 8 : index
    %141 = memref.load %arg1[%c8] : memref<98xf32, #tpu.memory_space<smem>>
    %c9 = arith.constant 9 : index
    %142 = memref.load %arg1[%c9] : memref<98xf32, #tpu.memory_space<smem>>
    %c10 = arith.constant 10 : index
    %143 = memref.load %arg1[%c10] : memref<98xf32, #tpu.memory_space<smem>>
    %c11 = arith.constant 11 : index
    %144 = memref.load %arg1[%c11] : memref<98xf32, #tpu.memory_space<smem>>
    %c12 = arith.constant 12 : index
    %145 = memref.load %arg1[%c12] : memref<98xf32, #tpu.memory_space<smem>>
    %c13 = arith.constant 13 : index
    %146 = memref.load %arg1[%c13] : memref<98xf32, #tpu.memory_space<smem>>
    %c14 = arith.constant 14 : index
    %147 = memref.load %arg1[%c14] : memref<98xf32, #tpu.memory_space<smem>>
    %c15 = arith.constant 15 : index
    %148 = memref.load %arg1[%c15] : memref<98xf32, #tpu.memory_space<smem>>
    %c16 = arith.constant 16 : index
    %149 = memref.load %arg1[%c16] : memref<98xf32, #tpu.memory_space<smem>>
    %c17 = arith.constant 17 : index
    %150 = memref.load %arg1[%c17] : memref<98xf32, #tpu.memory_space<smem>>
    %c18 = arith.constant 18 : index
    %151 = memref.load %arg1[%c18] : memref<98xf32, #tpu.memory_space<smem>>
    %c19 = arith.constant 19 : index
    %152 = memref.load %arg1[%c19] : memref<98xf32, #tpu.memory_space<smem>>
    %c20 = arith.constant 20 : index
    %153 = memref.load %arg1[%c20] : memref<98xf32, #tpu.memory_space<smem>>
    %c21 = arith.constant 21 : index
    %154 = memref.load %arg1[%c21] : memref<98xf32, #tpu.memory_space<smem>>
    %c22 = arith.constant 22 : index
    %155 = memref.load %arg1[%c22] : memref<98xf32, #tpu.memory_space<smem>>
    %c23 = arith.constant 23 : index
    %156 = memref.load %arg1[%c23] : memref<98xf32, #tpu.memory_space<smem>>
    %c24 = arith.constant 24 : index
    %157 = memref.load %arg1[%c24] : memref<98xf32, #tpu.memory_space<smem>>
    %c25 = arith.constant 25 : index
    %158 = memref.load %arg1[%c25] : memref<98xf32, #tpu.memory_space<smem>>
    %c26 = arith.constant 26 : index
    %159 = memref.load %arg1[%c26] : memref<98xf32, #tpu.memory_space<smem>>
    %c27 = arith.constant 27 : index
    %160 = memref.load %arg1[%c27] : memref<98xf32, #tpu.memory_space<smem>>
    %c28 = arith.constant 28 : index
    %161 = memref.load %arg1[%c28] : memref<98xf32, #tpu.memory_space<smem>>
    %c29 = arith.constant 29 : index
    %162 = memref.load %arg1[%c29] : memref<98xf32, #tpu.memory_space<smem>>
    %c30 = arith.constant 30 : index
    %163 = memref.load %arg1[%c30] : memref<98xf32, #tpu.memory_space<smem>>
    %c31 = arith.constant 31 : index
    %164 = memref.load %arg1[%c31] : memref<98xf32, #tpu.memory_space<smem>>
    %c32 = arith.constant 32 : index
    %165 = memref.load %arg1[%c32] : memref<98xf32, #tpu.memory_space<smem>>
    %c33 = arith.constant 33 : index
    %166 = memref.load %arg1[%c33] : memref<98xf32, #tpu.memory_space<smem>>
    %c34 = arith.constant 34 : index
    %167 = memref.load %arg1[%c34] : memref<98xf32, #tpu.memory_space<smem>>
    %c35 = arith.constant 35 : index
    %168 = memref.load %arg1[%c35] : memref<98xf32, #tpu.memory_space<smem>>
    %c36 = arith.constant 36 : index
    %169 = memref.load %arg1[%c36] : memref<98xf32, #tpu.memory_space<smem>>
    %c37 = arith.constant 37 : index
    %170 = memref.load %arg1[%c37] : memref<98xf32, #tpu.memory_space<smem>>
    %c38 = arith.constant 38 : index
    %171 = memref.load %arg1[%c38] : memref<98xf32, #tpu.memory_space<smem>>
    %c39 = arith.constant 39 : index
    %172 = memref.load %arg1[%c39] : memref<98xf32, #tpu.memory_space<smem>>
    %c40 = arith.constant 40 : index
    %173 = memref.load %arg1[%c40] : memref<98xf32, #tpu.memory_space<smem>>
    %c41 = arith.constant 41 : index
    %174 = memref.load %arg1[%c41] : memref<98xf32, #tpu.memory_space<smem>>
    %c42 = arith.constant 42 : index
    %175 = memref.load %arg1[%c42] : memref<98xf32, #tpu.memory_space<smem>>
    %c43 = arith.constant 43 : index
    %176 = memref.load %arg1[%c43] : memref<98xf32, #tpu.memory_space<smem>>
    %c44 = arith.constant 44 : index
    %177 = memref.load %arg1[%c44] : memref<98xf32, #tpu.memory_space<smem>>
    %c45 = arith.constant 45 : index
    %178 = memref.load %arg1[%c45] : memref<98xf32, #tpu.memory_space<smem>>
    %c46 = arith.constant 46 : index
    %179 = memref.load %arg1[%c46] : memref<98xf32, #tpu.memory_space<smem>>
    %c47 = arith.constant 47 : index
    %180 = memref.load %arg1[%c47] : memref<98xf32, #tpu.memory_space<smem>>
    %c48 = arith.constant 48 : index
    %181 = memref.load %arg1[%c48] : memref<98xf32, #tpu.memory_space<smem>>
    %c49 = arith.constant 49 : index
    %182 = memref.load %arg1[%c49] : memref<98xf32, #tpu.memory_space<smem>>
    %c50 = arith.constant 50 : index
    %183 = memref.load %arg1[%c50] : memref<98xf32, #tpu.memory_space<smem>>
    %c51 = arith.constant 51 : index
    %184 = memref.load %arg1[%c51] : memref<98xf32, #tpu.memory_space<smem>>
    %c52 = arith.constant 52 : index
    %185 = memref.load %arg1[%c52] : memref<98xf32, #tpu.memory_space<smem>>
    %c53 = arith.constant 53 : index
    %186 = memref.load %arg1[%c53] : memref<98xf32, #tpu.memory_space<smem>>
    %c54 = arith.constant 54 : index
    %187 = memref.load %arg1[%c54] : memref<98xf32, #tpu.memory_space<smem>>
    %c55 = arith.constant 55 : index
    %188 = memref.load %arg1[%c55] : memref<98xf32, #tpu.memory_space<smem>>
    %c56 = arith.constant 56 : index
    %189 = memref.load %arg1[%c56] : memref<98xf32, #tpu.memory_space<smem>>
    %c57 = arith.constant 57 : index
    %190 = memref.load %arg1[%c57] : memref<98xf32, #tpu.memory_space<smem>>
    %c58 = arith.constant 58 : index
    %191 = memref.load %arg1[%c58] : memref<98xf32, #tpu.memory_space<smem>>
    %c59 = arith.constant 59 : index
    %192 = memref.load %arg1[%c59] : memref<98xf32, #tpu.memory_space<smem>>
    %c60 = arith.constant 60 : index
    %193 = memref.load %arg1[%c60] : memref<98xf32, #tpu.memory_space<smem>>
    %c61 = arith.constant 61 : index
    %194 = memref.load %arg1[%c61] : memref<98xf32, #tpu.memory_space<smem>>
    %c62 = arith.constant 62 : index
    %195 = memref.load %arg1[%c62] : memref<98xf32, #tpu.memory_space<smem>>
    %c63 = arith.constant 63 : index
    %196 = memref.load %arg1[%c63] : memref<98xf32, #tpu.memory_space<smem>>
    %c64 = arith.constant 64 : index
    %197 = memref.load %arg1[%c64] : memref<98xf32, #tpu.memory_space<smem>>
    %c65 = arith.constant 65 : index
    %198 = memref.load %arg1[%c65] : memref<98xf32, #tpu.memory_space<smem>>
    %c66 = arith.constant 66 : index
    %199 = memref.load %arg1[%c66] : memref<98xf32, #tpu.memory_space<smem>>
    %c67 = arith.constant 67 : index
    %200 = memref.load %arg1[%c67] : memref<98xf32, #tpu.memory_space<smem>>
    %c68 = arith.constant 68 : index
    %201 = memref.load %arg1[%c68] : memref<98xf32, #tpu.memory_space<smem>>
    %c69 = arith.constant 69 : index
    %202 = memref.load %arg1[%c69] : memref<98xf32, #tpu.memory_space<smem>>
    %c70 = arith.constant 70 : index
    %203 = memref.load %arg1[%c70] : memref<98xf32, #tpu.memory_space<smem>>
    %c71 = arith.constant 71 : index
    %204 = memref.load %arg1[%c71] : memref<98xf32, #tpu.memory_space<smem>>
    %c72 = arith.constant 72 : index
    %205 = memref.load %arg1[%c72] : memref<98xf32, #tpu.memory_space<smem>>
    %c73 = arith.constant 73 : index
    %206 = memref.load %arg1[%c73] : memref<98xf32, #tpu.memory_space<smem>>
    %c74 = arith.constant 74 : index
    %207 = memref.load %arg1[%c74] : memref<98xf32, #tpu.memory_space<smem>>
    %c75 = arith.constant 75 : index
    %208 = memref.load %arg1[%c75] : memref<98xf32, #tpu.memory_space<smem>>
    %c76 = arith.constant 76 : index
    %209 = memref.load %arg1[%c76] : memref<98xf32, #tpu.memory_space<smem>>
    %c77 = arith.constant 77 : index
    %210 = memref.load %arg1[%c77] : memref<98xf32, #tpu.memory_space<smem>>
    %c78 = arith.constant 78 : index
    %211 = memref.load %arg1[%c78] : memref<98xf32, #tpu.memory_space<smem>>
    %c79 = arith.constant 79 : index
    %212 = memref.load %arg1[%c79] : memref<98xf32, #tpu.memory_space<smem>>
    %c80 = arith.constant 80 : index
    %213 = memref.load %arg1[%c80] : memref<98xf32, #tpu.memory_space<smem>>
    %c81 = arith.constant 81 : index
    %214 = memref.load %arg1[%c81] : memref<98xf32, #tpu.memory_space<smem>>
    %c82 = arith.constant 82 : index
    %215 = memref.load %arg1[%c82] : memref<98xf32, #tpu.memory_space<smem>>
    %c83 = arith.constant 83 : index
    %216 = memref.load %arg1[%c83] : memref<98xf32, #tpu.memory_space<smem>>
    %c84 = arith.constant 84 : index
    %217 = memref.load %arg1[%c84] : memref<98xf32, #tpu.memory_space<smem>>
    %c85 = arith.constant 85 : index
    %218 = memref.load %arg1[%c85] : memref<98xf32, #tpu.memory_space<smem>>
    %c86 = arith.constant 86 : index
    %219 = memref.load %arg1[%c86] : memref<98xf32, #tpu.memory_space<smem>>
    %c87 = arith.constant 87 : index
    %220 = memref.load %arg1[%c87] : memref<98xf32, #tpu.memory_space<smem>>
    %c88 = arith.constant 88 : index
    %221 = memref.load %arg1[%c88] : memref<98xf32, #tpu.memory_space<smem>>
    %c89 = arith.constant 89 : index
    %222 = memref.load %arg1[%c89] : memref<98xf32, #tpu.memory_space<smem>>
    %c90 = arith.constant 90 : index
    %223 = memref.load %arg1[%c90] : memref<98xf32, #tpu.memory_space<smem>>
    %c91 = arith.constant 91 : index
    %224 = memref.load %arg1[%c91] : memref<98xf32, #tpu.memory_space<smem>>
    %c92 = arith.constant 92 : index
    %225 = memref.load %arg1[%c92] : memref<98xf32, #tpu.memory_space<smem>>
    %c93 = arith.constant 93 : index
    %226 = memref.load %arg1[%c93] : memref<98xf32, #tpu.memory_space<smem>>
    %c94 = arith.constant 94 : index
    %227 = memref.load %arg1[%c94] : memref<98xf32, #tpu.memory_space<smem>>
    %c95 = arith.constant 95 : index
    %228 = memref.load %arg1[%c95] : memref<98xf32, #tpu.memory_space<smem>>
    %c96 = arith.constant 96 : index
    %229 = memref.load %arg1[%c96] : memref<98xf32, #tpu.memory_space<smem>>
    %c97 = arith.constant 97 : index
    %230 = memref.load %arg1[%c97] : memref<98xf32, #tpu.memory_space<smem>>
    %cst_57 = arith.constant 0.000000e+00 : f32
    %231 = vector.broadcast %cst_57 : f32 to vector<2x256xf32>
    %c51_i32 = arith.constant 51 : i32
    %232 = tpu.dynamic_rotate %3 by %c51_i32 dim 1 : vector<2x256xf32>, i32 -> vector<2x256xf32>
    %c51_i32_58 = arith.constant 51 : i32
    %233 = tpu.dynamic_rotate %4 by %c51_i32_58 dim 1 : vector<2x256xf32>, i32 -> vector<2x256xf32>
    %234 = vector.broadcast %133 : f32 to vector<2x256xf32>
    %235 = arith.mulf %234, %232 : vector<2x256xf32>
    %236 = vector.broadcast %182 : f32 to vector<2x256xf32>
    %237 = arith.mulf %236, %233 : vector<2x256xf32>
    %238 = arith.addf %235, %237 : vector<2x256xf32>
    %239 = arith.andi %15, %24 : vector<1x256xi1>
    %cst_59 = arith.constant 0.000000e+00 : f32
    %240 = vector.shape_cast %239 : vector<1x256xi1> to vector<1x256xi1>
    %241 = vector.broadcast %240 : vector<1x256xi1> to vector<2x256xi1>
    %242 = vector.broadcast %cst_59 : f32 to vector<2x256xf32>
    %243 = arith.select %241, %238, %242 : vector<2x256xi1>, vector<2x256xf32>
    %244 = arith.addf %231, %243 : vector<2x256xf32>
    %c50_i32 = arith.constant 50 : i32
    %245 = tpu.dynamic_rotate %3 by %c50_i32 dim 1 : vector<2x256xf32>, i32 -> vector<2x256xf32>
    %c50_i32_60 = arith.constant 50 : i32
    %246 = tpu.dynamic_rotate %4 by %c50_i32_60 dim 1 : vector<2x256xf32>, i32 -> vector<2x256xf32>
    %247 = vector.broadcast %134 : f32 to vector<2x256xf32>
    %248 = arith.mulf %247, %245 : vector<2x256xf32>
    %249 = vector.broadcast %183 : f32 to vector<2x256xf32>
    %250 = arith.mulf %249, %246 : vector<2x256xf32>
    %251 = arith.addf %248, %250 : vector<2x256xf32>
    %252 = arith.andi %15, %42 : vector<1x256xi1>
    %cst_61 = arith.constant 0.000000e+00 : f32
    %253 = vector.shape_cast %252 : vector<1x256xi1> to vector<1x256xi1>
    %254 = vector.broadcast %253 : vector<1x256xi1> to vector<2x256xi1>
    %255 = vector.broadcast %cst_61 : f32 to vector<2x256xf32>
    %256 = arith.select %254, %251, %255 : vector<2x256xi1>, vector<2x256xf32>
    %257 = arith.addf %244, %256 : vector<2x256xf32>
    %c49_i32 = arith.constant 49 : i32
    %258 = tpu.dynamic_rotate %3 by %c49_i32 dim 1 : vector<2x256xf32>, i32 -> vector<2x256xf32>
    %c49_i32_62 = arith.constant 49 : i32
    %259 = tpu.dynamic_rotate %4 by %c49_i32_62 dim 1 : vector<2x256xf32>, i32 -> vector<2x256xf32>
    %260 = vector.broadcast %135 : f32 to vector<2x256xf32>
    %261 = arith.mulf %260, %258 : vector<2x256xf32>
    %262 = vector.broadcast %184 : f32 to vector<2x256xf32>
    %263 = arith.mulf %262, %259 : vector<2x256xf32>
    %264 = arith.addf %261, %263 : vector<2x256xf32>
    %265 = arith.andi %15, %60 : vector<1x256xi1>
    %cst_63 = arith.constant 0.000000e+00 : f32
    %266 = vector.shape_cast %265 : vector<1x256xi1> to vector<1x256xi1>
    %267 = vector.broadcast %266 : vector<1x256xi1> to vector<2x256xi1>
    %268 = vector.broadcast %cst_63 : f32 to vector<2x256xf32>
    %269 = arith.select %267, %264, %268 : vector<2x256xi1>, vector<2x256xf32>
    %270 = arith.addf %257, %269 : vector<2x256xf32>
    %c48_i32 = arith.constant 48 : i32
    %271 = tpu.dynamic_rotate %3 by %c48_i32 dim 1 : vector<2x256xf32>, i32 -> vector<2x256xf32>
    %c48_i32_64 = arith.constant 48 : i32
    %272 = tpu.dynamic_rotate %4 by %c48_i32_64 dim 1 : vector<2x256xf32>, i32 -> vector<2x256xf32>
    %273 = vector.broadcast %136 : f32 to vector<2x256xf32>
    %274 = arith.mulf %273, %271 : vector<2x256xf32>
    %275 = vector.broadcast %185 : f32 to vector<2x256xf32>
    %276 = arith.mulf %275, %272 : vector<2x256xf32>
    %277 = arith.addf %274, %276 : vector<2x256xf32>
    %278 = arith.andi %15, %78 : vector<1x256xi1>
    %cst_65 = arith.constant 0.000000e+00 : f32
    %279 = vector.shape_cast %278 : vector<1x256xi1> to vector<1x256xi1>
    %280 = vector.broadcast %279 : vector<1x256xi1> to vector<2x256xi1>
    %281 = vector.broadcast %cst_65 : f32 to vector<2x256xf32>
    %282 = arith.select %280, %277, %281 : vector<2x256xi1>, vector<2x256xf32>
    %283 = arith.addf %270, %282 : vector<2x256xf32>
    %c47_i32 = arith.constant 47 : i32
    %284 = tpu.dynamic_rotate %3 by %c47_i32 dim 1 : vector<2x256xf32>, i32 -> vector<2x256xf32>
    %c47_i32_66 = arith.constant 47 : i32
    %285 = tpu.dynamic_rotate %4 by %c47_i32_66 dim 1 : vector<2x256xf32>, i32 -> vector<2x256xf32>
    %286 = vector.broadcast %137 : f32 to vector<2x256xf32>
    %287 = arith.mulf %286, %284 : vector<2x256xf32>
    %288 = vector.broadcast %186 : f32 to vector<2x256xf32>
    %289 = arith.mulf %288, %285 : vector<2x256xf32>
    %290 = arith.addf %287, %289 : vector<2x256xf32>
    %291 = arith.andi %15, %96 : vector<1x256xi1>
    %cst_67 = arith.constant 0.000000e+00 : f32
    %292 = vector.shape_cast %291 : vector<1x256xi1> to vector<1x256xi1>
    %293 = vector.broadcast %292 : vector<1x256xi1> to vector<2x256xi1>
    %294 = vector.broadcast %cst_67 : f32 to vector<2x256xf32>
    %295 = arith.select %293, %290, %294 : vector<2x256xi1>, vector<2x256xf32>
    %296 = arith.addf %283, %295 : vector<2x256xf32>
    %c46_i32 = arith.constant 46 : i32
    %297 = tpu.dynamic_rotate %3 by %c46_i32 dim 1 : vector<2x256xf32>, i32 -> vector<2x256xf32>
    %c46_i32_68 = arith.constant 46 : i32
    %298 = tpu.dynamic_rotate %4 by %c46_i32_68 dim 1 : vector<2x256xf32>, i32 -> vector<2x256xf32>
    %299 = vector.broadcast %138 : f32 to vector<2x256xf32>
    %300 = arith.mulf %299, %297 : vector<2x256xf32>
    %301 = vector.broadcast %187 : f32 to vector<2x256xf32>
    %302 = arith.mulf %301, %298 : vector<2x256xf32>
    %303 = arith.addf %300, %302 : vector<2x256xf32>
    %304 = arith.andi %15, %114 : vector<1x256xi1>
    %cst_69 = arith.constant 0.000000e+00 : f32
    %305 = vector.shape_cast %304 : vector<1x256xi1> to vector<1x256xi1>
    %306 = vector.broadcast %305 : vector<1x256xi1> to vector<2x256xi1>
    %307 = vector.broadcast %cst_69 : f32 to vector<2x256xf32>
    %308 = arith.select %306, %303, %307 : vector<2x256xi1>, vector<2x256xf32>
    %309 = arith.addf %296, %308 : vector<2x256xf32>
    %c45_i32 = arith.constant 45 : i32
    %310 = tpu.dynamic_rotate %3 by %c45_i32 dim 1 : vector<2x256xf32>, i32 -> vector<2x256xf32>
    %c45_i32_70 = arith.constant 45 : i32
    %311 = tpu.dynamic_rotate %4 by %c45_i32_70 dim 1 : vector<2x256xf32>, i32 -> vector<2x256xf32>
    %312 = vector.broadcast %139 : f32 to vector<2x256xf32>
    %313 = arith.mulf %312, %310 : vector<2x256xf32>
    %314 = vector.broadcast %188 : f32 to vector<2x256xf32>
    %315 = arith.mulf %314, %311 : vector<2x256xf32>
    %316 = arith.addf %313, %315 : vector<2x256xf32>
    %317 = arith.andi %15, %132 : vector<1x256xi1>
    %cst_71 = arith.constant 0.000000e+00 : f32
    %318 = vector.shape_cast %317 : vector<1x256xi1> to vector<1x256xi1>
    %319 = vector.broadcast %318 : vector<1x256xi1> to vector<2x256xi1>
    %320 = vector.broadcast %cst_71 : f32 to vector<2x256xf32>
    %321 = arith.select %319, %316, %320 : vector<2x256xi1>, vector<2x256xf32>
    %322 = arith.addf %309, %321 : vector<2x256xf32>
    %c35_i32 = arith.constant 35 : i32
    %323 = tpu.dynamic_rotate %3 by %c35_i32 dim 1 : vector<2x256xf32>, i32 -> vector<2x256xf32>
    %c35_i32_72 = arith.constant 35 : i32
    %324 = tpu.dynamic_rotate %4 by %c35_i32_72 dim 1 : vector<2x256xf32>, i32 -> vector<2x256xf32>
    %325 = vector.broadcast %140 : f32 to vector<2x256xf32>
    %326 = arith.mulf %325, %323 : vector<2x256xf32>
    %327 = vector.broadcast %189 : f32 to vector<2x256xf32>
    %328 = arith.mulf %327, %324 : vector<2x256xf32>
    %329 = arith.addf %326, %328 : vector<2x256xf32>
    %330 = arith.andi %33, %24 : vector<1x256xi1>
    %cst_73 = arith.constant 0.000000e+00 : f32
    %331 = vector.shape_cast %330 : vector<1x256xi1> to vector<1x256xi1>
    %332 = vector.broadcast %331 : vector<1x256xi1> to vector<2x256xi1>
    %333 = vector.broadcast %cst_73 : f32 to vector<2x256xf32>
    %334 = arith.select %332, %329, %333 : vector<2x256xi1>, vector<2x256xf32>
    %335 = arith.addf %322, %334 : vector<2x256xf32>
    %c34_i32 = arith.constant 34 : i32
    %336 = tpu.dynamic_rotate %3 by %c34_i32 dim 1 : vector<2x256xf32>, i32 -> vector<2x256xf32>
    %c34_i32_74 = arith.constant 34 : i32
    %337 = tpu.dynamic_rotate %4 by %c34_i32_74 dim 1 : vector<2x256xf32>, i32 -> vector<2x256xf32>
    %338 = vector.broadcast %141 : f32 to vector<2x256xf32>
    %339 = arith.mulf %338, %336 : vector<2x256xf32>
    %340 = vector.broadcast %190 : f32 to vector<2x256xf32>
    %341 = arith.mulf %340, %337 : vector<2x256xf32>
    %342 = arith.addf %339, %341 : vector<2x256xf32>
    %343 = arith.andi %33, %42 : vector<1x256xi1>
    %cst_75 = arith.constant 0.000000e+00 : f32
    %344 = vector.shape_cast %343 : vector<1x256xi1> to vector<1x256xi1>
    %345 = vector.broadcast %344 : vector<1x256xi1> to vector<2x256xi1>
    %346 = vector.broadcast %cst_75 : f32 to vector<2x256xf32>
    %347 = arith.select %345, %342, %346 : vector<2x256xi1>, vector<2x256xf32>
    %348 = arith.addf %335, %347 : vector<2x256xf32>
    %c33_i32 = arith.constant 33 : i32
    %349 = tpu.dynamic_rotate %3 by %c33_i32 dim 1 : vector<2x256xf32>, i32 -> vector<2x256xf32>
    %c33_i32_76 = arith.constant 33 : i32
    %350 = tpu.dynamic_rotate %4 by %c33_i32_76 dim 1 : vector<2x256xf32>, i32 -> vector<2x256xf32>
    %351 = vector.broadcast %142 : f32 to vector<2x256xf32>
    %352 = arith.mulf %351, %349 : vector<2x256xf32>
    %353 = vector.broadcast %191 : f32 to vector<2x256xf32>
    %354 = arith.mulf %353, %350 : vector<2x256xf32>
    %355 = arith.addf %352, %354 : vector<2x256xf32>
    %356 = arith.andi %33, %60 : vector<1x256xi1>
    %cst_77 = arith.constant 0.000000e+00 : f32
    %357 = vector.shape_cast %356 : vector<1x256xi1> to vector<1x256xi1>
    %358 = vector.broadcast %357 : vector<1x256xi1> to vector<2x256xi1>
    %359 = vector.broadcast %cst_77 : f32 to vector<2x256xf32>
    %360 = arith.select %358, %355, %359 : vector<2x256xi1>, vector<2x256xf32>
    %361 = arith.addf %348, %360 : vector<2x256xf32>
    %c32_i32 = arith.constant 32 : i32
    %362 = tpu.dynamic_rotate %3 by %c32_i32 dim 1 : vector<2x256xf32>, i32 -> vector<2x256xf32>
    %c32_i32_78 = arith.constant 32 : i32
    %363 = tpu.dynamic_rotate %4 by %c32_i32_78 dim 1 : vector<2x256xf32>, i32 -> vector<2x256xf32>
    %364 = vector.broadcast %143 : f32 to vector<2x256xf32>
    %365 = arith.mulf %364, %362 : vector<2x256xf32>
    %366 = vector.broadcast %192 : f32 to vector<2x256xf32>
    %367 = arith.mulf %366, %363 : vector<2x256xf32>
    %368 = arith.addf %365, %367 : vector<2x256xf32>
    %369 = arith.andi %33, %78 : vector<1x256xi1>
    %cst_79 = arith.constant 0.000000e+00 : f32
    %370 = vector.shape_cast %369 : vector<1x256xi1> to vector<1x256xi1>
    %371 = vector.broadcast %370 : vector<1x256xi1> to vector<2x256xi1>
    %372 = vector.broadcast %cst_79 : f32 to vector<2x256xf32>
    %373 = arith.select %371, %368, %372 : vector<2x256xi1>, vector<2x256xf32>
    %374 = arith.addf %361, %373 : vector<2x256xf32>
    %c31_i32 = arith.constant 31 : i32
    %375 = tpu.dynamic_rotate %3 by %c31_i32 dim 1 : vector<2x256xf32>, i32 -> vector<2x256xf32>
    %c31_i32_80 = arith.constant 31 : i32
    %376 = tpu.dynamic_rotate %4 by %c31_i32_80 dim 1 : vector<2x256xf32>, i32 -> vector<2x256xf32>
    %377 = vector.broadcast %144 : f32 to vector<2x256xf32>
    %378 = arith.mulf %377, %375 : vector<2x256xf32>
    %379 = vector.broadcast %193 : f32 to vector<2x256xf32>
    %380 = arith.mulf %379, %376 : vector<2x256xf32>
    %381 = arith.addf %378, %380 : vector<2x256xf32>
    %382 = arith.andi %33, %96 : vector<1x256xi1>
    %cst_81 = arith.constant 0.000000e+00 : f32
    %383 = vector.shape_cast %382 : vector<1x256xi1> to vector<1x256xi1>
    %384 = vector.broadcast %383 : vector<1x256xi1> to vector<2x256xi1>
    %385 = vector.broadcast %cst_81 : f32 to vector<2x256xf32>
    %386 = arith.select %384, %381, %385 : vector<2x256xi1>, vector<2x256xf32>
    %387 = arith.addf %374, %386 : vector<2x256xf32>
    %c30_i32 = arith.constant 30 : i32
    %388 = tpu.dynamic_rotate %3 by %c30_i32 dim 1 : vector<2x256xf32>, i32 -> vector<2x256xf32>
    %c30_i32_82 = arith.constant 30 : i32
    %389 = tpu.dynamic_rotate %4 by %c30_i32_82 dim 1 : vector<2x256xf32>, i32 -> vector<2x256xf32>
    %390 = vector.broadcast %145 : f32 to vector<2x256xf32>
    %391 = arith.mulf %390, %388 : vector<2x256xf32>
    %392 = vector.broadcast %194 : f32 to vector<2x256xf32>
    %393 = arith.mulf %392, %389 : vector<2x256xf32>
    %394 = arith.addf %391, %393 : vector<2x256xf32>
    %395 = arith.andi %33, %114 : vector<1x256xi1>
    %cst_83 = arith.constant 0.000000e+00 : f32
    %396 = vector.shape_cast %395 : vector<1x256xi1> to vector<1x256xi1>
    %397 = vector.broadcast %396 : vector<1x256xi1> to vector<2x256xi1>
    %398 = vector.broadcast %cst_83 : f32 to vector<2x256xf32>
    %399 = arith.select %397, %394, %398 : vector<2x256xi1>, vector<2x256xf32>
    %400 = arith.addf %387, %399 : vector<2x256xf32>
    %c29_i32 = arith.constant 29 : i32
    %401 = tpu.dynamic_rotate %3 by %c29_i32 dim 1 : vector<2x256xf32>, i32 -> vector<2x256xf32>
    %c29_i32_84 = arith.constant 29 : i32
    %402 = tpu.dynamic_rotate %4 by %c29_i32_84 dim 1 : vector<2x256xf32>, i32 -> vector<2x256xf32>
    %403 = vector.broadcast %146 : f32 to vector<2x256xf32>
    %404 = arith.mulf %403, %401 : vector<2x256xf32>
    %405 = vector.broadcast %195 : f32 to vector<2x256xf32>
    %406 = arith.mulf %405, %402 : vector<2x256xf32>
    %407 = arith.addf %404, %406 : vector<2x256xf32>
    %408 = arith.andi %33, %132 : vector<1x256xi1>
    %cst_85 = arith.constant 0.000000e+00 : f32
    %409 = vector.shape_cast %408 : vector<1x256xi1> to vector<1x256xi1>
    %410 = vector.broadcast %409 : vector<1x256xi1> to vector<2x256xi1>
    %411 = vector.broadcast %cst_85 : f32 to vector<2x256xf32>
    %412 = arith.select %410, %407, %411 : vector<2x256xi1>, vector<2x256xf32>
    %413 = arith.addf %400, %412 : vector<2x256xf32>
    %c19_i32 = arith.constant 19 : i32
    %414 = tpu.dynamic_rotate %3 by %c19_i32 dim 1 : vector<2x256xf32>, i32 -> vector<2x256xf32>
    %c19_i32_86 = arith.constant 19 : i32
    %415 = tpu.dynamic_rotate %4 by %c19_i32_86 dim 1 : vector<2x256xf32>, i32 -> vector<2x256xf32>
    %416 = vector.broadcast %147 : f32 to vector<2x256xf32>
    %417 = arith.mulf %416, %414 : vector<2x256xf32>
    %418 = vector.broadcast %196 : f32 to vector<2x256xf32>
    %419 = arith.mulf %418, %415 : vector<2x256xf32>
    %420 = arith.addf %417, %419 : vector<2x256xf32>
    %421 = arith.andi %51, %24 : vector<1x256xi1>
    %cst_87 = arith.constant 0.000000e+00 : f32
    %422 = vector.shape_cast %421 : vector<1x256xi1> to vector<1x256xi1>
    %423 = vector.broadcast %422 : vector<1x256xi1> to vector<2x256xi1>
    %424 = vector.broadcast %cst_87 : f32 to vector<2x256xf32>
    %425 = arith.select %423, %420, %424 : vector<2x256xi1>, vector<2x256xf32>
    %426 = arith.addf %413, %425 : vector<2x256xf32>
    %c18_i32 = arith.constant 18 : i32
    %427 = tpu.dynamic_rotate %3 by %c18_i32 dim 1 : vector<2x256xf32>, i32 -> vector<2x256xf32>
    %c18_i32_88 = arith.constant 18 : i32
    %428 = tpu.dynamic_rotate %4 by %c18_i32_88 dim 1 : vector<2x256xf32>, i32 -> vector<2x256xf32>
    %429 = vector.broadcast %148 : f32 to vector<2x256xf32>
    %430 = arith.mulf %429, %427 : vector<2x256xf32>
    %431 = vector.broadcast %197 : f32 to vector<2x256xf32>
    %432 = arith.mulf %431, %428 : vector<2x256xf32>
    %433 = arith.addf %430, %432 : vector<2x256xf32>
    %434 = arith.andi %51, %42 : vector<1x256xi1>
    %cst_89 = arith.constant 0.000000e+00 : f32
    %435 = vector.shape_cast %434 : vector<1x256xi1> to vector<1x256xi1>
    %436 = vector.broadcast %435 : vector<1x256xi1> to vector<2x256xi1>
    %437 = vector.broadcast %cst_89 : f32 to vector<2x256xf32>
    %438 = arith.select %436, %433, %437 : vector<2x256xi1>, vector<2x256xf32>
    %439 = arith.addf %426, %438 : vector<2x256xf32>
    %c17_i32 = arith.constant 17 : i32
    %440 = tpu.dynamic_rotate %3 by %c17_i32 dim 1 : vector<2x256xf32>, i32 -> vector<2x256xf32>
    %c17_i32_90 = arith.constant 17 : i32
    %441 = tpu.dynamic_rotate %4 by %c17_i32_90 dim 1 : vector<2x256xf32>, i32 -> vector<2x256xf32>
    %442 = vector.broadcast %149 : f32 to vector<2x256xf32>
    %443 = arith.mulf %442, %440 : vector<2x256xf32>
    %444 = vector.broadcast %198 : f32 to vector<2x256xf32>
    %445 = arith.mulf %444, %441 : vector<2x256xf32>
    %446 = arith.addf %443, %445 : vector<2x256xf32>
    %447 = arith.andi %51, %60 : vector<1x256xi1>
    %cst_91 = arith.constant 0.000000e+00 : f32
    %448 = vector.shape_cast %447 : vector<1x256xi1> to vector<1x256xi1>
    %449 = vector.broadcast %448 : vector<1x256xi1> to vector<2x256xi1>
    %450 = vector.broadcast %cst_91 : f32 to vector<2x256xf32>
    %451 = arith.select %449, %446, %450 : vector<2x256xi1>, vector<2x256xf32>
    %452 = arith.addf %439, %451 : vector<2x256xf32>
    %c16_i32_92 = arith.constant 16 : i32
    %453 = tpu.dynamic_rotate %3 by %c16_i32_92 dim 1 : vector<2x256xf32>, i32 -> vector<2x256xf32>
    %c16_i32_93 = arith.constant 16 : i32
    %454 = tpu.dynamic_rotate %4 by %c16_i32_93 dim 1 : vector<2x256xf32>, i32 -> vector<2x256xf32>
    %455 = vector.broadcast %150 : f32 to vector<2x256xf32>
    %456 = arith.mulf %455, %453 : vector<2x256xf32>
    %457 = vector.broadcast %199 : f32 to vector<2x256xf32>
    %458 = arith.mulf %457, %454 : vector<2x256xf32>
    %459 = arith.addf %456, %458 : vector<2x256xf32>
    %460 = arith.andi %51, %78 : vector<1x256xi1>
    %cst_94 = arith.constant 0.000000e+00 : f32
    %461 = vector.shape_cast %460 : vector<1x256xi1> to vector<1x256xi1>
    %462 = vector.broadcast %461 : vector<1x256xi1> to vector<2x256xi1>
    %463 = vector.broadcast %cst_94 : f32 to vector<2x256xf32>
    %464 = arith.select %462, %459, %463 : vector<2x256xi1>, vector<2x256xf32>
    %465 = arith.addf %452, %464 : vector<2x256xf32>
    %c15_i32 = arith.constant 15 : i32
    %466 = tpu.dynamic_rotate %3 by %c15_i32 dim 1 : vector<2x256xf32>, i32 -> vector<2x256xf32>
    %c15_i32_95 = arith.constant 15 : i32
    %467 = tpu.dynamic_rotate %4 by %c15_i32_95 dim 1 : vector<2x256xf32>, i32 -> vector<2x256xf32>
    %468 = vector.broadcast %151 : f32 to vector<2x256xf32>
    %469 = arith.mulf %468, %466 : vector<2x256xf32>
    %470 = vector.broadcast %200 : f32 to vector<2x256xf32>
    %471 = arith.mulf %470, %467 : vector<2x256xf32>
    %472 = arith.addf %469, %471 : vector<2x256xf32>
    %473 = arith.andi %51, %96 : vector<1x256xi1>
    %cst_96 = arith.constant 0.000000e+00 : f32
    %474 = vector.shape_cast %473 : vector<1x256xi1> to vector<1x256xi1>
    %475 = vector.broadcast %474 : vector<1x256xi1> to vector<2x256xi1>
    %476 = vector.broadcast %cst_96 : f32 to vector<2x256xf32>
    %477 = arith.select %475, %472, %476 : vector<2x256xi1>, vector<2x256xf32>
    %478 = arith.addf %465, %477 : vector<2x256xf32>
    %c14_i32 = arith.constant 14 : i32
    %479 = tpu.dynamic_rotate %3 by %c14_i32 dim 1 : vector<2x256xf32>, i32 -> vector<2x256xf32>
    %c14_i32_97 = arith.constant 14 : i32
    %480 = tpu.dynamic_rotate %4 by %c14_i32_97 dim 1 : vector<2x256xf32>, i32 -> vector<2x256xf32>
    %481 = vector.broadcast %152 : f32 to vector<2x256xf32>
    %482 = arith.mulf %481, %479 : vector<2x256xf32>
    %483 = vector.broadcast %201 : f32 to vector<2x256xf32>
    %484 = arith.mulf %483, %480 : vector<2x256xf32>
    %485 = arith.addf %482, %484 : vector<2x256xf32>
    %486 = arith.andi %51, %114 : vector<1x256xi1>
    %cst_98 = arith.constant 0.000000e+00 : f32
    %487 = vector.shape_cast %486 : vector<1x256xi1> to vector<1x256xi1>
    %488 = vector.broadcast %487 : vector<1x256xi1> to vector<2x256xi1>
    %489 = vector.broadcast %cst_98 : f32 to vector<2x256xf32>
    %490 = arith.select %488, %485, %489 : vector<2x256xi1>, vector<2x256xf32>
    %491 = arith.addf %478, %490 : vector<2x256xf32>
    %c13_i32 = arith.constant 13 : i32
    %492 = tpu.dynamic_rotate %3 by %c13_i32 dim 1 : vector<2x256xf32>, i32 -> vector<2x256xf32>
    %c13_i32_99 = arith.constant 13 : i32
    %493 = tpu.dynamic_rotate %4 by %c13_i32_99 dim 1 : vector<2x256xf32>, i32 -> vector<2x256xf32>
    %494 = vector.broadcast %153 : f32 to vector<2x256xf32>
    %495 = arith.mulf %494, %492 : vector<2x256xf32>
    %496 = vector.broadcast %202 : f32 to vector<2x256xf32>
    %497 = arith.mulf %496, %493 : vector<2x256xf32>
    %498 = arith.addf %495, %497 : vector<2x256xf32>
    %499 = arith.andi %51, %132 : vector<1x256xi1>
    %cst_100 = arith.constant 0.000000e+00 : f32
    %500 = vector.shape_cast %499 : vector<1x256xi1> to vector<1x256xi1>
    %501 = vector.broadcast %500 : vector<1x256xi1> to vector<2x256xi1>
    %502 = vector.broadcast %cst_100 : f32 to vector<2x256xf32>
    %503 = arith.select %501, %498, %502 : vector<2x256xi1>, vector<2x256xf32>
    %504 = arith.addf %491, %503 : vector<2x256xf32>
    %c3_i32_101 = arith.constant 3 : i32
    %505 = tpu.dynamic_rotate %3 by %c3_i32_101 dim 1 : vector<2x256xf32>, i32 -> vector<2x256xf32>
    %c3_i32_102 = arith.constant 3 : i32
    %506 = tpu.dynamic_rotate %4 by %c3_i32_102 dim 1 : vector<2x256xf32>, i32 -> vector<2x256xf32>
    %507 = vector.broadcast %154 : f32 to vector<2x256xf32>
    %508 = arith.mulf %507, %505 : vector<2x256xf32>
    %509 = vector.broadcast %203 : f32 to vector<2x256xf32>
    %510 = arith.mulf %509, %506 : vector<2x256xf32>
    %511 = arith.addf %508, %510 : vector<2x256xf32>
    %512 = arith.andi %69, %24 : vector<1x256xi1>
    %cst_103 = arith.constant 0.000000e+00 : f32
    %513 = vector.shape_cast %512 : vector<1x256xi1> to vector<1x256xi1>
    %514 = vector.broadcast %513 : vector<1x256xi1> to vector<2x256xi1>
    %515 = vector.broadcast %cst_103 : f32 to vector<2x256xf32>
    %516 = arith.select %514, %511, %515 : vector<2x256xi1>, vector<2x256xf32>
    %517 = arith.addf %504, %516 : vector<2x256xf32>
    %c2_i32_104 = arith.constant 2 : i32
    %518 = tpu.dynamic_rotate %3 by %c2_i32_104 dim 1 : vector<2x256xf32>, i32 -> vector<2x256xf32>
    %c2_i32_105 = arith.constant 2 : i32
    %519 = tpu.dynamic_rotate %4 by %c2_i32_105 dim 1 : vector<2x256xf32>, i32 -> vector<2x256xf32>
    %520 = vector.broadcast %155 : f32 to vector<2x256xf32>
    %521 = arith.mulf %520, %518 : vector<2x256xf32>
    %522 = vector.broadcast %204 : f32 to vector<2x256xf32>
    %523 = arith.mulf %522, %519 : vector<2x256xf32>
    %524 = arith.addf %521, %523 : vector<2x256xf32>
    %525 = arith.andi %69, %42 : vector<1x256xi1>
    %cst_106 = arith.constant 0.000000e+00 : f32
    %526 = vector.shape_cast %525 : vector<1x256xi1> to vector<1x256xi1>
    %527 = vector.broadcast %526 : vector<1x256xi1> to vector<2x256xi1>
    %528 = vector.broadcast %cst_106 : f32 to vector<2x256xf32>
    %529 = arith.select %527, %524, %528 : vector<2x256xi1>, vector<2x256xf32>
    %530 = arith.addf %517, %529 : vector<2x256xf32>
    %c1_i32_107 = arith.constant 1 : i32
    %531 = tpu.dynamic_rotate %3 by %c1_i32_107 dim 1 : vector<2x256xf32>, i32 -> vector<2x256xf32>
    %c1_i32_108 = arith.constant 1 : i32
    %532 = tpu.dynamic_rotate %4 by %c1_i32_108 dim 1 : vector<2x256xf32>, i32 -> vector<2x256xf32>
    %533 = vector.broadcast %156 : f32 to vector<2x256xf32>
    %534 = arith.mulf %533, %531 : vector<2x256xf32>
    %535 = vector.broadcast %205 : f32 to vector<2x256xf32>
    %536 = arith.mulf %535, %532 : vector<2x256xf32>
    %537 = arith.addf %534, %536 : vector<2x256xf32>
    %538 = arith.andi %69, %60 : vector<1x256xi1>
    %cst_109 = arith.constant 0.000000e+00 : f32
    %539 = vector.shape_cast %538 : vector<1x256xi1> to vector<1x256xi1>
    %540 = vector.broadcast %539 : vector<1x256xi1> to vector<2x256xi1>
    %541 = vector.broadcast %cst_109 : f32 to vector<2x256xf32>
    %542 = arith.select %540, %537, %541 : vector<2x256xi1>, vector<2x256xf32>
    %543 = arith.addf %530, %542 : vector<2x256xf32>
    %544 = vector.broadcast %157 : f32 to vector<2x256xf32>
    %545 = arith.mulf %544, %3 : vector<2x256xf32>
    %546 = vector.broadcast %206 : f32 to vector<2x256xf32>
    %547 = arith.mulf %546, %4 : vector<2x256xf32>
    %548 = arith.addf %545, %547 : vector<2x256xf32>
    %549 = arith.andi %69, %78 : vector<1x256xi1>
    %cst_110 = arith.constant 0.000000e+00 : f32
    %550 = vector.shape_cast %549 : vector<1x256xi1> to vector<1x256xi1>
    %551 = vector.broadcast %550 : vector<1x256xi1> to vector<2x256xi1>
    %552 = vector.broadcast %cst_110 : f32 to vector<2x256xf32>
    %553 = arith.select %551, %548, %552 : vector<2x256xi1>, vector<2x256xf32>
    %554 = arith.addf %543, %553 : vector<2x256xf32>
    %c255_i32 = arith.constant 255 : i32
    %555 = tpu.dynamic_rotate %3 by %c255_i32 dim 1 : vector<2x256xf32>, i32 -> vector<2x256xf32>
    %c255_i32_111 = arith.constant 255 : i32
    %556 = tpu.dynamic_rotate %4 by %c255_i32_111 dim 1 : vector<2x256xf32>, i32 -> vector<2x256xf32>
    %557 = vector.broadcast %158 : f32 to vector<2x256xf32>
    %558 = arith.mulf %557, %555 : vector<2x256xf32>
    %559 = vector.broadcast %207 : f32 to vector<2x256xf32>
    %560 = arith.mulf %559, %556 : vector<2x256xf32>
    %561 = arith.addf %558, %560 : vector<2x256xf32>
    %562 = arith.andi %69, %96 : vector<1x256xi1>
    %cst_112 = arith.constant 0.000000e+00 : f32
    %563 = vector.shape_cast %562 : vector<1x256xi1> to vector<1x256xi1>
    %564 = vector.broadcast %563 : vector<1x256xi1> to vector<2x256xi1>
    %565 = vector.broadcast %cst_112 : f32 to vector<2x256xf32>
    %566 = arith.select %564, %561, %565 : vector<2x256xi1>, vector<2x256xf32>
    %567 = arith.addf %554, %566 : vector<2x256xf32>
    %c254_i32 = arith.constant 254 : i32
    %568 = tpu.dynamic_rotate %3 by %c254_i32 dim 1 : vector<2x256xf32>, i32 -> vector<2x256xf32>
    %c254_i32_113 = arith.constant 254 : i32
    %569 = tpu.dynamic_rotate %4 by %c254_i32_113 dim 1 : vector<2x256xf32>, i32 -> vector<2x256xf32>
    %570 = vector.broadcast %159 : f32 to vector<2x256xf32>
    %571 = arith.mulf %570, %568 : vector<2x256xf32>
    %572 = vector.broadcast %208 : f32 to vector<2x256xf32>
    %573 = arith.mulf %572, %569 : vector<2x256xf32>
    %574 = arith.addf %571, %573 : vector<2x256xf32>
    %575 = arith.andi %69, %114 : vector<1x256xi1>
    %cst_114 = arith.constant 0.000000e+00 : f32
    %576 = vector.shape_cast %575 : vector<1x256xi1> to vector<1x256xi1>
    %577 = vector.broadcast %576 : vector<1x256xi1> to vector<2x256xi1>
    %578 = vector.broadcast %cst_114 : f32 to vector<2x256xf32>
    %579 = arith.select %577, %574, %578 : vector<2x256xi1>, vector<2x256xf32>
    %580 = arith.addf %567, %579 : vector<2x256xf32>
    %c253_i32 = arith.constant 253 : i32
    %581 = tpu.dynamic_rotate %3 by %c253_i32 dim 1 : vector<2x256xf32>, i32 -> vector<2x256xf32>
    %c253_i32_115 = arith.constant 253 : i32
    %582 = tpu.dynamic_rotate %4 by %c253_i32_115 dim 1 : vector<2x256xf32>, i32 -> vector<2x256xf32>
    %583 = vector.broadcast %160 : f32 to vector<2x256xf32>
    %584 = arith.mulf %583, %581 : vector<2x256xf32>
    %585 = vector.broadcast %209 : f32 to vector<2x256xf32>
    %586 = arith.mulf %585, %582 : vector<2x256xf32>
    %587 = arith.addf %584, %586 : vector<2x256xf32>
    %588 = arith.andi %69, %132 : vector<1x256xi1>
    %cst_116 = arith.constant 0.000000e+00 : f32
    %589 = vector.shape_cast %588 : vector<1x256xi1> to vector<1x256xi1>
    %590 = vector.broadcast %589 : vector<1x256xi1> to vector<2x256xi1>
    %591 = vector.broadcast %cst_116 : f32 to vector<2x256xf32>
    %592 = arith.select %590, %587, %591 : vector<2x256xi1>, vector<2x256xf32>
    %593 = arith.addf %580, %592 : vector<2x256xf32>
    %c243_i32 = arith.constant 243 : i32
    %594 = tpu.dynamic_rotate %3 by %c243_i32 dim 1 : vector<2x256xf32>, i32 -> vector<2x256xf32>
    %c243_i32_117 = arith.constant 243 : i32
    %595 = tpu.dynamic_rotate %4 by %c243_i32_117 dim 1 : vector<2x256xf32>, i32 -> vector<2x256xf32>
    %596 = vector.broadcast %161 : f32 to vector<2x256xf32>
    %597 = arith.mulf %596, %594 : vector<2x256xf32>
    %598 = vector.broadcast %210 : f32 to vector<2x256xf32>
    %599 = arith.mulf %598, %595 : vector<2x256xf32>
    %600 = arith.addf %597, %599 : vector<2x256xf32>
    %601 = arith.andi %87, %24 : vector<1x256xi1>
    %cst_118 = arith.constant 0.000000e+00 : f32
    %602 = vector.shape_cast %601 : vector<1x256xi1> to vector<1x256xi1>
    %603 = vector.broadcast %602 : vector<1x256xi1> to vector<2x256xi1>
    %604 = vector.broadcast %cst_118 : f32 to vector<2x256xf32>
    %605 = arith.select %603, %600, %604 : vector<2x256xi1>, vector<2x256xf32>
    %606 = arith.addf %593, %605 : vector<2x256xf32>
    %c242_i32 = arith.constant 242 : i32
    %607 = tpu.dynamic_rotate %3 by %c242_i32 dim 1 : vector<2x256xf32>, i32 -> vector<2x256xf32>
    %c242_i32_119 = arith.constant 242 : i32
    %608 = tpu.dynamic_rotate %4 by %c242_i32_119 dim 1 : vector<2x256xf32>, i32 -> vector<2x256xf32>
    %609 = vector.broadcast %162 : f32 to vector<2x256xf32>
    %610 = arith.mulf %609, %607 : vector<2x256xf32>
    %611 = vector.broadcast %211 : f32 to vector<2x256xf32>
    %612 = arith.mulf %611, %608 : vector<2x256xf32>
    %613 = arith.addf %610, %612 : vector<2x256xf32>
    %614 = arith.andi %87, %42 : vector<1x256xi1>
    %cst_120 = arith.constant 0.000000e+00 : f32
    %615 = vector.shape_cast %614 : vector<1x256xi1> to vector<1x256xi1>
    %616 = vector.broadcast %615 : vector<1x256xi1> to vector<2x256xi1>
    %617 = vector.broadcast %cst_120 : f32 to vector<2x256xf32>
    %618 = arith.select %616, %613, %617 : vector<2x256xi1>, vector<2x256xf32>
    %619 = arith.addf %606, %618 : vector<2x256xf32>
    %c241_i32 = arith.constant 241 : i32
    %620 = tpu.dynamic_rotate %3 by %c241_i32 dim 1 : vector<2x256xf32>, i32 -> vector<2x256xf32>
    %c241_i32_121 = arith.constant 241 : i32
    %621 = tpu.dynamic_rotate %4 by %c241_i32_121 dim 1 : vector<2x256xf32>, i32 -> vector<2x256xf32>
    %622 = vector.broadcast %163 : f32 to vector<2x256xf32>
    %623 = arith.mulf %622, %620 : vector<2x256xf32>
    %624 = vector.broadcast %212 : f32 to vector<2x256xf32>
    %625 = arith.mulf %624, %621 : vector<2x256xf32>
    %626 = arith.addf %623, %625 : vector<2x256xf32>
    %627 = arith.andi %87, %60 : vector<1x256xi1>
    %cst_122 = arith.constant 0.000000e+00 : f32
    %628 = vector.shape_cast %627 : vector<1x256xi1> to vector<1x256xi1>
    %629 = vector.broadcast %628 : vector<1x256xi1> to vector<2x256xi1>
    %630 = vector.broadcast %cst_122 : f32 to vector<2x256xf32>
    %631 = arith.select %629, %626, %630 : vector<2x256xi1>, vector<2x256xf32>
    %632 = arith.addf %619, %631 : vector<2x256xf32>
    %c240_i32 = arith.constant 240 : i32
    %633 = tpu.dynamic_rotate %3 by %c240_i32 dim 1 : vector<2x256xf32>, i32 -> vector<2x256xf32>
    %c240_i32_123 = arith.constant 240 : i32
    %634 = tpu.dynamic_rotate %4 by %c240_i32_123 dim 1 : vector<2x256xf32>, i32 -> vector<2x256xf32>
    %635 = vector.broadcast %164 : f32 to vector<2x256xf32>
    %636 = arith.mulf %635, %633 : vector<2x256xf32>
    %637 = vector.broadcast %213 : f32 to vector<2x256xf32>
    %638 = arith.mulf %637, %634 : vector<2x256xf32>
    %639 = arith.addf %636, %638 : vector<2x256xf32>
    %640 = arith.andi %87, %78 : vector<1x256xi1>
    %cst_124 = arith.constant 0.000000e+00 : f32
    %641 = vector.shape_cast %640 : vector<1x256xi1> to vector<1x256xi1>
    %642 = vector.broadcast %641 : vector<1x256xi1> to vector<2x256xi1>
    %643 = vector.broadcast %cst_124 : f32 to vector<2x256xf32>
    %644 = arith.select %642, %639, %643 : vector<2x256xi1>, vector<2x256xf32>
    %645 = arith.addf %632, %644 : vector<2x256xf32>
    %c239_i32 = arith.constant 239 : i32
    %646 = tpu.dynamic_rotate %3 by %c239_i32 dim 1 : vector<2x256xf32>, i32 -> vector<2x256xf32>
    %c239_i32_125 = arith.constant 239 : i32
    %647 = tpu.dynamic_rotate %4 by %c239_i32_125 dim 1 : vector<2x256xf32>, i32 -> vector<2x256xf32>
    %648 = vector.broadcast %165 : f32 to vector<2x256xf32>
    %649 = arith.mulf %648, %646 : vector<2x256xf32>
    %650 = vector.broadcast %214 : f32 to vector<2x256xf32>
    %651 = arith.mulf %650, %647 : vector<2x256xf32>
    %652 = arith.addf %649, %651 : vector<2x256xf32>
    %653 = arith.andi %87, %96 : vector<1x256xi1>
    %cst_126 = arith.constant 0.000000e+00 : f32
    %654 = vector.shape_cast %653 : vector<1x256xi1> to vector<1x256xi1>
    %655 = vector.broadcast %654 : vector<1x256xi1> to vector<2x256xi1>
    %656 = vector.broadcast %cst_126 : f32 to vector<2x256xf32>
    %657 = arith.select %655, %652, %656 : vector<2x256xi1>, vector<2x256xf32>
    %658 = arith.addf %645, %657 : vector<2x256xf32>
    %c238_i32 = arith.constant 238 : i32
    %659 = tpu.dynamic_rotate %3 by %c238_i32 dim 1 : vector<2x256xf32>, i32 -> vector<2x256xf32>
    %c238_i32_127 = arith.constant 238 : i32
    %660 = tpu.dynamic_rotate %4 by %c238_i32_127 dim 1 : vector<2x256xf32>, i32 -> vector<2x256xf32>
    %661 = vector.broadcast %166 : f32 to vector<2x256xf32>
    %662 = arith.mulf %661, %659 : vector<2x256xf32>
    %663 = vector.broadcast %215 : f32 to vector<2x256xf32>
    %664 = arith.mulf %663, %660 : vector<2x256xf32>
    %665 = arith.addf %662, %664 : vector<2x256xf32>
    %666 = arith.andi %87, %114 : vector<1x256xi1>
    %cst_128 = arith.constant 0.000000e+00 : f32
    %667 = vector.shape_cast %666 : vector<1x256xi1> to vector<1x256xi1>
    %668 = vector.broadcast %667 : vector<1x256xi1> to vector<2x256xi1>
    %669 = vector.broadcast %cst_128 : f32 to vector<2x256xf32>
    %670 = arith.select %668, %665, %669 : vector<2x256xi1>, vector<2x256xf32>
    %671 = arith.addf %658, %670 : vector<2x256xf32>
    %c237_i32 = arith.constant 237 : i32
    %672 = tpu.dynamic_rotate %3 by %c237_i32 dim 1 : vector<2x256xf32>, i32 -> vector<2x256xf32>
    %c237_i32_129 = arith.constant 237 : i32
    %673 = tpu.dynamic_rotate %4 by %c237_i32_129 dim 1 : vector<2x256xf32>, i32 -> vector<2x256xf32>
    %674 = vector.broadcast %167 : f32 to vector<2x256xf32>
    %675 = arith.mulf %674, %672 : vector<2x256xf32>
    %676 = vector.broadcast %216 : f32 to vector<2x256xf32>
    %677 = arith.mulf %676, %673 : vector<2x256xf32>
    %678 = arith.addf %675, %677 : vector<2x256xf32>
    %679 = arith.andi %87, %132 : vector<1x256xi1>
    %cst_130 = arith.constant 0.000000e+00 : f32
    %680 = vector.shape_cast %679 : vector<1x256xi1> to vector<1x256xi1>
    %681 = vector.broadcast %680 : vector<1x256xi1> to vector<2x256xi1>
    %682 = vector.broadcast %cst_130 : f32 to vector<2x256xf32>
    %683 = arith.select %681, %678, %682 : vector<2x256xi1>, vector<2x256xf32>
    %684 = arith.addf %671, %683 : vector<2x256xf32>
    %c227_i32 = arith.constant 227 : i32
    %685 = tpu.dynamic_rotate %3 by %c227_i32 dim 1 : vector<2x256xf32>, i32 -> vector<2x256xf32>
    %c227_i32_131 = arith.constant 227 : i32
    %686 = tpu.dynamic_rotate %4 by %c227_i32_131 dim 1 : vector<2x256xf32>, i32 -> vector<2x256xf32>
    %687 = vector.broadcast %168 : f32 to vector<2x256xf32>
    %688 = arith.mulf %687, %685 : vector<2x256xf32>
    %689 = vector.broadcast %217 : f32 to vector<2x256xf32>
    %690 = arith.mulf %689, %686 : vector<2x256xf32>
    %691 = arith.addf %688, %690 : vector<2x256xf32>
    %692 = arith.andi %105, %24 : vector<1x256xi1>
    %cst_132 = arith.constant 0.000000e+00 : f32
    %693 = vector.shape_cast %692 : vector<1x256xi1> to vector<1x256xi1>
    %694 = vector.broadcast %693 : vector<1x256xi1> to vector<2x256xi1>
    %695 = vector.broadcast %cst_132 : f32 to vector<2x256xf32>
    %696 = arith.select %694, %691, %695 : vector<2x256xi1>, vector<2x256xf32>
    %697 = arith.addf %684, %696 : vector<2x256xf32>
    %c226_i32 = arith.constant 226 : i32
    %698 = tpu.dynamic_rotate %3 by %c226_i32 dim 1 : vector<2x256xf32>, i32 -> vector<2x256xf32>
    %c226_i32_133 = arith.constant 226 : i32
    %699 = tpu.dynamic_rotate %4 by %c226_i32_133 dim 1 : vector<2x256xf32>, i32 -> vector<2x256xf32>
    %700 = vector.broadcast %169 : f32 to vector<2x256xf32>
    %701 = arith.mulf %700, %698 : vector<2x256xf32>
    %702 = vector.broadcast %218 : f32 to vector<2x256xf32>
    %703 = arith.mulf %702, %699 : vector<2x256xf32>
    %704 = arith.addf %701, %703 : vector<2x256xf32>
    %705 = arith.andi %105, %42 : vector<1x256xi1>
    %cst_134 = arith.constant 0.000000e+00 : f32
    %706 = vector.shape_cast %705 : vector<1x256xi1> to vector<1x256xi1>
    %707 = vector.broadcast %706 : vector<1x256xi1> to vector<2x256xi1>
    %708 = vector.broadcast %cst_134 : f32 to vector<2x256xf32>
    %709 = arith.select %707, %704, %708 : vector<2x256xi1>, vector<2x256xf32>
    %710 = arith.addf %697, %709 : vector<2x256xf32>
    %c225_i32 = arith.constant 225 : i32
    %711 = tpu.dynamic_rotate %3 by %c225_i32 dim 1 : vector<2x256xf32>, i32 -> vector<2x256xf32>
    %c225_i32_135 = arith.constant 225 : i32
    %712 = tpu.dynamic_rotate %4 by %c225_i32_135 dim 1 : vector<2x256xf32>, i32 -> vector<2x256xf32>
    %713 = vector.broadcast %170 : f32 to vector<2x256xf32>
    %714 = arith.mulf %713, %711 : vector<2x256xf32>
    %715 = vector.broadcast %219 : f32 to vector<2x256xf32>
    %716 = arith.mulf %715, %712 : vector<2x256xf32>
    %717 = arith.addf %714, %716 : vector<2x256xf32>
    %718 = arith.andi %105, %60 : vector<1x256xi1>
    %cst_136 = arith.constant 0.000000e+00 : f32
    %719 = vector.shape_cast %718 : vector<1x256xi1> to vector<1x256xi1>
    %720 = vector.broadcast %719 : vector<1x256xi1> to vector<2x256xi1>
    %721 = vector.broadcast %cst_136 : f32 to vector<2x256xf32>
    %722 = arith.select %720, %717, %721 : vector<2x256xi1>, vector<2x256xf32>
    %723 = arith.addf %710, %722 : vector<2x256xf32>
    %c224_i32 = arith.constant 224 : i32
    %724 = tpu.dynamic_rotate %3 by %c224_i32 dim 1 : vector<2x256xf32>, i32 -> vector<2x256xf32>
    %c224_i32_137 = arith.constant 224 : i32
    %725 = tpu.dynamic_rotate %4 by %c224_i32_137 dim 1 : vector<2x256xf32>, i32 -> vector<2x256xf32>
    %726 = vector.broadcast %171 : f32 to vector<2x256xf32>
    %727 = arith.mulf %726, %724 : vector<2x256xf32>
    %728 = vector.broadcast %220 : f32 to vector<2x256xf32>
    %729 = arith.mulf %728, %725 : vector<2x256xf32>
    %730 = arith.addf %727, %729 : vector<2x256xf32>
    %731 = arith.andi %105, %78 : vector<1x256xi1>
    %cst_138 = arith.constant 0.000000e+00 : f32
    %732 = vector.shape_cast %731 : vector<1x256xi1> to vector<1x256xi1>
    %733 = vector.broadcast %732 : vector<1x256xi1> to vector<2x256xi1>
    %734 = vector.broadcast %cst_138 : f32 to vector<2x256xf32>
    %735 = arith.select %733, %730, %734 : vector<2x256xi1>, vector<2x256xf32>
    %736 = arith.addf %723, %735 : vector<2x256xf32>
    %c223_i32 = arith.constant 223 : i32
    %737 = tpu.dynamic_rotate %3 by %c223_i32 dim 1 : vector<2x256xf32>, i32 -> vector<2x256xf32>
    %c223_i32_139 = arith.constant 223 : i32
    %738 = tpu.dynamic_rotate %4 by %c223_i32_139 dim 1 : vector<2x256xf32>, i32 -> vector<2x256xf32>
    %739 = vector.broadcast %172 : f32 to vector<2x256xf32>
    %740 = arith.mulf %739, %737 : vector<2x256xf32>
    %741 = vector.broadcast %221 : f32 to vector<2x256xf32>
    %742 = arith.mulf %741, %738 : vector<2x256xf32>
    %743 = arith.addf %740, %742 : vector<2x256xf32>
    %744 = arith.andi %105, %96 : vector<1x256xi1>
    %cst_140 = arith.constant 0.000000e+00 : f32
    %745 = vector.shape_cast %744 : vector<1x256xi1> to vector<1x256xi1>
    %746 = vector.broadcast %745 : vector<1x256xi1> to vector<2x256xi1>
    %747 = vector.broadcast %cst_140 : f32 to vector<2x256xf32>
    %748 = arith.select %746, %743, %747 : vector<2x256xi1>, vector<2x256xf32>
    %749 = arith.addf %736, %748 : vector<2x256xf32>
    %c222_i32 = arith.constant 222 : i32
    %750 = tpu.dynamic_rotate %3 by %c222_i32 dim 1 : vector<2x256xf32>, i32 -> vector<2x256xf32>
    %c222_i32_141 = arith.constant 222 : i32
    %751 = tpu.dynamic_rotate %4 by %c222_i32_141 dim 1 : vector<2x256xf32>, i32 -> vector<2x256xf32>
    %752 = vector.broadcast %173 : f32 to vector<2x256xf32>
    %753 = arith.mulf %752, %750 : vector<2x256xf32>
    %754 = vector.broadcast %222 : f32 to vector<2x256xf32>
    %755 = arith.mulf %754, %751 : vector<2x256xf32>
    %756 = arith.addf %753, %755 : vector<2x256xf32>
    %757 = arith.andi %105, %114 : vector<1x256xi1>
    %cst_142 = arith.constant 0.000000e+00 : f32
    %758 = vector.shape_cast %757 : vector<1x256xi1> to vector<1x256xi1>
    %759 = vector.broadcast %758 : vector<1x256xi1> to vector<2x256xi1>
    %760 = vector.broadcast %cst_142 : f32 to vector<2x256xf32>
    %761 = arith.select %759, %756, %760 : vector<2x256xi1>, vector<2x256xf32>
    %762 = arith.addf %749, %761 : vector<2x256xf32>
    %c221_i32 = arith.constant 221 : i32
    %763 = tpu.dynamic_rotate %3 by %c221_i32 dim 1 : vector<2x256xf32>, i32 -> vector<2x256xf32>
    %c221_i32_143 = arith.constant 221 : i32
    %764 = tpu.dynamic_rotate %4 by %c221_i32_143 dim 1 : vector<2x256xf32>, i32 -> vector<2x256xf32>
    %765 = vector.broadcast %174 : f32 to vector<2x256xf32>
    %766 = arith.mulf %765, %763 : vector<2x256xf32>
    %767 = vector.broadcast %223 : f32 to vector<2x256xf32>
    %768 = arith.mulf %767, %764 : vector<2x256xf32>
    %769 = arith.addf %766, %768 : vector<2x256xf32>
    %770 = arith.andi %105, %132 : vector<1x256xi1>
    %cst_144 = arith.constant 0.000000e+00 : f32
    %771 = vector.shape_cast %770 : vector<1x256xi1> to vector<1x256xi1>
    %772 = vector.broadcast %771 : vector<1x256xi1> to vector<2x256xi1>
    %773 = vector.broadcast %cst_144 : f32 to vector<2x256xf32>
    %774 = arith.select %772, %769, %773 : vector<2x256xi1>, vector<2x256xf32>
    %775 = arith.addf %762, %774 : vector<2x256xf32>
    %c211_i32 = arith.constant 211 : i32
    %776 = tpu.dynamic_rotate %3 by %c211_i32 dim 1 : vector<2x256xf32>, i32 -> vector<2x256xf32>
    %c211_i32_145 = arith.constant 211 : i32
    %777 = tpu.dynamic_rotate %4 by %c211_i32_145 dim 1 : vector<2x256xf32>, i32 -> vector<2x256xf32>
    %778 = vector.broadcast %175 : f32 to vector<2x256xf32>
    %779 = arith.mulf %778, %776 : vector<2x256xf32>
    %780 = vector.broadcast %224 : f32 to vector<2x256xf32>
    %781 = arith.mulf %780, %777 : vector<2x256xf32>
    %782 = arith.addf %779, %781 : vector<2x256xf32>
    %783 = arith.andi %123, %24 : vector<1x256xi1>
    %cst_146 = arith.constant 0.000000e+00 : f32
    %784 = vector.shape_cast %783 : vector<1x256xi1> to vector<1x256xi1>
    %785 = vector.broadcast %784 : vector<1x256xi1> to vector<2x256xi1>
    %786 = vector.broadcast %cst_146 : f32 to vector<2x256xf32>
    %787 = arith.select %785, %782, %786 : vector<2x256xi1>, vector<2x256xf32>
    %788 = arith.addf %775, %787 : vector<2x256xf32>
    %c210_i32 = arith.constant 210 : i32
    %789 = tpu.dynamic_rotate %3 by %c210_i32 dim 1 : vector<2x256xf32>, i32 -> vector<2x256xf32>
    %c210_i32_147 = arith.constant 210 : i32
    %790 = tpu.dynamic_rotate %4 by %c210_i32_147 dim 1 : vector<2x256xf32>, i32 -> vector<2x256xf32>
    %791 = vector.broadcast %176 : f32 to vector<2x256xf32>
    %792 = arith.mulf %791, %789 : vector<2x256xf32>
    %793 = vector.broadcast %225 : f32 to vector<2x256xf32>
    %794 = arith.mulf %793, %790 : vector<2x256xf32>
    %795 = arith.addf %792, %794 : vector<2x256xf32>
    %796 = arith.andi %123, %42 : vector<1x256xi1>
    %cst_148 = arith.constant 0.000000e+00 : f32
    %797 = vector.shape_cast %796 : vector<1x256xi1> to vector<1x256xi1>
    %798 = vector.broadcast %797 : vector<1x256xi1> to vector<2x256xi1>
    %799 = vector.broadcast %cst_148 : f32 to vector<2x256xf32>
    %800 = arith.select %798, %795, %799 : vector<2x256xi1>, vector<2x256xf32>
    %801 = arith.addf %788, %800 : vector<2x256xf32>
    %c209_i32 = arith.constant 209 : i32
    %802 = tpu.dynamic_rotate %3 by %c209_i32 dim 1 : vector<2x256xf32>, i32 -> vector<2x256xf32>
    %c209_i32_149 = arith.constant 209 : i32
    %803 = tpu.dynamic_rotate %4 by %c209_i32_149 dim 1 : vector<2x256xf32>, i32 -> vector<2x256xf32>
    %804 = vector.broadcast %177 : f32 to vector<2x256xf32>
    %805 = arith.mulf %804, %802 : vector<2x256xf32>
    %806 = vector.broadcast %226 : f32 to vector<2x256xf32>
    %807 = arith.mulf %806, %803 : vector<2x256xf32>
    %808 = arith.addf %805, %807 : vector<2x256xf32>
    %809 = arith.andi %123, %60 : vector<1x256xi1>
    %cst_150 = arith.constant 0.000000e+00 : f32
    %810 = vector.shape_cast %809 : vector<1x256xi1> to vector<1x256xi1>
    %811 = vector.broadcast %810 : vector<1x256xi1> to vector<2x256xi1>
    %812 = vector.broadcast %cst_150 : f32 to vector<2x256xf32>
    %813 = arith.select %811, %808, %812 : vector<2x256xi1>, vector<2x256xf32>
    %814 = arith.addf %801, %813 : vector<2x256xf32>
    %c208_i32 = arith.constant 208 : i32
    %815 = tpu.dynamic_rotate %3 by %c208_i32 dim 1 : vector<2x256xf32>, i32 -> vector<2x256xf32>
    %c208_i32_151 = arith.constant 208 : i32
    %816 = tpu.dynamic_rotate %4 by %c208_i32_151 dim 1 : vector<2x256xf32>, i32 -> vector<2x256xf32>
    %817 = vector.broadcast %178 : f32 to vector<2x256xf32>
    %818 = arith.mulf %817, %815 : vector<2x256xf32>
    %819 = vector.broadcast %227 : f32 to vector<2x256xf32>
    %820 = arith.mulf %819, %816 : vector<2x256xf32>
    %821 = arith.addf %818, %820 : vector<2x256xf32>
    %822 = arith.andi %123, %78 : vector<1x256xi1>
    %cst_152 = arith.constant 0.000000e+00 : f32
    %823 = vector.shape_cast %822 : vector<1x256xi1> to vector<1x256xi1>
    %824 = vector.broadcast %823 : vector<1x256xi1> to vector<2x256xi1>
    %825 = vector.broadcast %cst_152 : f32 to vector<2x256xf32>
    %826 = arith.select %824, %821, %825 : vector<2x256xi1>, vector<2x256xf32>
    %827 = arith.addf %814, %826 : vector<2x256xf32>
    %c207_i32 = arith.constant 207 : i32
    %828 = tpu.dynamic_rotate %3 by %c207_i32 dim 1 : vector<2x256xf32>, i32 -> vector<2x256xf32>
    %c207_i32_153 = arith.constant 207 : i32
    %829 = tpu.dynamic_rotate %4 by %c207_i32_153 dim 1 : vector<2x256xf32>, i32 -> vector<2x256xf32>
    %830 = vector.broadcast %179 : f32 to vector<2x256xf32>
    %831 = arith.mulf %830, %828 : vector<2x256xf32>
    %832 = vector.broadcast %228 : f32 to vector<2x256xf32>
    %833 = arith.mulf %832, %829 : vector<2x256xf32>
    %834 = arith.addf %831, %833 : vector<2x256xf32>
    %835 = arith.andi %123, %96 : vector<1x256xi1>
    %cst_154 = arith.constant 0.000000e+00 : f32
    %836 = vector.shape_cast %835 : vector<1x256xi1> to vector<1x256xi1>
    %837 = vector.broadcast %836 : vector<1x256xi1> to vector<2x256xi1>
    %838 = vector.broadcast %cst_154 : f32 to vector<2x256xf32>
    %839 = arith.select %837, %834, %838 : vector<2x256xi1>, vector<2x256xf32>
    %840 = arith.addf %827, %839 : vector<2x256xf32>
    %c206_i32 = arith.constant 206 : i32
    %841 = tpu.dynamic_rotate %3 by %c206_i32 dim 1 : vector<2x256xf32>, i32 -> vector<2x256xf32>
    %c206_i32_155 = arith.constant 206 : i32
    %842 = tpu.dynamic_rotate %4 by %c206_i32_155 dim 1 : vector<2x256xf32>, i32 -> vector<2x256xf32>
    %843 = vector.broadcast %180 : f32 to vector<2x256xf32>
    %844 = arith.mulf %843, %841 : vector<2x256xf32>
    %845 = vector.broadcast %229 : f32 to vector<2x256xf32>
    %846 = arith.mulf %845, %842 : vector<2x256xf32>
    %847 = arith.addf %844, %846 : vector<2x256xf32>
    %848 = arith.andi %123, %114 : vector<1x256xi1>
    %cst_156 = arith.constant 0.000000e+00 : f32
    %849 = vector.shape_cast %848 : vector<1x256xi1> to vector<1x256xi1>
    %850 = vector.broadcast %849 : vector<1x256xi1> to vector<2x256xi1>
    %851 = vector.broadcast %cst_156 : f32 to vector<2x256xf32>
    %852 = arith.select %850, %847, %851 : vector<2x256xi1>, vector<2x256xf32>
    %853 = arith.addf %840, %852 : vector<2x256xf32>
    %c205_i32 = arith.constant 205 : i32
    %854 = tpu.dynamic_rotate %3 by %c205_i32 dim 1 : vector<2x256xf32>, i32 -> vector<2x256xf32>
    %c205_i32_157 = arith.constant 205 : i32
    %855 = tpu.dynamic_rotate %4 by %c205_i32_157 dim 1 : vector<2x256xf32>, i32 -> vector<2x256xf32>
    %856 = vector.broadcast %181 : f32 to vector<2x256xf32>
    %857 = arith.mulf %856, %854 : vector<2x256xf32>
    %858 = vector.broadcast %230 : f32 to vector<2x256xf32>
    %859 = arith.mulf %858, %855 : vector<2x256xf32>
    %860 = arith.addf %857, %859 : vector<2x256xf32>
    %861 = arith.andi %123, %132 : vector<1x256xi1>
    %cst_158 = arith.constant 0.000000e+00 : f32
    %862 = vector.shape_cast %861 : vector<1x256xi1> to vector<1x256xi1>
    %863 = vector.broadcast %862 : vector<1x256xi1> to vector<2x256xi1>
    %864 = vector.broadcast %cst_158 : f32 to vector<2x256xf32>
    %865 = arith.select %863, %860, %864 : vector<2x256xi1>, vector<2x256xf32>
    %866 = arith.addf %853, %865 : vector<2x256xf32>
    %867 = arith.negf %866 : vector<2x256xf32>
    %868 = math.exp %867 : vector<2x256xf32>
    %cst_159 = arith.constant 1.000000e+00 : f32
    %869 = vector.broadcast %cst_159 : f32 to vector<2x256xf32>
    %870 = arith.addf %869, %868 : vector<2x256xf32>
    %871 = arith.divf %869, %870 : vector<2x256xf32>
    %872 = vector.shape_cast %871 : vector<2x256xf32> to vector<2x1x256xf32>
    %873 = vector.broadcast %872 : vector<2x1x256xf32> to vector<2x4x256xf32>
    %874 = arith.mulf %0, %873 : vector<2x4x256xf32>
    %c0_160 = arith.constant 0 : index
    %c0_161 = arith.constant 0 : index
    %c0_162 = arith.constant 0 : index
    %875 = vector.load %arg5[%c0_160, %c0_161, %c0_162] : memref<2x4x256xf32, #tpu.memory_space<vmem>>, vector<2x4x256xf32>
    tpu.vector_store %arg5[%c0_160, %c0_161, %c0_162], %874 {strides = array<i32>} : memref<2x4x256xf32, #tpu.memory_space<vmem>>, vector<2x4x256xf32>,
    return
  }
  func.func @transform_0(%arg0: i32) -> i32 {
    %c0_i32 = arith.constant 0 : i32
    %c0_i32_0 = arith.constant 0 : i32
    return %c0_i32 : i32
  }
  func.func @transform_1(%arg0: i32) -> (i32, i32) {
    %c0_i32 = arith.constant 0 : i32
    %c0_i32_0 = arith.constant 0 : i32
    %c0_i32_1 = arith.constant 0 : i32
    return %c0_i32, %c0_i32_0 : i32, i32
  }
  func.func @transform_2(%arg0: i32) -> (i32, i32) {
    %c0_i32 = arith.constant 0 : i32
    %c0_i32_0 = arith.constant 0 : i32
    %c0_i32_1 = arith.constant 0 : i32
    return %c0_i32, %c0_i32_0 : i32, i32
  }
  func.func @transform_3(%arg0: i32) -> (i32, i32, i32) {
    %c0_i32 = arith.constant 0 : i32
    %c0_i32_0 = arith.constant 0 : i32
    %c0_i32_1 = arith.constant 0 : i32
    return %arg0, %c0_i32, %c0_i32_0 : i32, i32, i32
  }
  func.func @transform_4(%arg0: i32) -> (i32, i32, i32) {
    %c0_i32 = arith.constant 0 : i32
    %c0_i32_0 = arith.constant 0 : i32
    %c0_i32_1 = arith.constant 0 : i32
    return %arg0, %c0_i32, %c0_i32_0 : i32, i32, i32
  }
}

</mosaic_0001>

<bundles_post_ra>
// kernel: tpu_custom_call.1
= control target key start
LH: loop header
LB: loop body
LE: loop exit
PB: predicated region body
PF: predicated region fallthrough
CT: control target
= control target key end

     0   :  { %s5706_s0 = inlined_call_operand.hbm [shape: f32[98], index: 0, kind: input, shape index: {}]   ;;  %s5707_s1 = inlined_call_operand.hbm [shape: s32[1,256], index: 1, kind: input, shape index: {}]   ;;  %s5708_s2 = inlined_call_operand.vmem [shape: s32[1,256], index: 2, kind: input, shape index: {}]   ;;  %s5709_s3 = inlined_call_operand.hbm [shape: f32[2,4,256], index: 3, kind: input, shape index: {}]   ;;  %s5710_s4 = inlined_call_operand.hbm [shape: f32[2,4,256], index: 4, kind: output, shape index: {}]  }
   0x1   :  { %5840 = sst [smem:[#allocation76_spill]] %s5710_s4 }
   0x2   :  { %9 = vsyncpa [#allocation5], 0 }
   0x3   :  { %10 = vsyncpa [#allocation3], 0 }
   0x4   :  { %11 = vsyncpa [#allocation8], 0 }
   0x5   :  { %12 = vsyncpa [#allocation4], 0  ;;  %s2436_s15 = smov [#allocation2]   ;;  %s2437_s18 = smov [#allocation6]  }
   0x6   :  { %20 = dma.hbm_to_smem %s5706_s0, 16, %s2436_s15, [#allocation5]  }
   0x7   :  { %s27_s19 = sshll.u32 %s2437_s18, 4  ;;  %s2438_s20 = smov [#allocation7]   ;;  %s28_s19 = int_to_ptr.vmem [resolvable:$true] %s27_s19 }
   0x8   :  { %s38_s21 = sshll.u32 %s2438_s20, 4  ;;  %s2376_s22 = scalar_lea.vmem %s28_s19, 32  ;;  %s39_s21 = int_to_ptr.vmem [resolvable:$true] %s38_s21 }
   0x9   :  { %p2377_p0 = scmp.ne.s32.totalorder %s28_s19, %s2376_s22  ;;  %p2381_p1 = scmp.lt.s32.totalorder %s28_s19, %s28_s19 }
   0xa   :  { %p2382_p2 = scmp.lt.s32.totalorder %s2376_s22, %s2376_s22 }
   0xc   :  { %p2383_p3 = por %p2382_p2, %p2381_p1 }
   0xe   :  { %p2384_p4 = pnand %p2383_p3, %p2377_p0 }
  0x10   :  { %2387 = shalt.err (!%p2384_p4)
}
  0x11   :  { %30 = dma.hbm_to_vmem [thread:$0]  %s5707_s1, 32, %s28_s19, [#allocation3]  }
  0x12   :  { %s2396_s25 = scalar_lea.vmem %s39_s21, 256  ;;  %p2401_p6 = scmp.lt.s32.totalorder %s39_s21, %s39_s21 }
  0x13   :  { %p2397_p5 = scmp.ne.s32.totalorder %s39_s21, %s2396_s25  ;;  %p2402_p7 = scmp.lt.s32.totalorder %s2396_s25, %s2396_s25 }
  0x15   :  { %p2403_p8 = por %p2402_p7, %p2401_p6 }
  0x17   :  { %p2404_p9 = pnand %p2403_p8, %p2397_p5 }
  0x19   :  { %2407 = shalt.err (!%p2404_p9)
}
  0x1a   :  { %s5734_s0 = smov 128   ;;  %s5735_s26 = smov 8  }
  0x1b   :  { %44 = dma.hbm_to_vmem [thread:$0]  %s5709_s3, 256, %s39_s21, [#allocation8], %s5734_s0, %s5734_s0, %s5735_s26  }
  0x1c   :  { %2428 = dma.done.wait [#allocation5], 16  }
  0x1d   :  { %2429 = vsyncadd [#allocation5], 4294967280 }
  0x1e   :  { %2430 = dma.done.wait [#allocation3], 32  }
  0x1f   :  { %2431 = vsyncadd [#allocation3], 4294967264 }
  0x20   :  { %2432 = dma.done.wait [#allocation8], 256  }
  0x21   :  { %2433 = vsyncadd [#allocation8], 4294967040 }
  0x22   :  { %54 = sfence }
  0x23   :  { %v55_v0 = vld [vmem:[#allocation7] sm:$0xff]  ;;  %v56_v1 = vld [vmem:[#allocation7 + $0x8] sm:$0xff]  ;;  %vm63_vm0 = vcmask 1043456   ;;  %vm5711_vm1 = vcmask 1041409   ;;  %s2441_s1 = smov 50   ;;  %s2442_s3 = smov 51  }
  0x24   :  { %v97_v2 = vsel %vm63_vm0, %v55_v0, -inf  ;;  %v111_v3 = vsel %vm63_vm0, %v56_v1, -inf  ;;  %v64_v4 = vsel %vm63_vm0, %v55_v0, 0.0  ;;  %v78_v5 = vsel %vm63_vm0, %v56_v1, 0.0  ;;  %s2443_s29 = smov 49   ;;  %s2444_s30 = smov 48  }
  0x25   :  { %v98_v6 = vrot.slane %v97_v2, 4  ;;  %v112_v7 = vrot.slane %v111_v3, 4  ;;  %v65_v8 = vrot.slane %v64_v4, 4  ;;  %v79_v9 = vrot.slane %v78_v5, 4  ;;  %s2445_s5 = smov 47   ;;  %s2446_s6 = smov 46  }
  0x26   :  { %v59_v10 = vcombine.high %v55_v0, %v55_v0  ;;  %v60_v11 = vcombine.high %v56_v1, %v56_v1  ;;  %s2447_s7 = smov 45   ;;  %s2448_s8 = smov 35  }
  0x27   :  { %v99_v12 = vmax.f32 %v97_v2, %v98_v6  ;;  %v113_v13 = vmax.f32 %v111_v3, %v112_v7  ;;  %v66_v14 = vadd.f32 %v65_v8, %v64_v4  ;;  %v80_v15 = vadd.f32 %v79_v9, %v78_v5  ;;  %s2449_s9 = smov 34   ;;  %s2450_s10 = smov 33  }
  0x28   :  { %v104_v16 = vsel %vm63_vm0, %v59_v10, -inf  ;;  %v118_v17 = vsel %vm63_vm0, %v60_v11, -inf  ;;  %v71_v18 = vsel %vm63_vm0, %v59_v10, 0.0  ;;  %v85_v19 = vsel %vm63_vm0, %v60_v11, 0.0  ;;  %s2451_s11 = smov 32   ;;  %s2452_s12 = smov 31  }
  0x29   :  { %v100_v20 = vrot.slane %v99_v12, 2  ;;  %v114_v21 = vrot.slane %v113_v13, 2  ;;  %v67_v22 = vrot.slane %v66_v14, 2  ;;  %v81_v23 = vrot.slane %v80_v15, 2  ;;  %s2453_s13 = smov 30   ;;  %s2454_s14 = smov 29  }
  0x2a   :  { %v105_v24 = vrot.slane %v104_v16, 4  ;;  %v119_v25 = vrot.slane %v118_v17, 4  ;;  %v72_v26 = vrot.slane %v71_v18, 4  ;;  %v86_v27 = vrot.slane %v85_v19, 4  ;;  %s2455_s15 = smov 19   ;;  %s2456_s16 = smov 18  }
  0x2b   :  { %v101_v28 = vmax.f32 %v99_v12, %v100_v20  ;;  %v115_v29 = vmax.f32 %v113_v13, %v114_v21  ;;  %v68_v30 = vadd.f32 %v67_v22, %v66_v14  ;;  %v82_v31 = vadd.f32 %v81_v23, %v80_v15  ;;  %s2457_s17 = smov 17   ;;  %s2458_s18 = smov 16  }
  0x2c   :  { %v106_v32 = vmax.f32 %v104_v16, %v105_v24  ;;  %v120_v33 = vmax.f32 %v118_v17, %v119_v25  ;;  %v73_v34 = vadd.f32 %v72_v26, %v71_v18  ;;  %v87_v35 = vadd.f32 %v86_v27, %v85_v19  ;;  %s2459_s19 = smov 15   ;;  %s2460_s20 = smov 14  }
  0x2d   :  { %v102_v36 = vrot.slane %v101_v28, 1  ;;  %v116_v37 = vrot.slane %v115_v29, 1  ;;  %v69_v38 = vrot.slane %v68_v30, 1  ;;  %v83_v39 = vrot.slane %v82_v31, 1  ;;  %s2461_s21 = smov 13   ;;  %s2462_s24 = smov 3  }
  0x2e   :  { %v107_v40 = vrot.slane %v106_v32, 2  ;;  %v121_v41 = vrot.slane %v120_v33, 2  ;;  %v74_v42 = vrot.slane %v73_v34, 2  ;;  %v88_v43 = vrot.slane %v87_v35, 2  ;;  %s2723_s25 = sld [smem:[#allocation2 + $0x31]]  ;;  %s2467_s26 = smov 126  }
  0x2f   :  { %v2537_v44 = vmax.f32 %v101_v28, %v102_v36  ;;  %v2539_v45 = vmax.f32 %v115_v29, %v116_v37  ;;  %v70_v46 = vadd.f32 %v69_v38, %v68_v30  ;;  %v84_v47 = vadd.f32 %v83_v39, %v82_v31  ;;  %v2711_v31 = vld [vmem:[#allocation6] sm:$0x3]  ;;  %s2727_s27 = sld [smem:[#allocation2 + $0x32]] }
  0x30   :  { %v108_v48 = vmax.f32 %v106_v32, %v107_v40  ;;  %v122_v49 = vmax.f32 %v120_v33, %v121_v41  ;;  %v75_v50 = vadd.f32 %v74_v42, %v73_v34  ;;  %v89_v51 = vadd.f32 %v88_v43, %v87_v35  ;;  %v126_v33 = vld [vmem:[%s5708_s2] sm:$0x3]  ;;  %s2730_s2 = sld [smem:[#allocation2 + $0x1]] }
  0x31   :  { %5841 = vst [vmem:[#allocation14_spill] sm:$0xff] %v2537_v44  ;;  %5842 = vst [vmem:[#allocation15_spill] sm:$0xff] %v2539_v45  ;;  %v2544_v52 = vsel %vm5711_vm1, %v2539_v45, %v2537_v44  ;;  %v2546_v53 = vmul.f32 0.25, %v70_v46  ;;  %v2548_v54 = vmul.f32 0.25, %v84_v47  ;;  %v127_v34 = vadd.s32 4294967293, %v2711_v31  ;;  %s2733_s28 = sld [smem:[#allocation2 + $0x2]] }
  0x32   :  { %342 = vrot.lane.b32.xlu0 %v2544_v52, %s2441_s1  ;;  %305 = vrot.lane.b32.xlu1 %v2544_v52, %s2442_s3  ;;  %v109_v55 = vrot.slane %v108_v48, 1  ;;  %v123_v56 = vrot.slane %v122_v49, 1  ;;  %v76_v57 = vrot.slane %v75_v50, 1  ;;  %v90_v58 = vrot.slane %v89_v51, 1  ;;  %s2944_s22 = sld [smem:[#allocation2 + $0xb]] }
  0x33   :  { %5843 = vst [vmem:[#allocation16_spill] sm:$0xff] %v2546_v53  ;;  %5844 = vst [vmem:[#allocation17_spill] sm:$0xff] %v2548_v54  ;;  %v2555_v59 = vsel %vm5711_vm1, %v2548_v54, %v2546_v53  ;;  %v139_v36 = vadd.s32 4294967294, %v126_v33  ;;  %v131_v38 = vadd.s32 4294967293, %v126_v33  ;;  %vm128_vm2 = vcmp.ge.s32.totalorder %v127_v34, 0  ;;  %s2960_s23 = sld [smem:[#allocation2 + $0x3c]] }
  0x34   :  { %v2557_v60 = vmax.f32 %v108_v48, %v109_v55  ;;  %v2559_v61 = vmax.f32 %v122_v49, %v123_v56  ;;  %v77_v62 = vadd.f32 %v76_v57, %v75_v50  ;;  %v91_v63 = vadd.f32 %v90_v58, %v89_v51  ;;  %s3053_s0 = sld [smem:[#allocation2 + $0xe]] }
  0x35   :  { %vm129_vm3 = vcmp.lt.s32.totalorder %v127_v34, 16  ;;  %vm140_vm4 = vcmp.ge.s32.totalorder %v139_v36, 0  ;;  %vm141_vm5 = vcmp.lt.s32.totalorder %v139_v36, 16  ;;  %vm132_vm6 = vcmp.ge.s32.totalorder %v131_v38, 0  ;;  %s3077_s4 = sld [smem:[#allocation2 + $0x3f]] }
  0x36   :  { %5845 = vst [vmem:[#allocation18_spill] sm:$0xff] %v2557_v60  ;;  %5846 = vst [vmem:[#allocation19_spill] sm:$0xff] %v2559_v61  ;;  %288 = vrot.lane.b32.xlu0 %v2555_v59, %s2442_s3  ;;  %v2565_v0 = vsel %vm5711_vm1, %v2559_v61, %v2557_v60  ;;  %v2568_v1 = vmul.f32 0.25, %v77_v62  ;;  %v2570_v2 = vmul.f32 0.25, %v91_v63  ;;  %vm133_vm7 = vcmp.lt.s32.totalorder %v131_v38, 16 }
  0x37   :  { %307 = vrot.lane.b32.xlu1 %v2565_v0, %s2442_s3  ;;  %v147_v41 = vadd.s32 4294967295, %v126_v33  ;;  %vm2744_vm8 = vmand %vm128_vm2, %vm129_vm3  ;;  %v5859_v43 = vmov 0  ;;  %v161_v46 = vadd.s32 1, %v126_v33  ;;  %v5863_v48 = vmov 0 }
  0x38   :  { %5847 = vst [vmem:[#allocation20_spill] sm:$0xff] %v2568_v1  ;;  %5848 = vst [vmem:[#allocation21_spill] sm:$0xff] %v2570_v2  ;;  %v2577_v3 = vsel %vm5711_vm1, %v2570_v2, %v2568_v1  ;;  %vm154_vm14 = vcmp.ge.s32.totalorder %v126_v33, 0  ;;  %vm155_vm15 = vcmp.lt.s32.totalorder %v126_v33, 16  ;;  %v292_v50 = vlaneseq }
  0x39   :  { %vm2751_vm9 = vmand %vm140_vm4, %vm141_vm5  ;;  %vm148_vm11 = vcmp.ge.s32.totalorder %v147_v41, 0  ;;  %vm149_vm12 = vcmp.lt.s32.totalorder %v147_v41, 16  ;;  %vm162_vm2 = vcmp.ge.s32.totalorder %v161_v46, 0  ;;  %vm163_vm3 = vcmp.lt.s32.totalorder %v161_v46, 16 }
  0x3a   :  { %335 = vrot.lane.b32.xlu0 %v2555_v59, %s2441_s1  ;;  %v5860_v43 = vsel %vm2751_vm9, 4294967295, %v5859_v43  ;;  %vm2759_vm10 = vmand %vm132_vm6, %vm133_vm7  ;;  %v169_v51 = vadd.s32 2, %v126_v33  ;;  %v5868_v56 = vmov 0  ;;  %v177_v57 = vadd.s32 3, %v126_v33  ;;  %5903 = sst [smem:[#allocation55_spill]] %s3053_s0 }
  0x3b   :  { %344 = vrot.lane.b32.xlu1 %v2565_v0, %s2441_s1  ;;  %5861 = vst [vmem:[#allocation30_spill] sm:$0xff] %v5860_v43  ;;  %v5864_v48 = vsel %vm2759_vm10, 4294967295, %v5863_v48  ;;  %vm356_vm13 = vmand %vm2744_vm8, %vm2751_vm9  ;;  %v2795_v62 = vshrl.u32 %v292_v50, 7  ;;  %v5873_v63 = vmov 0  ;;  %v135_v34 = vadd.s32 4294967294, %v2711_v31  ;;  %s3299_s0 = sld [smem:[#allocation2 + $0x42]] }
  0x3c   :  { %5865 = vst [vmem:[#allocation32_spill] sm:$0xff] %v5864_v48  ;;  %vm319_vm0 = vmand %vm2744_vm8, %vm2759_vm10  ;;  %v5876_v36 = vmov 0  ;;  %v2844_v61 = vand.u32 127, %v292_v50  ;;  %v5723_v45 = vmov 0   ;;  %v5883_v60 = vmov 0 }
  0x3d   :  { %vm2787_vm4 = vmand %vm148_vm11, %vm149_vm12  ;;  %5872 = vst [vmem:[#allocation37_spill] sm:$0xff] %v2795_v62  ;;  %vm170_vm11 = vcmp.ge.s32.totalorder %v169_v51, 0  ;;  %vm171_vm12 = vcmp.lt.s32.totalorder %v169_v51, 16  ;;  %v2832_v41 = vsub.s32 0, %v2795_v62  ;;  %v2835_v46 = vsub.s32 1, %v2795_v62 }
  0x3e   :  { %372 = vrot.lane.b32.xlu0 %v2555_v59, %s2443_s29  ;;  %v5869_v56 = vsel %vm2787_vm4, 4294967295, %v5868_v56  ;;  %vm2799_vm5 = vmand %vm154_vm14, %vm155_vm15  ;;  %vm178_vm15 = vcmp.ge.s32.totalorder %v177_v57, 0  ;;  %vm136_vm1 = vcmp.ge.s32.totalorder %v135_v34, 0  ;;  %vm137_vm14 = vcmp.lt.s32.totalorder %v135_v34, 16 }
  0x3f   :  { %337 = vrot.lane.b32.xlu1 %v2577_v3, %s2441_s1  ;;  %s2737_s1 = sld [smem:[#allocation2]]  ;;  %5870 = vst [vmem:[#allocation35_spill] sm:$0xff] %v5869_v56  ;;  %v5874_v63 = vsel %vm2799_vm5, 4294967295, %v5873_v63  ;;  %vm2808_vm6 = vmand %vm162_vm2, %vm163_vm3  ;;  %vm179_vm2 = vcmp.lt.s32.totalorder %v177_v57, 16  ;;  %v2852_v62 = vsel %vm356_vm13, 1, %v5723_v45  ;;  %v2872_v51 = vsel %vm319_vm0, 1, %v5723_v45 }
  0x40   :  { %5875 = vst [vmem:[#allocation38_spill] sm:$0xff] %v5874_v63  ;;  %v5877_v36 = vsel %vm2808_vm6, 4294967295, %v5876_v36  ;;  %vm393_vm7 = vmand %vm2744_vm8, %vm2787_vm4  ;;  %v5886_v54 = vmov 0  ;;  %v143_v53 = vadd.s32 4294967295, %v2711_v31 }
  0x41   :  { %5878 = vst [vmem:[#allocation39_spill] sm:$0xff] %v5877_v36  ;;  %vm2856_vm3 = vmand %vm170_vm11, %vm171_vm12 }
  0x42   :  { %290 = vrot.lane.b32.xlu0 %v2577_v3, %s2442_s3  ;;  %s2741_s3 = sld [smem:[#allocation2 + $0x33]]  ;;  %v5884_v60 = vsel %vm2856_vm3, 4294967295, %v5883_v60  ;;  %vm2876_vm13 = vmand %vm178_vm15, %vm179_vm2 }
  0x43   :  { %374 = vrot.lane.b32.xlu1 %v2577_v3, %s2443_s29  ;;  %5885 = vst [vmem:[#allocation44_spill] sm:$0xff] %v5884_v60  ;;  %v5887_v54 = vsel %vm2876_vm13, 4294967295, %v5886_v54  ;;  %vm5890_vm0 = vmand %vm2744_vm8, %vm2799_vm5 }
  0x44   :  { %5888 = vst [vmem:[#allocation45_spill] sm:$0xff] %v5887_v54  ;;  %v2900_v57 = vsel %vm5890_vm0, 1, %v5723_v45  ;;  %vm2904_vm11 = vmand %vm136_vm1, %vm137_vm14  ;;  %vm144_vm0 = vcmp.ge.s32.totalorder %v143_v53, 0 }
  0x45   :  { %vm504_vm1 = vmand %vm2744_vm8, %vm2856_vm3 }
  0x46   :  { %379 = vrot.lane.b32.xlu0 %v2544_v52, %s2443_s29  ;;  %vm541_vm12 = vmand %vm2744_vm8, %vm2876_vm13 }
  0x47   :  { %381 = vrot.lane.b32.xlu1 %v2565_v0, %s2443_s29  ;;  %s2463_s29 = smov 2   ;;  %vm578_vm14 = vmand %vm2904_vm11, %vm2759_vm10 }
  0x48   :  { %vm615_vm15 = vmand %vm2904_vm11, %vm2751_vm9 }
  0x49   :  { %vm652_vm2 = vmand %vm2904_vm11, %vm2787_vm4 }
  0x4a   :  { %409 = vrot.lane.b32.xlu0 %v2555_v59, %s2444_s30 }
  0x4b   :  { %411 = vrot.lane.b32.xlu1 %v2577_v3, %s2444_s30 }
  0x4e   :  { %416 = vrot.lane.b32.xlu0 %v2544_v52, %s2444_s30 }
  0x4f   :  { %418 = vrot.lane.b32.xlu1 %v2565_v0, %s2444_s30  ;;  %s2748_s30 = sld [smem:[#allocation2 + $0x3]] }
  0x52   :  { %446 = vrot.lane.b32.xlu0 %v2555_v59, %s2445_s5 }
  0x53   :  { %448 = vrot.lane.b32.xlu1 %v2577_v3, %s2445_s5 }
  0x56   :  { %453 = vrot.lane.b32.xlu0 %v2544_v52, %s2445_s5 }
  0x57   :  { %455 = vrot.lane.b32.xlu1 %v2565_v0, %s2445_s5  ;;  %s2755_s5 = sld [smem:[#allocation2 + $0x34]] }
  0x5a   :  { %483 = vrot.lane.b32.xlu0 %v2555_v59, %s2446_s6 }
  0x5b   :  { %485 = vrot.lane.b32.xlu1 %v2577_v3, %s2446_s6 }
  0x5e   :  { %490 = vrot.lane.b32.xlu0 %v2544_v52, %s2446_s6 }
  0x5f   :  { %492 = vrot.lane.b32.xlu1 %v2565_v0, %s2446_s6  ;;  %s2763_s6 = sld [smem:[#allocation2 + $0x4]] }
  0x62   :  { %520 = vrot.lane.b32.xlu0 %v2555_v59, %s2447_s7 }
  0x63   :  { %522 = vrot.lane.b32.xlu1 %v2577_v3, %s2447_s7 }
  0x66   :  { %527 = vrot.lane.b32.xlu0 %v2544_v52, %s2447_s7 }
  0x67   :  { %529 = vrot.lane.b32.xlu1 %v2565_v0, %s2447_s7  ;;  %s2767_s7 = sld [smem:[#allocation2 + $0x35]] }
  0x6a   :  { %557 = vrot.lane.b32.xlu0 %v2555_v59, %s2448_s8 }
  0x6b   :  { %559 = vrot.lane.b32.xlu1 %v2577_v3, %s2448_s8 }
  0x6e   :  { %564 = vrot.lane.b32.xlu0 %v2544_v52, %s2448_s8 }
  0x6f   :  { %566 = vrot.lane.b32.xlu1 %v2565_v0, %s2448_s8  ;;  %s2774_s8 = sld [smem:[#allocation2 + $0x5]] }
  0x72   :  { %594 = vrot.lane.b32.xlu0 %v2555_v59, %s2449_s9 }
  0x73   :  { %596 = vrot.lane.b32.xlu1 %v2577_v3, %s2449_s9 }
  0x76   :  { %601 = vrot.lane.b32.xlu0 %v2544_v52, %s2449_s9 }
  0x77   :  { %603 = vrot.lane.b32.xlu1 %v2565_v0, %s2449_s9  ;;  %s2781_s9 = sld [smem:[#allocation2 + $0x36]] }
  0x7a   :  { %631 = vrot.lane.b32.xlu0 %v2555_v59, %s2450_s10 }
  0x7b   :  { %633 = vrot.lane.b32.xlu1 %v2577_v3, %s2450_s10 }
  0x7e   :  { %638 = vrot.lane.b32.xlu0 %v2544_v52, %s2450_s10 }
  0x7f   :  { %640 = vrot.lane.b32.xlu1 %v2565_v0, %s2450_s10  ;;  %s2791_s10 = sld [smem:[#allocation2 + $0x6]] }
  0x82   :  { %668 = vrot.lane.b32.xlu0 %v2555_v59, %s2451_s11 }
  0x83   :  { %670 = vrot.lane.b32.xlu1 %v2577_v3, %s2451_s11 }
  0x86   :  { %675 = vrot.lane.b32.xlu0 %v2544_v52, %s2451_s11 }
  0x87   :  { %677 = vrot.lane.b32.xlu1 %v2565_v0, %s2451_s11  ;;  %s2803_s11 = sld [smem:[#allocation2 + $0x37]] }
  0x8a   :  { %705 = vrot.lane.b32.xlu0 %v2555_v59, %s2452_s12 }
  0x8b   :  { %707 = vrot.lane.b32.xlu1 %v2577_v3, %s2452_s12 }
  0x8e   :  { %712 = vrot.lane.b32.xlu0 %v2544_v52, %s2452_s12 }
  0x8f   :  { %714 = vrot.lane.b32.xlu1 %v2565_v0, %s2452_s12  ;;  %s2464_s12 = smov 1  }
  0x92   :  { %742 = vrot.lane.b32.xlu0 %v2555_v59, %s2453_s13 }
  0x93   :  { %744 = vrot.lane.b32.xlu1 %v2577_v3, %s2453_s13 }
  0x96   :  { %749 = vrot.lane.b32.xlu0 %v2544_v52, %s2453_s13 }
  0x97   :  { %751 = vrot.lane.b32.xlu1 %v2565_v0, %s2453_s13  ;;  %s2812_s13 = sld [smem:[#allocation2 + $0x7]] }
  0x9a   :  { %779 = vrot.lane.b32.xlu0 %v2555_v59, %s2454_s14 }
  0x9b   :  { %781 = vrot.lane.b32.xlu1 %v2577_v3, %s2454_s14 }
  0x9d   :  { %5879 = sst [smem:[#allocation40_spill]] %s2812_s13 }
  0x9e   :  { %786 = vrot.lane.b32.xlu0 %v2544_v52, %s2454_s14  ;;  %s3092_s13 = sld [smem:[#allocation2 + $0xf]] }
  0x9f   :  { %788 = vrot.lane.b32.xlu1 %v2565_v0, %s2454_s14  ;;  %s2819_s14 = sld [smem:[#allocation2 + $0x38]] }
  0xa2   :  { %816 = vrot.lane.b32.xlu0 %v2555_v59, %s2455_s15 }
  0xa3   :  { %818 = vrot.lane.b32.xlu1 %v2577_v3, %s2455_s15 }
  0xa4   :  { %v2631_v4 = vpop.permute.xlu0 %342  ;;  %v2633_v5 = vpop.permute.xlu1 %305  ;;  %5908 = sst [smem:[#allocation58_spill]] %s3092_s13 }
  0xa5   :  { %s3267_s13 = sld [smem:[#allocation2 + $0x11]] }
  0xa6   :  { %823 = vrot.lane.b32.xlu0 %v2544_v52, %s2455_s15 }
  0xa7   :  { %825 = vrot.lane.b32.xlu1 %v2565_v0, %s2455_s15  ;;  %s2827_s15 = sld [smem:[#allocation2 + $0x8]] }
  0xa8   :  { %v2637_v6 = vpop.permute.xlu0 %288 }
  0xa9   :  { %v2639_v7 = vpop.permute.xlu1 %307 }
  0xaa   :  { %853 = vrot.lane.b32.xlu0 %v2555_v59, %s2456_s16 }
  0xab   :  { %855 = vrot.lane.b32.xlu1 %v2577_v3, %s2456_s16 }
  0xac   :  { %v2643_v8 = vpop.permute.xlu0 %335 }
  0xad   :  { %v2645_v9 = vpop.permute.xlu1 %344 }
  0xae   :  { %860 = vrot.lane.b32.xlu0 %v2544_v52, %s2456_s16 }
  0xaf   :  { %862 = vrot.lane.b32.xlu1 %v2565_v0, %s2456_s16  ;;  %s2841_s16 = sld [smem:[#allocation2 + $0x39]] }
  0xb0   :  { %v2649_v10 = vpop.permute.xlu0 %372 }
  0xb1   :  { %v2651_v11 = vpop.permute.xlu1 %337 }
  0xb2   :  { %890 = vrot.lane.b32.xlu0 %v2555_v59, %s2457_s17 }
  0xb3   :  { %892 = vrot.lane.b32.xlu1 %v2577_v3, %s2457_s17 }
  0xb4   :  { %v2655_v12 = vpop.permute.xlu0 %290 }
  0xb5   :  { %v2657_v13 = vpop.permute.xlu1 %374  ;;  %5882 = sst [smem:[#allocation43_spill]] %s2841_s16 }
  0xb6   :  { %897 = vrot.lane.b32.xlu0 %v2544_v52, %s2457_s17  ;;  %s3112_s16 = sld [smem:[#allocation2 + $0x40]] }
  0xb7   :  { %899 = vrot.lane.b32.xlu1 %v2565_v0, %s2457_s17  ;;  %s2860_s17 = sld [smem:[#allocation2 + $0x9]] }
  0xb8   :  { %v2661_v14 = vpop.permute.xlu0 %379 }
  0xb9   :  { %v2663_v15 = vpop.permute.xlu1 %381 }
  0xba   :  { %927 = vrot.lane.b32.xlu0 %v2555_v59, %s2458_s18 }
  0xbb   :  { %929 = vrot.lane.b32.xlu1 %v2577_v3, %s2458_s18 }
  0xbc   :  { %v2667_v16 = vpop.permute.xlu0 %409  ;;  %5911 = sst [smem:[#allocation61_spill]] %s3112_s16  ;;  %s5946_s16 = smov 125  }
  0xbd   :  { %v2669_v17 = vpop.permute.xlu1 %411 }
  0xbe   :  { %934 = vrot.lane.b32.xlu0 %v2544_v52, %s2458_s18 }
  0xbf   :  { %936 = vrot.lane.b32.xlu1 %v2565_v0, %s2458_s18  ;;  %s2880_s18 = sld [smem:[#allocation2 + $0x3a]] }
  0xc0   :  { %v2673_v18 = vpop.permute.xlu0 %416 }
  0xc1   :  { %v2675_v19 = vpop.permute.xlu1 %418 }
  0xc2   :  { %964 = vrot.lane.b32.xlu0 %v2555_v59, %s2459_s19 }
  0xc3   :  { %966 = vrot.lane.b32.xlu1 %v2577_v3, %s2459_s19 }
  0xc4   :  { %v2679_v20 = vpop.permute.xlu0 %446 }
  0xc5   :  { %v2681_v21 = vpop.permute.xlu1 %448  ;;  %v6090_v60 = vstv %s2880_s18  ;;  %s2475_s18 = smov 109  }
  0xc6   :  { %971 = vrot.lane.b32.xlu0 %v2544_v52, %s2459_s19 }
  0xc7   :  { %973 = vrot.lane.b32.xlu1 %v2565_v0, %s2459_s19  ;;  %s2910_s19 = sld [smem:[#allocation2 + $0xa]] }
  0xc8   :  { %v2685_v22 = vpop.permute.xlu0 %453 }
  0xc9   :  { %v2687_v23 = vpop.permute.xlu1 %455 }
  0xca   :  { %1001 = vrot.lane.b32.xlu0 %v2555_v59, %s2460_s20 }
  0xcb   :  { %1003 = vrot.lane.b32.xlu1 %v2577_v3, %s2460_s20 }
  0xcc   :  { %v2691_v24 = vpop.permute.xlu0 %483 }
  0xcd   :  { %v2693_v25 = vpop.permute.xlu1 %485 }
  0xce   :  { %1008 = vrot.lane.b32.xlu0 %v2544_v52, %s2460_s20 }
  0xcf   :  { %1010 = vrot.lane.b32.xlu1 %v2565_v0, %s2460_s20  ;;  %s2466_s20 = smov 127  }
  0xd0   :  { %v2697_v26 = vpop.permute.xlu0 %490 }
  0xd1   :  { %v2699_v27 = vpop.permute.xlu1 %492 }
  0xd2   :  { %1038 = vrot.lane.b32.xlu0 %v2555_v59, %s2461_s21 }
  0xd3   :  { %1040 = vrot.lane.b32.xlu1 %v2577_v3, %s2461_s21 }
  0xd4   :  { %v2703_v28 = vpop.permute.xlu0 %520 }
  0xd5   :  { %5849 = vst [vmem:[#allocation22_spill] sm:$0xff] %v2703_v28  ;;  %v2705_v29 = vpop.permute.xlu1 %522  ;;  %v5959_v28 = vstv %s2727_s27 }
  0xd6   :  { %5850 = vst [vmem:[#allocation23_spill] sm:$0xff] %v2705_v29  ;;  %1045 = vrot.lane.b32.xlu0 %v2544_v52, %s2461_s21 }
  0xd7   :  { %1047 = vrot.lane.b32.xlu1 %v2565_v0, %s2461_s21  ;;  %s2924_s21 = sld [smem:[#allocation2 + $0x3b]] }
  0xd8   :  { %v2709_v30 = vpop.permute.xlu0 %527 }
  0xd9   :  { %5851 = vst [vmem:[#allocation24_spill] sm:$0xff] %v2709_v30  ;;  %v2713_v32 = vpop.permute.xlu1 %529 }
  0xda   :  { %5852 = vst [vmem:[#allocation25_spill] sm:$0xff] %v2713_v32  ;;  %1075 = vrot.lane.b32.xlu0 %v2555_v59, %s2462_s24 }
  0xdb   :  { %1077 = vrot.lane.b32.xlu1 %v2577_v3, %s2462_s24 }
  0xdc   :  { %v2721_v35 = vpop.permute.xlu0 %557 }
  0xdd   :  { %5853 = vst [vmem:[#allocation26_spill] sm:$0xff] %v2721_v35  ;;  %v2725_v37 = vpop.permute.xlu1 %559 }
  0xde   :  { %5854 = vst [vmem:[#allocation27_spill] sm:$0xff] %v2725_v37  ;;  %1082 = vrot.lane.b32.xlu0 %v2544_v52, %s2462_s24 }
  0xdf   :  { %1084 = vrot.lane.b32.xlu1 %v2565_v0, %s2462_s24  ;;  %s2980_s24 = sld [smem:[#allocation2 + $0xc]] }
  0xe0   :  { %v2735_v39 = vpop.permute.xlu0 %564 }
  0xe1   :  { %5855 = vst [vmem:[#allocation28_spill] sm:$0xff] %v2735_v39  ;;  %v2739_v40 = vpop.permute.xlu1 %566 }
  0xe2   :  { %5856 = vst [vmem:[#allocation29_spill] sm:$0xff] %v2739_v40  ;;  %1112 = vrot.lane.b32.xlu0 %v2555_v59, %s2463_s29 }
  0xe3   :  { %1114 = vrot.lane.b32.xlu1 %v2577_v3, %s2463_s29 }
  0xe4   :  { %v2757_v47 = vpop.permute.xlu0 %594 }
  0xe5   :  { %5862 = vst [vmem:[#allocation31_spill] sm:$0xff] %v2757_v47  ;;  %v2765_v49 = vpop.permute.xlu1 %596  ;;  %5898 = sst [smem:[#allocation50_spill]] %s2980_s24 }
  0xe6   :  { %5866 = vst [vmem:[#allocation33_spill] sm:$0xff] %v2765_v49  ;;  %1119 = vrot.lane.b32.xlu0 %v2544_v52, %s2463_s29  ;;  %s3190_s24 = sld [smem:[#allocation2 + $0x10]] }
  0xe7   :  { %1121 = vrot.lane.b32.xlu1 %v2565_v0, %s2463_s29  ;;  %s3001_s29 = sld [smem:[#allocation2 + $0x3d]] }
  0xe8   :  { %v2783_v55 = vpop.permute.xlu0 %601 }
  0xe9   :  { %5867 = vst [vmem:[#allocation34_spill] sm:$0xff] %v2783_v55  ;;  %v2793_v58 = vpop.permute.xlu1 %603 }
  0xea   :  { %5871 = vst [vmem:[#allocation36_spill] sm:$0xff] %v2793_v58  ;;  %1149 = vrot.lane.b32.xlu0 %v2555_v59, %s2464_s12 }
  0xeb   :  { %1151 = vrot.lane.b32.xlu1 %v2577_v3, %s2464_s12 }
  0xec   :  { %v2821_v33 = vpop.permute.xlu0 %631 }
  0xed   :  { %5880 = vst [vmem:[#allocation41_spill] sm:$0xff] %v2821_v33  ;;  %v2829_v38 = vpop.permute.xlu1 %633  ;;  %v2892_v33 = vsel %vm393_vm7, 1, %v5723_v45  ;;  %v5894_v45 = vmov 0   ;;  %vm5895_vm7 = vmand %vm2744_vm8, %vm2808_vm6 }
  0xee   :  { %5881 = vst [vmem:[#allocation42_spill] sm:$0xff] %v2829_v38  ;;  %1156 = vrot.lane.b32.xlu0 %v2544_v52, %s2464_s12  ;;  %v2936_v1 = vsel %vm5895_vm7, 1, %v5894_v45  ;;  %v2993_v38 = vsel %vm541_vm12, 1, %v5894_v45  ;;  %v3010_v42 = vsel %vm578_vm14, 1, %v5894_v45  ;;  %vm689_vm8 = vmand %vm2904_vm11, %vm2799_vm5  ;;  %v3068_v58 = vsel %vm652_vm2, 1, %v5894_v45 }
  0xef   :  { %1158 = vrot.lane.b32.xlu1 %v2565_v0, %s2464_s12  ;;  %5899 = vst [vmem:[#allocation51_spill] sm:$0xff] %v3010_v42  ;;  %s3018_s12 = sld [smem:[#allocation2 + $0xd]]  ;;  %vm726_vm7 = vmand %vm2904_vm11, %vm2808_vm6  ;;  %v5938_v42 = vrot.slane %v2892_v33, %v2832_v41 }
  0xf0   :  { %v2882_v50 = vpop.permute.xlu0 %638  ;;  %vm763_vm12 = vmand %vm2904_vm11, %vm2856_vm3  ;;  %5904 = vst [vmem:[#allocation56_spill] sm:$0xff] %v3068_v58  ;;  %v3106_v37 = vsel %vm726_vm7, 1, %v5894_v45 }
  0xf1   :  { %5889 = vst [vmem:[#allocation46_spill] sm:$0xff] %v2882_v50  ;;  %v2908_v2 = vpop.permute.xlu1 %640  ;;  %v2972_v50 = vsel %vm504_vm1, 1, %v5894_v45  ;;  %vm145_vm1 = vcmp.lt.s32.totalorder %v143_v53, 16  ;;  %5910 = vst [vmem:[#allocation60_spill] sm:$0xff] %v3106_v37  ;;  %v5922_v37 = vrot.slane %v2872_v51, %v2832_v41 }
  0xf2   :  { %5893 = vst [vmem:[#allocation47_spill] sm:$0xff] %v2908_v2  ;;  %1224 = vrot.lane.b32.xlu0 %v2555_v59, %s2466_s20  ;;  %vm3073_vm14 = vmand %vm144_vm0, %vm145_vm1 }
  0xf3   :  { %1226 = vrot.lane.b32.xlu1 %v2577_v3, %s2466_s20  ;;  %vm800_vm2 = vmand %vm2904_vm11, %vm2876_vm13  ;;  %vm3213_vm7 = vcmp.eq.s32.totalorder %v5922_v37, 1 }
  0xf4   :  { %v2958_v55 = vpop.permute.xlu0 %668  ;;  %vm837_vm0 = vmand %vm3073_vm14, %vm2759_vm10 }
  0xf5   :  { %5896 = vst [vmem:[#allocation48_spill] sm:$0xff] %v2958_v55  ;;  %v2978_v2 = vpop.permute.xlu1 %670  ;;  %v3031_v55 = vsel %vm615_vm15, 1, %v5894_v45  ;;  %vm5774_vm15 = vcmp.lt.s32.totalorder %v2844_v61, 50  ;;  %vm874_vm1 = vmand %vm3073_vm14, %vm2751_vm9  ;;  %v3171_v44 = vsel %vm837_vm0, 1, %v5894_v45  ;;  %vm5947_vm9 = vcmp.lt.s32.totalorder %v2844_v61, 50 }
  0xf6   :  { %5897 = vst [vmem:[#allocation49_spill] sm:$0xff] %v2978_v2  ;;  %1231 = vrot.lane.b32.xlu0 %v2544_v52, %s2466_s20  ;;  %5900 = vst [vmem:[#allocation52_spill] sm:$0xff] %v3031_v55  ;;  %v3128_v55 = vsel %vm763_vm12, 1, %v5894_v45  ;;  %v3180_v58 = vsel %vm874_vm1, 1, %v5894_v45  ;;  %vm3278_vm1 = vcmp.eq.s32.totalorder %v5938_v42, 1 }
  0xf7   :  { %1233 = vrot.lane.b32.xlu1 %v2565_v0, %s2466_s20  ;;  %s3039_s20 = sld [smem:[#allocation2 + $0x3e]]  ;;  %5913 = vst [vmem:[#allocation63_spill] sm:$0xff] %v3128_v55  ;;  %5916 = vst [vmem:[#allocation66_spill] sm:$0xff] %v3171_v44  ;;  %v340_v44 = vsel %vm5774_vm15, %v2643_v8, %v2651_v11 }
  0xf8   :  { %v3033_v2 = vpop.permute.xlu0 %675  ;;  %5918 = vst [vmem:[#allocation68_spill] sm:$0xff] %v3180_v58  ;;  %v5955_v58 = vstv %s2723_s25  ;;  %s3362_s25 = sld [smem:[#allocation2 + $0x43]] }
  0xf9   :  { %5901 = vst [vmem:[#allocation53_spill] sm:$0xff] %v3033_v2  ;;  %v3047_v35 = vpop.permute.xlu1 %677  ;;  %v5956_v56 = vmov %v5955_v58 }
  0xfa   :  { %5902 = vst [vmem:[#allocation54_spill] sm:$0xff] %v3047_v35  ;;  %1261 = vrot.lane.b32.xlu0 %v2555_v59, %s2467_s26  ;;  %v3089_v35 = vsel %vm689_vm8, 1, %v5894_v45 }
  0xfb   :  { %5907 = vst [vmem:[#allocation57_spill] sm:$0xff] %v3089_v35  ;;  %1263 = vrot.lane.b32.xlu1 %v2577_v3, %s2467_s26  ;;  %v5925_v35 = vrot.slane %v2872_v51, %v2835_v46  ;;  %v5932_v51 = vrot.slane %v2852_v62, %v2835_v46 }
  0xfc   :  { %v3098_v2 = vpop.permute.xlu0 %705 }
  0xfd   :  { %5909 = vst [vmem:[#allocation59_spill] sm:$0xff] %v3098_v2  ;;  %v3120_v2 = vpop.permute.xlu1 %707  ;;  %vm3220_vm12 = vcmp.eq.s32.totalorder %v5925_v35, 1 }
  0xfe   :  { %5912 = vst [vmem:[#allocation62_spill] sm:$0xff] %v3120_v2  ;;  %1268 = vrot.lane.b32.xlu0 %v2544_v52, %s2467_s26  ;;  %v3157_v2 = vsel %vm800_vm2, 1, %v5894_v45  ;;  %vm5928_vm2 = vcmp.lt.s32.totalorder %v2844_v61, 51 }
  0xff   :  { %1270 = vrot.lane.b32.xlu1 %v2565_v0, %s2467_s26  ;;  %5914 = vst [vmem:[#allocation64_spill] sm:$0xff] %v3157_v2  ;;  %s5762_s26 = smov 125   ;;  %vm5929_vm0 = vmmov %vm5928_vm2 }
 0x100   :  { %v3159_v49 = vpop.permute.xlu0 %712  ;;  %v296_v37 = vsel %vm5929_vm0, %v2655_v12, %v2637_v6  ;;  %vm5931_vm8 = vmmov %vm5929_vm0  ;;  %vm3255_vm0 = vcmp.eq.s32.totalorder %v5932_v51, 1  ;;  %v5937_v51 = vstv %s2730_s2 }
 0x101   :  { %5915 = vst [vmem:[#allocation65_spill] sm:$0xff] %v3159_v49  ;;  %v3173_v53 = vpop.permute.xlu1 %714  ;;  %v341_v49 = vsel %vm5774_vm15, %v2651_v11, %v2643_v8  ;;  %v5941_v11 = vrot.slane %v2892_v33, %v2835_v46  ;;  %v5948_v33 = vstv %s2737_s1  ;;  %s2469_s1 = smov 115  }
 0x102   :  { %5917 = vst [vmem:[#allocation67_spill] sm:$0xff] %v3173_v53  ;;  %1298 = vrot.lane.b32.xlu0 %v2555_v59, %s5762_s26  ;;  %v5919_v53 = vrot.slane %v2852_v62, %v2832_v41  ;;  %v349_v40 = vmul.f32 %v5937_v51, %v341_v49  ;;  %v346_v49 = vsel %vm5947_vm9, %v2631_v4, %v2645_v9  ;;  %vm948_vm9 = vmand %vm3073_vm14, %vm2799_vm5 }
 0x103   :  { %1300 = vrot.lane.b32.xlu1 %v2577_v3, %s5762_s26  ;;  %s3238_s26 = sld [smem:[#allocation2 + $0x41]]  ;;  %v312_v42 = vmul.f32 %v5948_v33, %v296_v37  ;;  %v5949_v51 = vmov %v5948_v33  ;;  %v353_v32 = vmul.f32 %v5959_v28, %v346_v49  ;;  %vm985_vm5 = vmand %vm3073_vm14, %vm2808_vm6 }
 0x104   :  { %vm3206_vm11 = vcmp.eq.s32.totalorder %v5919_v53, 1  ;;  %v295_v53 = vsel %vm5928_vm2, %v2637_v6, %v2655_v12  ;;  %v3233_v43 = vpop.permute.xlu0 %742  ;;  %v309_v6 = vsel %vm5931_vm8, %v2633_v5, %v2639_v7  ;;  %v347_v12 = vsel %vm5774_vm15, %v2645_v9, %v2631_v4  ;;  %vm5936_vm8 = vmmov %vm5928_vm2 }
 0x105   :  { %5930 = vst [vmem:[#allocation69_spill] sm:$0xff] %v3233_v43  ;;  %v3263_v43 = vpop.permute.xlu1 %744  ;;  %v310_v62 = vsel %vm5936_vm8, %v2639_v7, %v2633_v5  ;;  %vm3285_vm2 = vcmp.eq.s32.totalorder %v5941_v11, 1  ;;  %vm5944_vm8 = vcmp.lt.s32.totalorder %v2844_v61, 49  ;;  %v313_v11 = vmul.f32 %v5949_v51, %v295_v53 }
 0x106   :  { %5935 = vst [vmem:[#allocation70_spill] sm:$0xff] %v3263_v43  ;;  %v383_v5 = vsel %vm5944_vm8, %v2661_v14, %v2663_v15  ;;  %vm5945_vm15 = vmmov %vm5944_vm8  ;;  %1305 = vrot.lane.b32.xlu0 %v2544_v52, %s5946_s16  ;;  %v5952_v4 = vstv %s2727_s27  ;;  %v377_v37 = vsel %vm5944_vm8, %v2649_v10, %v2657_v13  ;;  %v315_v43 = vmul.f32 %v5955_v58, %v310_v62  ;;  %s3378_s27 = sld [smem:[#allocation2 + $0x13]] }
 0x107   :  { %v384_v7 = vsel %vm5945_vm15, %v2663_v15, %v2661_v14  ;;  %1307 = vrot.lane.b32.xlu1 %v2565_v0, %s5946_s16  ;;  %vm5950_vm15 = vmand %vm3073_vm14, %vm2787_vm4  ;;  %v352_v9 = vmul.f32 %v5952_v4, %v347_v12  ;;  %v5953_v15 = vstv %s2730_s2  ;;  %v316_v12 = vmul.f32 %v5956_v56, %v309_v6  ;;  %s3347_s2 = sld [smem:[#allocation2 + $0x12]]  ;;  %s2470_s16 = smov 114  }
 0x108   :  { %v3317_v14 = vsel %vm5950_vm15, 1, %v5894_v45  ;;  %v350_v53 = vmul.f32 %v5953_v15, %v340_v44  ;;  %vm5954_vm15 = vmmov %vm5944_vm8  ;;  %v3335_v51 = vpop.permute.xlu0 %749  ;;  %v5957_v4 = vstv %s2741_s3  ;;  %v5961_v56 = vstv %s2733_s28  ;;  %s3399_s28 = sld [smem:[#allocation2 + $0x44]] }
 0x109   :  { %5951 = vst [vmem:[#allocation71_spill] sm:$0xff] %v3317_v14  ;;  %v378_v33 = vsel %vm5954_vm15, %v2657_v13, %v2649_v10  ;;  %v389_v44 = vmul.f32 %v5957_v4, %v384_v7  ;;  %v5958_v15 = vmov %v5957_v4  ;;  %v3345_v29 = vpop.permute.xlu1 %751  ;;  %v354_v30 = vadd.f32 %v352_v9, %v349_v40  ;;  %s3463_s3 = sld [smem:[#allocation2 + $0x14]]  ;;  %v6107_v14 = vld [vmem:[#allocation48_spill] sm:$0xff] }
 0x10a   :  { %v390_v48 = vmul.f32 %v5958_v15, %v383_v5  ;;  %1335 = vrot.lane.b32.xlu0 %v2555_v59, %s2469_s1  ;;  %v3360_v13 = vsel %vm948_vm9, 1, %v5894_v45  ;;  %v386_v58 = vmul.f32 %v5961_v56, %v378_v33  ;;  %v5962_v6 = vmov %v5961_v56 }
 0x10b   :  { %5960 = vst [vmem:[#allocation72_spill] sm:$0xff] %v3360_v13  ;;  %v387_v28 = vmul.f32 %v5962_v6, %v377_v37  ;;  %v317_v40 = vadd.f32 %v315_v43, %v312_v42  ;;  %v318_v62 = vadd.f32 %v316_v12, %v313_v11  ;;  %1337 = vrot.lane.b32.xlu1 %v2577_v3, %s2469_s1  ;;  %vm5966_vm15 = vcmp.lt.s32.totalorder %v2844_v61, 48 }
 0x10c   :  { %v355_v5 = vadd.f32 %v353_v32, %v350_v53  ;;  %v3371_v7 = vpop.permute.xlu0 %779  ;;  %v391_v43 = vadd.f32 %v389_v44, %v386_v58  ;;  %v5963_v11 = vrot.slane %v2900_v57, %v2832_v41  ;;  %v421_v32 = vsel %vm5966_vm15, %v2675_v19, %v2673_v18 }
 0x10d   :  { %v392_v42 = vadd.f32 %v390_v48, %v387_v28  ;;  %vm487_vm8 = vcmp.lt.s32.totalorder %v2844_v61, 46  ;;  %v3392_v53 = vpop.permute.xlu1 %781  ;;  %v5967_v48 = vrot.slane %v2900_v57, %v2835_v46  ;;  %v420_v44 = vsel %vm5966_vm15, %v2673_v18, %v2675_v19 }
 0x10e   :  { %vm3383_vm9 = vcmp.eq.s32.totalorder %v5963_v11, 1  ;;  %1342 = vrot.lane.b32.xlu0 %v2544_v52, %s2469_s1  ;;  %v368_v58 = vsel %vm3206_vm11, %v354_v30, 0.0  ;;  %v331_v6 = vsel %vm3213_vm7, %v317_v40, 0.0  ;;  %v332_v18 = vsel %vm3220_vm12, %v318_v62, 0.0  ;;  %vm5970_vm11 = vmmov %vm5966_vm15 }
 0x10f   :  { %vm3404_vm4 = vcmp.eq.s32.totalorder %v5967_v48, 1  ;;  %v415_v19 = vsel %vm5966_vm15, %v2669_v17, %v2667_v16  ;;  %1344 = vrot.lane.b32.xlu1 %v2565_v0, %s2469_s1  ;;  %v369_v39 = vsel %vm3255_vm0, %v355_v5, 0.0  ;;  %v414_v2 = vsel %vm5970_vm11, %v2667_v16, %v2669_v17  ;;  %vm1022_vm7 = vmand %vm3073_vm14, %vm2856_vm3  ;;  %5974 = sst [smem:[#allocation74_spill]] %s3463_s3 }
 0x110   :  { %v5971_v30 = vstv %s2755_s5  ;;  %v3439_v28 = vpop.permute.xlu0 %786  ;;  %v3447_v35 = vsel %vm985_vm5, 1, %v5894_v45  ;;  %v405_v16 = vsel %vm3278_vm1, %v391_v43, 0.0  ;;  %v406_v17 = vsel %vm3285_vm2, %v392_v42, 0.0  ;;  %s2471_s5 = smov 113   ;;  %s3732_s1 = sld [smem:[#allocation2 + $0x48]] }
 0x111   :  { %v426_v47 = vmul.f32 %v5971_v30, %v421_v32  ;;  %5972 = vst [vmem:[#allocation73_spill] sm:$0xff] %v3447_v35  ;;  %v5973_v40 = vmov %v5971_v30  ;;  %vm524_vm12 = vcmp.lt.s32.totalorder %v2844_v61, 45  ;;  %v3460_v5 = vpop.permute.xlu1 %788  ;;  %v370_v32 = vadd.f32 %v368_v58, %v331_v6  ;;  %s3747_s3 = sld [smem:[#allocation2 + $0x49]] }
 0x112   :  { %v427_v62 = vmul.f32 %v5973_v40, %v420_v44  ;;  %v371_v48 = vadd.f32 %v369_v39, %v332_v18  ;;  %v5975_v30 = vstv %s2748_s30  ;;  %1372 = vrot.lane.b32.xlu0 %v2555_v59, %s2470_s16  ;;  %v3484_v58 = vsel %vm1022_vm7, 1, %v5894_v45  ;;  %s3536_s30 = sld [smem:[#allocation2 + $0x45]]  ;;  %vm1059_vm7 = vmand %vm3073_vm14, %vm2876_vm13 }
 0x113   :  { %v423_v12 = vmul.f32 %v5975_v30, %v415_v19  ;;  %v5976_v8 = vmov %v5975_v30  ;;  %1374 = vrot.lane.b32.xlu1 %v2577_v3, %s2470_s16  ;;  %5977 = vst [vmem:[#allocation75_spill] sm:$0xff] %v3484_v58  ;;  %v407_v6 = vadd.f32 %v405_v16, %v370_v32  ;;  %v5978_v30 = vrot.slane %v2936_v1, %v2832_v41  ;;  %v6103_v58 = vld [vmem:[#allocation18_spill] sm:$0xff] }
 0x114   :  { %v424_v43 = vmul.f32 %v5976_v8, %v414_v2  ;;  %v408_v18 = vadd.f32 %v406_v17, %v371_v48  ;;  %v3486_v39 = vpop.permute.xlu0 %816  ;;  %v5981_v11 = vrot.slane %v2936_v1, %v2835_v46  ;;  %vm5984_vm2 = vcmp.lt.s32.totalorder %v2844_v61, 47 }
 0x115   :  { %v428_v19 = vadd.f32 %v426_v47, %v423_v12  ;;  %vm3492_vm5 = vcmp.eq.s32.totalorder %v5978_v30, 1  ;;  %v457_v12 = vsel %vm5984_vm2, %v2685_v22, %v2687_v23  ;;  %vm5985_vm0 = vmmov %vm5984_vm2  ;;  %v3511_v16 = vpop.permute.xlu1 %818  ;;  %v5997_v17 = vstv %s2763_s6  ;;  %s3603_s6 = sld [smem:[#allocation2 + $0x15]] }
 0x116   :  { %v429_v40 = vadd.f32 %v427_v62, %v424_v43  ;;  %vm3499_vm1 = vcmp.eq.s32.totalorder %v5981_v11, 1  ;;  %v458_v47 = vsel %vm5985_vm0, %v2687_v23, %v2685_v22  ;;  %vm5986_vm15 = vmmov %vm5985_vm0  ;;  %v5987_v62 = vrot.slane %v2972_v50, %v2832_v41  ;;  %1379 = vrot.lane.b32.xlu0 %v2544_v52, %s2470_s16 }
 0x117   :  { %v451_v1 = vsel %vm5986_vm15, %v2679_v20, %v2681_v21  ;;  %v495_v22 = vsel %vm487_vm8, %v2699_v27, %v2697_v26  ;;  %vm5990_vm2 = vmmov %vm5985_vm0  ;;  %v5991_v43 = vrot.slane %v2972_v50, %v2835_v46  ;;  %1381 = vrot.lane.b32.xlu1 %v2565_v0, %s2470_s16  ;;  %vm151_vm15 = vcmp.ge.s32.totalorder %v2711_v31, 0  ;;  %s2472_s16 = smov 112  }
 0x118   :  { %vm3521_vm11 = vcmp.eq.s32.totalorder %v5987_v62, 1  ;;  %v452_v48 = vsel %vm5990_vm2, %v2681_v21, %v2679_v20  ;;  %v494_v62 = vsel %vm487_vm8, %v2697_v26, %v2699_v27  ;;  %vm152_vm2 = vcmp.lt.s32.totalorder %v2711_v31, 16  ;;  %v3567_v27 = vpop.permute.xlu0 %823 }
 0x119   :  { %vm3545_vm0 = vcmp.eq.s32.totalorder %v5991_v43, 1  ;;  %v442_v20 = vsel %vm3383_vm9, %v428_v19, 0.0  ;;  %v5994_v21 = vstv %s2767_s7  ;;  %v489_v26 = vsel %vm487_vm8, %v2693_v25, %v2691_v24  ;;  %s3636_s7 = sld [smem:[#allocation2 + $0x46]] }
 0x11a   :  { %v463_v50 = vmul.f32 %v5994_v21, %v458_v47  ;;  %v5995_v43 = vmov %v5994_v21  ;;  %v443_v37 = vsel %vm3404_vm4, %v429_v40, 0.0  ;;  %v488_v19 = vsel %vm487_vm8, %v2691_v24, %v2693_v25  ;;  %v3581_v21 = vpop.permute.xlu1 %825  ;;  %v6003_v24 = vld [vmem:[#allocation24_spill] sm:$0xff]  ;;  %v6004_v25 = vld [vmem:[#allocation25_spill] sm:$0xff]  ;;  %1409 = vrot.lane.b32.xlu0 %v2555_v59, %s2471_s5  ;;  %vm3609_vm8 = vmand %vm151_vm15, %vm152_vm2 }
 0x11b   :  { %v464_v2 = vmul.f32 %v5995_v43, %v457_v12  ;;  %v5996_v12 = vstv %s2781_s9  ;;  %v460_v32 = vmul.f32 %v5997_v17, %v452_v48  ;;  %v5998_v23 = vmov %v5997_v17  ;;  %1411 = vrot.lane.b32.xlu1 %v2577_v3, %s2471_s5  ;;  %s3696_s9 = sld [smem:[#allocation2 + $0x47]] }
 0x11c   :  { %v500_v47 = vmul.f32 %v5996_v12, %v495_v22  ;;  %v461_v44 = vmul.f32 %v5998_v23, %v451_v1  ;;  %v5999_v42 = vmov %v5996_v12  ;;  %v6000_v4 = vrot.slane %v2993_v38, %v2832_v41  ;;  %v3644_v34 = vpop.permute.xlu0 %853 }
 0x11d   :  { %v501_v15 = vmul.f32 %v5999_v42, %v494_v62  ;;  %v532_v22 = vsel %vm524_vm12, %v6004_v25, %v6003_v24  ;;  %v444_v17 = vadd.f32 %v442_v20, %v407_v6  ;;  %v6007_v1 = vstv %s2774_s8  ;;  %6015 = vst [vmem:[#allocation25_spill] sm:$0xff] %v3644_v34  ;;  %s3666_s8 = sld [smem:[#allocation2 + $0x16]]  ;;  %v6127_v34 = vld [vmem:[#allocation59_spill] sm:$0xff] }
 0x11e   :  { %vm3593_vm4 = vcmp.eq.s32.totalorder %v6000_v4, 1  ;;  %v497_v23 = vmul.f32 %v6007_v1, %v489_v26  ;;  %v6008_v48 = vrot.slane %v2993_v38, %v2835_v46  ;;  %v531_v31 = vsel %vm524_vm12, %v6003_v24, %v6004_v25  ;;  %v6013_v4 = vld [vmem:[#allocation22_spill] sm:$0xff]  ;;  %v6014_v24 = vld [vmem:[#allocation23_spill] sm:$0xff]  ;;  %1416 = vrot.lane.b32.xlu0 %v2544_v52, %s2471_s5 }
 0x11f   :  { %v3634_v38 = vsel %vm1059_vm7, 1, %v5894_v45  ;;  %v465_v6 = vadd.f32 %v463_v50, %v460_v32  ;;  %v466_v20 = vadd.f32 %v464_v2, %v461_v44  ;;  %v6012_v26 = vmov %v6007_v1  ;;  %v3653_v44 = vpop.permute.xlu1 %855  ;;  %vm1096_vm7 = vmand %vm3609_vm8, %vm2759_vm10  ;;  %1418 = vrot.lane.b32.xlu1 %v2565_v0, %s2471_s5  ;;  %s3741_s5 = sld [smem:[#allocation2 + $0x18]]  ;;  %v6087_v2 = vld [vmem:[#allocation41_spill] sm:$0xff] }
 0x120   :  { %vm3618_vm9 = vcmp.eq.s32.totalorder %v6008_v48, 1  ;;  %6011 = vst [vmem:[#allocation24_spill] sm:$0xff] %v3634_v38  ;;  %v498_v12 = vmul.f32 %v6012_v26, %v488_v19  ;;  %v526_v25 = vsel %vm524_vm12, %v6014_v24, %v6013_v4  ;;  %v445_v1 = vadd.f32 %v443_v37, %v408_v18  ;;  %6017 = vst [vmem:[#allocation22_spill] sm:$0xff] %v3653_v44 }
 0x121   :  { %v502_v48 = vadd.f32 %v500_v47, %v497_v23  ;;  %v525_v43 = vsel %vm524_vm12, %v6013_v4, %v6014_v24  ;;  %v6016_v10 = vstv %s2803_s11  ;;  %v6020_v47 = vstv %s2791_s10  ;;  %v6021_v23 = vld [vmem:[#allocation51_spill] sm:$0xff]  ;;  %s3714_s11 = sld [smem:[#allocation2 + $0x17]] }
 0x122   :  { %v537_v32 = vmul.f32 %v6016_v10, %v532_v22  ;;  %v503_v50 = vadd.f32 %v501_v15, %v498_v12  ;;  %v6019_v19 = vmov %v6016_v10  ;;  %v534_v22 = vmul.f32 %v6020_v47, %v526_v25  ;;  %v6028_v12 = vld [vmem:[#allocation29_spill] sm:$0xff]  ;;  %v6029_v24 = vld [vmem:[#allocation28_spill] sm:$0xff]  ;;  %v3704_v10 = vpop.permute.xlu0 %860  ;;  %s6040_s10 = sld [smem:[#allocation40_spill]]  ;;  %1446 = vrot.lane.b32.xlu0 %v2555_v59, %s2472_s16 }
 0x123   :  { %v538_v18 = vmul.f32 %v6019_v19, %v531_v31  ;;  %v6022_v26 = vrot.slane %v6021_v23, %v2832_v41  ;;  %v6025_v15 = vrot.slane %v6021_v23, %v2835_v46  ;;  %vm6030_vm2 = vcmp.lt.s32.totalorder %v2844_v61, 35  ;;  %1448 = vrot.lane.b32.xlu1 %v2577_v3, %s2472_s16 }
 0x124   :  { %v568_v19 = vsel %vm6030_vm2, %v6029_v24, %v6028_v12  ;;  %vm6031_vm14 = vmmov %vm6030_vm2  ;;  %v479_v23 = vsel %vm3492_vm5, %v465_v6, 0.0  ;;  %v516_v8 = vsel %vm3521_vm11, %v502_v48, 0.0  ;;  %v539_v55 = vadd.f32 %v537_v32, %v534_v22  ;;  %v6034_v6 = vld [vmem:[#allocation27_spill] sm:$0xff] }
 0x125   :  { %vm3673_vm12 = vcmp.eq.s32.totalorder %v6022_v26, 1  ;;  %vm3680_vm15 = vcmp.eq.s32.totalorder %v6025_v15, 1  ;;  %v569_v25 = vsel %vm6031_vm14, %v6028_v12, %v6029_v24  ;;  %v480_v26 = vsel %vm3499_vm1, %v466_v20, 0.0  ;;  %v6035_v20 = vld [vmem:[#allocation26_spill] sm:$0xff]  ;;  %vm6036_vm5 = vmmov %vm6030_vm2 }
 0x126   :  { %v6032_v15 = vmov %v6020_v47  ;;  %v3712_v12 = vsel %vm1096_vm7, 1, %v5894_v45  ;;  %vm6037_vm1 = vmmov %vm6030_vm2  ;;  %v6038_v47 = vld [vmem:[#allocation30_spill] sm:$0xff]  ;;  %v517_v11 = vsel %vm3545_vm0, %v503_v50, 0.0  ;;  %v6041_v32 = vstv %s2819_s14  ;;  %1453 = vrot.lane.b32.xlu0 %v2544_v52, %s2472_s16  ;;  %s6060_s14 = sld [smem:[#allocation43_spill]] }
 0x127   :  { %v535_v37 = vmul.f32 %v6032_v15, %v525_v43  ;;  %6033 = vst [vmem:[#allocation23_spill] sm:$0xff] %v3712_v12  ;;  %v562_v43 = vsel %vm6036_vm5, %v6035_v20, %v6034_v6  ;;  %v563_v24 = vsel %vm6037_vm1, %v6034_v6, %v6035_v20  ;;  %v3726_v15 = vpop.permute.xlu1 %862  ;;  %vm6039_vm14 = vnez %v6038_v47  ;;  %v6074_v47 = vld [vmem:[#allocation46_spill] sm:$0xff]  ;;  %v6092_v12 = vld [vmem:[#allocation57_spill] sm:$0xff] }
 0x128   :  { %vm1133_vm11 = vmand %vm3609_vm8, %vm6039_vm14  ;;  %v574_v22 = vmul.f32 %v6041_v32, %v569_v25  ;;  %v6042_v57 = vmov %v6041_v32  ;;  %v481_v20 = vadd.f32 %v479_v23, %v444_v17  ;;  %v482_v56 = vadd.f32 %v480_v26, %v445_v1  ;;  %v6047_v25 = vld [vmem:[#allocation35_spill] sm:$0xff]  ;;  %1455 = vrot.lane.b32.xlu1 %v2565_v0, %s2472_s16  ;;  %s4815_s16 = sld [smem:[#allocation2 + $0x4f]] }
 0x129   :  { %v540_v48 = vadd.f32 %v538_v18, %v535_v37  ;;  %v575_v6 = vmul.f32 %v6042_v57, %v568_v19  ;;  %vm635_vm7 = vcmp.lt.s32.totalorder %v2844_v61, 33  ;;  %v6043_v50 = vstv %s6040_s10  ;;  %v3753_v19 = vpop.permute.xlu0 %890  ;;  %s2473_s10 = smov 111  }
 0x12a   :  { %v571_v18 = vmul.f32 %v6043_v50, %v563_v24  ;;  %v6044_v37 = vmov %v6043_v50  ;;  %6045 = vst [vmem:[#allocation51_spill] sm:$0xff] %v3753_v19  ;;  %v3763_v1 = vsel %vm1133_vm11, 1, %v5894_v45  ;;  %vm6048_vm0 = vnez %v6047_v25  ;;  %1483 = vrot.lane.b32.xlu0 %v2555_v59, %s2473_s10  ;;  %v6073_v25 = vld [vmem:[#allocation47_spill] sm:$0xff] }
 0x12b   :  { %v572_v57 = vmul.f32 %v6044_v37, %v562_v43  ;;  %6046 = vst [vmem:[#allocation29_spill] sm:$0xff] %v3763_v1  ;;  %vm1170_vm2 = vmand %vm3609_vm8, %vm6048_vm0  ;;  %v518_v23 = vadd.f32 %v516_v8, %v481_v20  ;;  %v519_v26 = vadd.f32 %v517_v11, %v482_v56  ;;  %v553_v43 = vsel %vm3593_vm4, %v539_v55, 0.0  ;;  %v3771_v24 = vpop.permute.xlu1 %892  ;;  %v6056_v56 = vld [vmem:[#allocation36_spill] sm:$0xff]  ;;  %v6057_v55 = vld [vmem:[#allocation34_spill] sm:$0xff] }
 0x12c   :  { %6049 = vst [vmem:[#allocation28_spill] sm:$0xff] %v3771_v24  ;;  %v554_v50 = vsel %vm3618_vm9, %v540_v48, 0.0  ;;  %v576_v37 = vadd.f32 %v574_v22, %v571_v18  ;;  %vm672_vm5 = vcmp.lt.s32.totalorder %v2844_v61, 32  ;;  %v3792_v62 = vsel %vm1170_vm2, 1, %v5894_v45  ;;  %v6051_v48 = vld [vmem:[#allocation33_spill] sm:$0xff]  ;;  %v6052_v22 = vld [vmem:[#allocation31_spill] sm:$0xff]  ;;  %1485 = vrot.lane.b32.xlu1 %v2577_v3, %s2473_s10 }
 0x12d   :  { %v577_v49 = vadd.f32 %v575_v6, %v572_v57  ;;  %6050 = vst [vmem:[#allocation27_spill] sm:$0xff] %v3792_v62  ;;  %v555_v11 = vadd.f32 %v553_v43, %v518_v23  ;;  %vm6053_vm4 = vcmp.lt.s32.totalorder %v2844_v61, 34  ;;  %v3802_v18 = vpop.permute.xlu0 %897  ;;  %v556_v8 = vadd.f32 %v554_v50, %v519_v26  ;;  %v6062_v57 = vld [vmem:[#allocation52_spill] sm:$0xff]  ;;  %v6106_v24 = vld [vmem:[#allocation49_spill] sm:$0xff] }
 0x12e   :  { %v599_v6 = vsel %vm6053_vm4, %v6052_v22, %v6051_v48  ;;  %vm6054_vm9 = vmmov %vm6053_vm4  ;;  %6055 = vst [vmem:[#allocation26_spill] sm:$0xff] %v3802_v18  ;;  %v590_v26 = vsel %vm3673_vm12, %v576_v37, 0.0  ;;  %v6063_v40 = vrot.slane %v6062_v57, %v2832_v41  ;;  %v1186_v4 = vstv %s3741_s5  ;;  %1490 = vrot.lane.b32.xlu0 %v2544_v52, %s2473_s10  ;;  %s2485_s5 = smov 81  }
 0x12f   :  { %v600_v20 = vsel %vm6054_vm9, %v6051_v48, %v6052_v22  ;;  %vm6058_vm1 = vmmov %vm6053_vm4  ;;  %v3814_v48 = vpop.permute.xlu1 %899  ;;  %v591_v50 = vsel %vm3680_vm15, %v577_v49, 0.0  ;;  %v6069_v31 = vstv %s2827_s15  ;;  %v6071_v32 = vstv %s6060_s14  ;;  %s2474_s15 = smov 110   ;;  %s4844_s14 = sld [smem:[#allocation2 + $0x1f]] }
 0x130   :  { %v605_v23 = vsel %vm6058_vm1, %v6057_v55, %v6056_v56  ;;  %vm6059_vm11 = vmmov %vm6058_vm1  ;;  %6061 = vst [vmem:[#allocation33_spill] sm:$0xff] %v3814_v48  ;;  %vm3824_vm4 = vcmp.eq.s32.totalorder %v6063_v40, 1  ;;  %v608_v37 = vmul.f32 %v6069_v31, %v600_v20  ;;  %v6070_v40 = vmov %v6069_v31  ;;  %1492 = vrot.lane.b32.xlu1 %v2565_v0, %s2473_s10  ;;  %s4853_s10 = sld [smem:[#allocation2 + $0x50]] }
 0x131   :  { %v606_v43 = vsel %vm6059_vm11, %v6056_v56, %v6057_v55  ;;  %v6066_v56 = vrot.slane %v6062_v57, %v2835_v46  ;;  %v609_v22 = vmul.f32 %v6070_v40, %v599_v6  ;;  %v6072_v33 = vmov %v6071_v32  ;;  %v3861_v20 = vpop.permute.xlu0 %927 }
 0x132   :  { %v611_v17 = vmul.f32 %v6071_v32, %v606_v43  ;;  %v612_v9 = vmul.f32 %v6072_v33, %v605_v23  ;;  %v642_v49 = vsel %vm635_vm7, %v6074_v47, %v6073_v25  ;;  %v643_v6 = vsel %vm635_vm7, %v6073_v25, %v6074_v47  ;;  %6075 = vst [vmem:[#allocation31_spill] sm:$0xff] %v3861_v20  ;;  %v6076_v32 = vld [vmem:[#allocation56_spill] sm:$0xff] }
 0x133   :  { %vm3831_vm9 = vcmp.eq.s32.totalorder %v6066_v56, 1  ;;  %v1191_v56 = vstv %s3747_s3  ;;  %v3863_v31 = vadd.f32 %v590_v26, %v555_v11  ;;  %v3865_v40 = vadd.f32 %v591_v50, %v556_v8  ;;  %v3881_v47 = vpop.permute.xlu1 %929  ;;  %v6084_v25 = vld [vmem:[#allocation16_spill] sm:$0xff]  ;;  %v6086_v50 = vld [vmem:[#allocation42_spill] sm:$0xff]  ;;  %1520 = vrot.lane.b32.xlu0 %v2555_v59, %s2474_s15  ;;  %s2482_s3 = smov 93  }
 0x134   :  { %v6077_v33 = vrot.slane %v6076_v32, %v2832_v41  ;;  %v6080_v43 = vrot.slane %v6076_v32, %v2835_v46  ;;  %6083 = vst [vmem:[#allocation36_spill] sm:$0xff] %v3881_v47  ;;  %v1187_v11 = vmul.f32 %v1186_v4, %v6084_v25  ;;  %v6085_v8 = vld [vmem:[#allocation20_spill] sm:$0xff]  ;;  %v637_v32 = vsel %vm635_vm7, %v6086_v50, %v6087_v2 }
 0x135   :  { %v1188_v26 = vmul.f32 %v1186_v4, %v6085_v8  ;;  %v6089_v8 = vld [vmem:[#allocation21_spill] sm:$0xff]  ;;  %v648_v36 = vmul.f32 %v6090_v60, %v643_v6  ;;  %v6091_v62 = vmov %v6090_v60  ;;  %v6096_v38 = vrot.slane %v6092_v12, %v2835_v46  ;;  %v6100_v60 = vld [vmem:[#allocation53_spill] sm:$0xff]  ;;  %1522 = vrot.lane.b32.xlu1 %v2577_v3, %s2474_s15  ;;  %v6143_v23 = vld [vmem:[#allocation70_spill] sm:$0xff] }
 0x136   :  { %vm3870_vm12 = vcmp.eq.s32.totalorder %v6077_v33, 1  ;;  %vm3877_vm15 = vcmp.eq.s32.totalorder %v6080_v43, 1  ;;  %v636_v33 = vsel %vm635_vm7, %v6087_v2, %v6086_v50  ;;  %v6088_v43 = vld [vmem:[#allocation17_spill] sm:$0xff]  ;;  %v3900_v54 = vmul.f32 %v1186_v4, %v6089_v8  ;;  %v3930_v8 = vpop.permute.xlu0 %934 }
 0x137   :  { %v3897_v25 = vmul.f32 %v1186_v4, %v6088_v43  ;;  %v649_v1 = vmul.f32 %v6091_v62, %v642_v49  ;;  %v6093_v2 = vrot.slane %v6092_v12, %v2832_v41  ;;  %vm3916_vm11 = vcmp.eq.s32.totalorder %v6096_v38, 1  ;;  %v6099_v4 = vld [vmem:[#allocation54_spill] sm:$0xff]  ;;  %6101 = vst [vmem:[#allocation34_spill] sm:$0xff] %v3930_v8  ;;  %v6102_v38 = vld [vmem:[#allocation14_spill] sm:$0xff]  ;;  %1527 = vrot.lane.b32.xlu0 %v2544_v52, %s2474_s15 }
 0x138   :  { %v679_v62 = vsel %vm672_vm5, %v6100_v60, %v6099_v4  ;;  %v680_v49 = vsel %vm672_vm5, %v6099_v4, %v6100_v60  ;;  %v613_v6 = vadd.f32 %v611_v17, %v608_v37  ;;  %v614_v12 = vadd.f32 %v612_v9, %v609_v22  ;;  %v3946_v17 = vpop.permute.xlu1 %936 }
 0x139   :  { %vm3909_vm7 = vcmp.eq.s32.totalorder %v6093_v2, 1  ;;  %v1192_v2 = vmul.f32 %v1191_v56, %v6102_v38  ;;  %v1193_v35 = vmul.f32 %v1191_v56, %v6103_v58  ;;  %v6104_v20 = vstv %s2860_s17  ;;  %6108 = vst [vmem:[#allocation52_spill] sm:$0xff] %v3946_v17  ;;  %v6119_v38 = vld [vmem:[#allocation65_spill] sm:$0xff]  ;;  %1529 = vrot.lane.b32.xlu1 %v2565_v0, %s2474_s15  ;;  %s6145_s17 = sld [smem:[#allocation50_spill]]  ;;  %s2486_s15 = smov 80  }
 0x13a   :  { %v645_v47 = vmul.f32 %v6104_v20, %v637_v32  ;;  %v6105_v13 = vmov %v6104_v20  ;;  %v673_v4 = vsel %vm672_vm5, %v6107_v14, %v6106_v24  ;;  %v674_v9 = vsel %vm672_vm5, %v6106_v24, %v6107_v14  ;;  %v6111_v32 = vld [vmem:[#allocation60_spill] sm:$0xff]  ;;  %v6118_v24 = vld [vmem:[#allocation67_spill] sm:$0xff] }
 0x13b   :  { %v646_v19 = vmul.f32 %v6105_v13, %v636_v33  ;;  %v6109_v22 = vstv %s2924_s21  ;;  %v6112_v13 = vrot.slane %v6111_v32, %v2832_v41  ;;  %v6115_v60 = vrot.slane %v6111_v32, %v2835_v46  ;;  %v6122_v32 = vld [vmem:[#allocation15_spill] sm:$0xff]  ;;  %1557 = vrot.lane.b32.xlu0 %v2555_v59, %s2475_s18  ;;  %s6179_s21 = sld [smem:[#allocation61_spill]] }
 0x13c   :  { %v685_v58 = vmul.f32 %v6109_v22, %v680_v49  ;;  %v6110_v37 = vmov %v6109_v22  ;;  %vm6120_vm5 = vcmp.lt.s32.totalorder %v2844_v61, 31  ;;  %v650_v22 = vadd.f32 %v648_v36, %v645_v47 }
 0x13d   :  { %v686_v20 = vmul.f32 %v6110_v37, %v679_v62  ;;  %vm3955_vm1 = vcmp.eq.s32.totalorder %v6112_v13, 1  ;;  %vm3962_vm2 = vcmp.eq.s32.totalorder %v6115_v60, 1  ;;  %v716_v49 = vsel %vm6120_vm5, %v6119_v38, %v6118_v24  ;;  %vm6121_vm0 = vmmov %vm6120_vm5  ;;  %v6123_v60 = vld [vmem:[#allocation19_spill] sm:$0xff]  ;;  %1559 = vrot.lane.b32.xlu1 %v2577_v3, %s2475_s18 }
 0x13e   :  { %v717_v62 = vsel %vm6121_vm0, %v6118_v24, %v6119_v38  ;;  %v651_v37 = vadd.f32 %v649_v1, %v646_v19  ;;  %v1194_v13 = vmul.f32 %v1191_v56, %v6122_v32  ;;  %v3979_v8 = vmul.f32 %v1191_v56, %v6123_v60  ;;  %v6126_v38 = vld [vmem:[#allocation62_spill] sm:$0xff]  ;;  %vm6128_vm5 = vmmov %vm6121_vm0  ;;  %v3993_v1 = vpop.permute.xlu0 %964  ;;  %v4003_v32 = vpop.permute.xlu1 %966 }
 0x13f   :  { %v6124_v17 = vstv %s2910_s19  ;;  %v710_v36 = vsel %vm6121_vm0, %v6127_v34, %v6126_v38  ;;  %v711_v19 = vsel %vm6128_vm5, %v6126_v38, %v6127_v34  ;;  %v627_v56 = vsel %vm3824_vm4, %v613_v6, 0.0  ;;  %1564 = vrot.lane.b32.xlu0 %v2544_v52, %s2475_s18  ;;  %s6176_s19 = sld [smem:[#allocation55_spill]] }
 0x140   :  { %v682_v18 = vmul.f32 %v6124_v17, %v674_v9  ;;  %v6125_v48 = vmov %v6124_v17  ;;  %v628_v47 = vsel %vm3831_vm9, %v614_v12, 0.0  ;;  %v4007_v34 = vadd.f32 %v1192_v2, %v1187_v11 }
 0x141   :  { %v683_v24 = vmul.f32 %v6125_v48, %v673_v4  ;;  %v6129_v48 = vstv %s2960_s23  ;;  %v4009_v38 = vadd.f32 %v1193_v35, %v1188_v26  ;;  %v6131_v30 = vstv %s2944_s22  ;;  %1566 = vrot.lane.b32.xlu1 %v2565_v0, %s2475_s18  ;;  %s2476_s22 = smov 99   ;;  %s2477_s23 = smov 98  }
 0x142   :  { %v722_v4 = vmul.f32 %v6129_v48, %v717_v62  ;;  %v6130_v9 = vmov %v6129_v48  ;;  %v687_v60 = vadd.f32 %v685_v58, %v682_v18  ;;  %v719_v6 = vmul.f32 %v6131_v30, %v711_v19  ;;  %v6135_v58 = vld [vmem:[#allocation63_spill] sm:$0xff]  ;;  %s4891_s18 = sld [smem:[#allocation2 + $0x51]] }
 0x143   :  { %v723_v17 = vmul.f32 %v6130_v9, %v716_v49  ;;  %v688_v44 = vadd.f32 %v686_v20, %v683_v24  ;;  %v6132_v55 = vmov %v6131_v30  ;;  %vm6133_vm4 = vcmp.lt.s32.totalorder %v2844_v61, 30  ;;  %1594 = vrot.lane.b32.xlu0 %v2555_v59, %s2476_s22 }
 0x144   :  { %v720_v12 = vmul.f32 %v6132_v55, %v710_v36  ;;  %v753_v49 = vsel %vm6133_vm4, %v3335_v51, %v3345_v29  ;;  %vm6134_vm9 = vmmov %vm6133_vm4  ;;  %v629_v11 = vadd.f32 %v627_v56, %v3863_v31  ;;  %v630_v35 = vadd.f32 %v628_v47, %v3865_v40  ;;  %v4044_v31 = vpop.permute.xlu0 %971  ;;  %v4059_v36 = vpop.permute.xlu1 %973 }
 0x145   :  { %v754_v18 = vsel %vm6134_vm9, %v3345_v29, %v3335_v51  ;;  %v664_v26 = vsel %vm3870_vm12, %v650_v22, 0.0  ;;  %v665_v2 = vsel %vm3877_vm15, %v651_v37, 0.0  ;;  %v6136_v20 = vrot.slane %v6135_v58, %v2832_v41  ;;  %v6144_v22 = vld [vmem:[#allocation69_spill] sm:$0xff]  ;;  %vm6146_vm0 = vmmov %vm6134_vm9  ;;  %1596 = vrot.lane.b32.xlu1 %v2577_v3, %s2476_s22 }
 0x146   :  { %v6139_v29 = vrot.slane %v6135_v58, %v2835_v46  ;;  %vm6142_vm12 = vnez %v5874_v63  ;;  %v724_v57 = vadd.f32 %v722_v4, %v719_v6  ;;  %v725_v40 = vadd.f32 %v723_v17, %v720_v12 }
 0x147   :  { %vm4033_vm5 = vcmp.eq.s32.totalorder %v6136_v20, 1  ;;  %vm1200_vm15 = vmand %vm3609_vm8, %vm6142_vm12  ;;  %v747_v37 = vsel %vm6134_vm9, %v6144_v22, %v6143_v23  ;;  %v748_v24 = vsel %vm6146_vm0, %v6143_v23, %v6144_v22  ;;  %vm857_vm14 = vcmp.lt.s32.totalorder %v2844_v61, 18  ;;  %v6155_v20 = vld [vmem:[#allocation64_spill] sm:$0xff]  ;;  %1601 = vrot.lane.b32.xlu0 %v2544_v52, %s2476_s22 }
 0x148   :  { %vm4040_vm4 = vcmp.eq.s32.totalorder %v6139_v29, 1  ;;  %v701_v19 = vsel %vm3909_vm7, %v687_v60, 0.0  ;;  %v702_v56 = vsel %vm3916_vm11, %v688_v44, 0.0  ;;  %v6147_v47 = vstv %s3001_s29  ;;  %s4567_s29 = sld [smem:[#allocation2 + $0x19]] }
 0x149   :  { %v759_v48 = vmul.f32 %v6147_v47, %v754_v18  ;;  %v6148_v4 = vmov %v6147_v47  ;;  %v666_v17 = vadd.f32 %v664_v26, %v629_v11  ;;  %v667_v30 = vadd.f32 %v665_v2, %v630_v35  ;;  %v4101_v26 = vpop.permute.xlu1 %1003  ;;  %1603 = vrot.lane.b32.xlu1 %v2565_v0, %s2476_s22  ;;  %s4929_s22 = sld [smem:[#allocation2 + $0x52]] }
 0x14a   :  { %v760_v9 = vmul.f32 %v6148_v4, %v753_v49  ;;  %v4072_v6 = vadd.f32 %v1194_v13, %v3897_v25  ;;  %v4080_v44 = vsel %vm1200_vm15, 1, %v5894_v45  ;;  %v6149_v50 = vstv %s6145_s17  ;;  %v4095_v13 = vpop.permute.xlu0 %1001  ;;  %s4882_s17 = sld [smem:[#allocation2 + $0x20]] }
 0x14b   :  { %v756_v43 = vmul.f32 %v6149_v50, %v748_v24  ;;  %v6150_v60 = vmov %v6149_v50  ;;  %vm6151_vm7 = vcmp.lt.s32.totalorder %v2844_v61, 29  ;;  %vm894_vm0 = vcmp.lt.s32.totalorder %v2844_v61, 17  ;;  %1631 = vrot.lane.b32.xlu0 %v2555_v59, %s2477_s23 }
 0x14c   :  { %v757_v55 = vmul.f32 %v6150_v60, %v747_v37  ;;  %v790_v12 = vsel %vm6151_vm7, %v3439_v28, %v3460_v5  ;;  %vm6152_vm11 = vmmov %vm6151_vm7  ;;  %v703_v49 = vadd.f32 %v701_v19, %v666_v17  ;;  %v704_v18 = vadd.f32 %v702_v56, %v667_v30  ;;  %v6166_v56 = vld [vmem:[#allocation66_spill] sm:$0xff] }
 0x14d   :  { %v791_v25 = vsel %vm6152_vm11, %v3460_v5, %v3439_v28  ;;  %v738_v11 = vsel %vm3955_vm1, %v724_v57, 0.0  ;;  %v739_v35 = vsel %vm3962_vm2, %v725_v40, 0.0  ;;  %v761_v2 = vadd.f32 %v759_v48, %v756_v43  ;;  %vm6153_vm15 = vmmov %vm6151_vm7  ;;  %v6222_v17 = vld [vmem:[#allocation36_spill] sm:$0xff]  ;;  %1633 = vrot.lane.b32.xlu1 %v2577_v3, %s2477_s23 }
 0x14e   :  { %v762_v58 = vadd.f32 %v760_v9, %v757_v55  ;;  %v784_v28 = vsel %vm6153_vm15, %v3371_v7, %v3392_v53  ;;  %vm6154_vm9 = vmmov %vm6151_vm7  ;;  %v6156_v33 = vrot.slane %v6155_v20, %v2832_v41  ;;  %v6159_v29 = vrot.slane %v6155_v20, %v2835_v46  ;;  %v6180_v20 = vld [vmem:[#allocation68_spill] sm:$0xff] }
 0x14f   :  { %v785_v5 = vsel %vm6154_vm9, %v3392_v53, %v3371_v7  ;;  %v6162_v40 = vstv %s3039_s20  ;;  %vm6164_vm7 = vcmp.lt.s32.totalorder %v2844_v61, 19  ;;  %v740_v24 = vadd.f32 %v738_v11, %v703_v49  ;;  %1638 = vrot.lane.b32.xlu0 %v2544_v52, %s2477_s23  ;;  %s2480_s20 = smov 95  }
 0x150   :  { %vm4114_vm1 = vcmp.eq.s32.totalorder %v6156_v33, 1  ;;  %vm4121_vm2 = vcmp.eq.s32.totalorder %v6159_v29, 1  ;;  %v796_v7 = vmul.f32 %v6162_v40, %v791_v25  ;;  %v6163_v53 = vmov %v6162_v40  ;;  %vm6165_vm11 = vmmov %vm6164_vm7  ;;  %v6189_v40 = vld [vmem:[#allocation22_spill] sm:$0xff] }
 0x151   :  { %v797_v23 = vmul.f32 %v6163_v53, %v790_v12  ;;  %v827_v22 = vsel %vm6164_vm7, %v3567_v27, %v3581_v21  ;;  %v828_v37 = vsel %vm6165_vm11, %v3581_v21, %v3567_v27  ;;  %v741_v19 = vadd.f32 %v739_v35, %v704_v18  ;;  %v4154_v27 = vpop.permute.xlu0 %1008  ;;  %vm6175_vm15 = vmmov %vm6165_vm11  ;;  %1640 = vrot.lane.b32.xlu1 %v2565_v0, %s2477_s23  ;;  %s4959_s23 = sld [smem:[#allocation2 + $0x22]] }
 0x152   :  { %v6167_v47 = vrot.slane %v6166_v56, %v2832_v41  ;;  %v6170_v4 = vrot.slane %v6166_v56, %v2835_v46  ;;  %v4158_v21 = vadd.f32 %v3979_v8, %v3900_v54  ;;  %v6173_v30 = vstv %s3018_s12  ;;  %v4174_v54 = vpop.permute.xlu1 %1010  ;;  %s4574_s12 = sld [smem:[#allocation2 + $0x4a]] }
 0x153   :  { %v793_v50 = vmul.f32 %v6173_v30, %v785_v5  ;;  %v6174_v43 = vmov %v6173_v30  ;;  %v821_v55 = vsel %vm6165_vm11, %v3486_v39, %v3511_v16  ;;  %v822_v12 = vsel %vm6175_vm15, %v3511_v16, %v3486_v39  ;;  %v6194_v30 = vld [vmem:[#allocation33_spill] sm:$0xff] }
 0x154   :  { %vm4143_vm9 = vcmp.eq.s32.totalorder %v6167_v47, 1  ;;  %vm4150_vm7 = vcmp.eq.s32.totalorder %v6170_v4, 1  ;;  %v794_v60 = vmul.f32 %v6174_v43, %v784_v28  ;;  %v6177_v8 = vstv %s3077_s4  ;;  %s6191_s4 = sld [smem:[#allocation58_spill]] }
 0x155   :  { %v833_v25 = vmul.f32 %v6177_v8, %v828_v37  ;;  %v6178_v49 = vmov %v6177_v8  ;;  %v864_v11 = vsel %vm857_vm14, %v3704_v10, %v3726_v15  ;;  %v865_v35 = vsel %vm857_vm14, %v3726_v15, %v3704_v10 }
 0x156   :  { %v834_v18 = vmul.f32 %v6178_v49, %v827_v22  ;;  %v775_v39 = vsel %vm4033_vm5, %v761_v2, 0.0  ;;  %v776_v16 = vsel %vm4040_vm4, %v762_v58, 0.0  ;;  %v798_v28 = vadd.f32 %v796_v7, %v793_v50  ;;  %v6190_v7 = vld [vmem:[#allocation25_spill] sm:$0xff]  ;;  %v4223_v22 = vpop.permute.xlu0 %1038  ;;  %v6195_v50 = vld [vmem:[#allocation26_spill] sm:$0xff] }
 0x157   :  { %v799_v5 = vadd.f32 %v797_v23, %v794_v60  ;;  %v6181_v33 = vrot.slane %v6180_v20, %v2832_v41  ;;  %v6184_v10 = vrot.slane %v6180_v20, %v2835_v46  ;;  %v6187_v62 = vstv %s6176_s19  ;;  %v6196_v20 = vld [vmem:[#allocation71_spill] sm:$0xff]  ;;  %s2487_s19 = smov 79  }
 0x158   :  { %v830_v51 = vmul.f32 %v6187_v62, %v822_v12  ;;  %v6188_v2 = vmov %v6187_v62  ;;  %v858_v53 = vsel %vm857_vm14, %v6190_v7, %v6189_v40  ;;  %v859_v23 = vsel %vm857_vm14, %v6189_v40, %v6190_v7 }
 0x159   :  { %vm4197_vm15 = vcmp.eq.s32.totalorder %v6181_v33, 1  ;;  %vm4204_vm11 = vcmp.eq.s32.totalorder %v6184_v10, 1  ;;  %v831_v58 = vmul.f32 %v6188_v2, %v821_v55  ;;  %v6192_v37 = vstv %s6179_s21  ;;  %v4237_v55 = vpop.permute.xlu1 %1040  ;;  %s4920_s21 = sld [smem:[#allocation2 + $0x21]] }
 0x15a   :  { %v870_v56 = vmul.f32 %v6192_v37, %v865_v35  ;;  %v6193_v47 = vmov %v6192_v37  ;;  %v901_v43 = vsel %vm894_vm0, %v6195_v50, %v6194_v30  ;;  %v902_v60 = vsel %vm894_vm0, %v6194_v30, %v6195_v50 }
 0x15b   :  { %v871_v4 = vmul.f32 %v6193_v47, %v864_v11  ;;  %v777_v12 = vadd.f32 %v775_v39, %v740_v24  ;;  %v778_v8 = vadd.f32 %v776_v16, %v741_v19  ;;  %v835_v49 = vadd.f32 %v833_v25, %v830_v51  ;;  %v6205_v39 = vld [vmem:[#allocation28_spill] sm:$0xff] }
 0x15c   :  { %v836_v35 = vadd.f32 %v834_v18, %v831_v58  ;;  %v6197_v11 = vrot.slane %v6196_v20, %v2832_v41  ;;  %v6200_v10 = vrot.slane %v6196_v20, %v2835_v46  ;;  %v6203_v24 = vstv %s6191_s4  ;;  %v6206_v16 = vld [vmem:[#allocation51_spill] sm:$0xff]  ;;  %v6216_v20 = vld [vmem:[#allocation52_spill] sm:$0xff]  ;;  %s2488_s4 = smov 78  }
 0x15d   :  { %v867_v19 = vmul.f32 %v6203_v24, %v859_v23  ;;  %v6204_v25 = vmov %v6203_v24  ;;  %v895_v51 = vsel %vm894_vm0, %v6206_v16, %v6205_v39  ;;  %v896_v2 = vsel %vm894_vm0, %v6205_v39, %v6206_v16  ;;  %v6209_v23 = vld [vmem:[#allocation72_spill] sm:$0xff] }
 0x15e   :  { %vm4242_vm14 = vcmp.eq.s32.totalorder %v6197_v11, 1  ;;  %vm4249_vm4 = vcmp.eq.s32.totalorder %v6200_v10, 1  ;;  %v868_v18 = vmul.f32 %v6204_v25, %v858_v53  ;;  %v6207_v58 = vstv %s3238_s26  ;;  %v6217_v11 = vld [vmem:[#allocation34_spill] sm:$0xff]  ;;  %v4296_v10 = vpop.permute.xlu0 %1045  ;;  %s4635_s26 = sld [smem:[#allocation2 + $0x1a]] }
 0x15f   :  { %v907_v40 = vmul.f32 %v6207_v58, %v902_v60  ;;  %v6208_v7 = vmov %v6207_v58  ;;  %v6210_v37 = vrot.slane %v6209_v23, %v2832_v41  ;;  %v6213_v30 = vrot.slane %v6209_v23, %v2835_v46  ;;  %v4302_v58 = vpop.permute.xlu1 %1047 }
 0x160   :  { %v908_v53 = vmul.f32 %v6208_v7, %v901_v43  ;;  %vm6218_vm5 = vcmp.lt.s32.totalorder %v2844_v61, 16  ;;  %v812_v24 = vsel %vm4114_vm1, %v798_v28, 0.0  ;;  %v813_v25 = vsel %vm4121_vm2, %v799_v5, 0.0 }
 0x161   :  { %vm4277_vm12 = vcmp.eq.s32.totalorder %v6210_v37, 1  ;;  %vm4284_vm0 = vcmp.eq.s32.totalorder %v6213_v30, 1  ;;  %v938_v60 = vsel %vm6218_vm5, %v6217_v11, %v6216_v20  ;;  %vm6219_vm10 = vmmov %vm6218_vm5  ;;  %v872_v39 = vadd.f32 %v870_v56, %v867_v19 }
 0x162   :  { %v939_v43 = vsel %vm6219_vm10, %v6216_v20, %v6217_v11  ;;  %v873_v16 = vadd.f32 %v871_v4, %v868_v18  ;;  %v6220_v7 = vstv %s3190_s24  ;;  %v6223_v20 = vld [vmem:[#allocation31_spill] sm:$0xff]  ;;  %vm6224_vm10 = vmmov %vm6218_vm5  ;;  %v849_v57 = vsel %vm4143_vm9, %v835_v49, 0.0  ;;  %s2479_s24 = smov 96  }
 0x163   :  { %v904_v23 = vmul.f32 %v6220_v7, %v896_v2  ;;  %v6221_v37 = vmov %v6220_v7  ;;  %v932_v11 = vsel %vm6224_vm10, %v6223_v20, %v6222_v17  ;;  %vm6225_vm1 = vmmov %vm6218_vm5  ;;  %v850_v28 = vsel %vm4150_vm7, %v836_v35, 0.0  ;;  %v6230_v49 = vld [vmem:[#allocation73_spill] sm:$0xff] }
 0x164   :  { %v905_v30 = vmul.f32 %v6221_v37, %v895_v51  ;;  %v933_v14 = vsel %vm6225_vm1, %v6222_v17, %v6223_v20  ;;  %v6226_v5 = vstv %s3299_s0  ;;  %v814_v18 = vadd.f32 %v812_v24, %v777_v12  ;;  %v4326_v17 = vpop.permute.xlu0 %1075  ;;  %s2478_s0 = smov 97  }
 0x165   :  { %v944_v56 = vmul.f32 %v6226_v5, %v939_v43  ;;  %v6227_v4 = vmov %v6226_v5  ;;  %v815_v51 = vadd.f32 %v813_v25, %v778_v8  ;;  %v909_v2 = vadd.f32 %v907_v40, %v904_v23  ;;  %v4355_v40 = vpop.permute.xlu1 %1077  ;;  %1668 = vrot.lane.b32.xlu0 %v2555_v59, %s2478_s0  ;;  %1670 = vrot.lane.b32.xlu1 %v2577_v3, %s2478_s0 }
 0x166   :  { %v945_v19 = vmul.f32 %v6227_v4, %v938_v60  ;;  %v910_v7 = vadd.f32 %v908_v53, %v905_v30  ;;  %v6228_v37 = vstv %s3267_s13  ;;  %v6231_v9 = vrot.slane %v6230_v49, %v2832_v41  ;;  %s6277_s13 = sld [smem:[#allocation74_spill]] }
 0x167   :  { %v941_v20 = vmul.f32 %v6228_v37, %v933_v14  ;;  %v6229_v63 = vmov %v6228_v37  ;;  %v6234_v60 = vrot.slane %v6230_v49, %v2835_v46  ;;  %vm6237_vm7 = vcmp.lt.s32.totalorder %v2844_v61, 15 }
 0x168   :  { %v942_v48 = vmul.f32 %v6229_v63, %v932_v11  ;;  %vm4335_vm2 = vcmp.eq.s32.totalorder %v6231_v9, 1  ;;  %v975_v63 = vsel %vm6237_vm7, %v4044_v31, %v4059_v36  ;;  %vm6238_vm5 = vmmov %vm6237_vm7  ;;  %vm1042_vm10 = vcmp.lt.s32.totalorder %v2844_v61, 13  ;;  %v6242_v11 = vld [vmem:[#allocation75_spill] sm:$0xff] }
 0x169   :  { %vm4342_vm9 = vcmp.eq.s32.totalorder %v6234_v60, 1  ;;  %v976_v8 = vsel %vm6238_vm5, %v4059_v36, %v4044_v31  ;;  %v851_v53 = vadd.f32 %v849_v57, %v814_v18  ;;  %v852_v43 = vadd.f32 %v850_v28, %v815_v51  ;;  %vm6239_vm7 = vmmov %vm6238_vm5  ;;  %v1085_v37 = vpop.permute.xlu1 %1084  ;;  %1675 = vrot.lane.b32.xlu0 %v2544_v52, %s2478_s0  ;;  %1677 = vrot.lane.b32.xlu1 %v2565_v0, %s2478_s0  ;;  %s4968_s0 = sld [smem:[#allocation2 + $0x53]] }
 0x16a   :  { %v886_v24 = vsel %vm4197_vm15, %v872_v39, 0.0  ;;  %v887_v25 = vsel %vm4204_vm11, %v873_v16, 0.0  ;;  %v946_v23 = vadd.f32 %v944_v56, %v941_v20  ;;  %v947_v30 = vadd.f32 %v945_v19, %v942_v48  ;;  %v1083_v56 = vpop.permute.xlu0 %1082 }
 0x16b   :  { %v969_v31 = vsel %vm6239_vm7, %v3993_v1, %v4003_v32  ;;  %v970_v36 = vsel %vm6238_vm5, %v4003_v32, %v3993_v1  ;;  %v6240_v29 = vstv %s3362_s25  ;;  %v6243_v14 = vrot.slane %v6242_v11, %v2832_v41  ;;  %s2481_s25 = smov 94  }
 0x16c   :  { %v981_v15 = vmul.f32 %v6240_v29, %v976_v8  ;;  %v6241_v39 = vmov %v6240_v29  ;;  %v6246_v28 = vrot.slane %v6242_v11, %v2835_v46  ;;  %vm6249_vm7 = vcmp.lt.s32.totalorder %v2844_v61, 14 }
 0x16d   :  { %v982_v16 = vmul.f32 %v6241_v39, %v975_v63  ;;  %vm4379_vm15 = vcmp.eq.s32.totalorder %v6243_v14, 1  ;;  %v1012_v1 = vsel %vm6249_vm7, %v4154_v27, %v4174_v54  ;;  %vm6250_vm5 = vmmov %vm6249_vm7  ;;  %v888_v4 = vadd.f32 %v886_v24, %v851_v53  ;;  %1705 = vrot.lane.b32.xlu0 %v2555_v59, %s2479_s24  ;;  %1707 = vrot.lane.b32.xlu1 %v2577_v3, %s2479_s24 }
 0x16e   :  { %vm4386_vm11 = vcmp.eq.s32.totalorder %v6246_v28, 1  ;;  %v1013_v32 = vsel %vm6250_vm5, %v4174_v54, %v4154_v27  ;;  %v889_v19 = vadd.f32 %v887_v25, %v852_v43  ;;  %v923_v18 = vsel %vm4242_vm14, %v909_v2, 0.0  ;;  %vm6253_vm7 = vmmov %vm6250_vm5  ;;  %v1113_v43 = vpop.permute.xlu0 %1112 }
 0x16f   :  { %v924_v51 = vsel %vm4249_vm4, %v910_v7, 0.0  ;;  %vm1116_vm1 = vcmp.lt.s32.totalorder %v2844_v61, 2  ;;  %v6251_v20 = vstv %s3347_s2  ;;  %v1006_v27 = vsel %vm6253_vm7, %v4095_v13, %v4101_v26  ;;  %vm6254_vm14 = vmmov %vm6250_vm5  ;;  %s4649_s2 = sld [smem:[#allocation2 + $0x4b]] }
 0x170   :  { %v978_v48 = vmul.f32 %v6251_v20, %v970_v36  ;;  %v6252_v49 = vmov %v6251_v20  ;;  %v1007_v54 = vsel %vm6254_vm14, %v4101_v26, %v4095_v13  ;;  %v960_v33 = vsel %vm4277_vm12, %v946_v23, 0.0  ;;  %v1115_v23 = vpop.permute.xlu1 %1114 }
 0x171   :  { %v979_v9 = vmul.f32 %v6252_v49, %v969_v31  ;;  %v961_v62 = vsel %vm4284_vm0, %v947_v30, 0.0  ;;  %v6255_v2 = vstv %s3399_s28  ;;  %v925_v8 = vadd.f32 %v923_v18, %v888_v4  ;;  %1712 = vrot.lane.b32.xlu0 %v2544_v52, %s2479_s24  ;;  %1714 = vrot.lane.b32.xlu1 %v2565_v0, %s2479_s24  ;;  %s4694_s28 = sld [smem:[#allocation2 + $0x4c]] }
 0x172   :  { %v1018_v7 = vmul.f32 %v6255_v2, %v1013_v32  ;;  %v6256_v60 = vmov %v6255_v2  ;;  %v926_v53 = vadd.f32 %v924_v51, %v889_v19  ;;  %v983_v13 = vadd.f32 %v981_v15, %v978_v48  ;;  %v6260_v15 = vld [vmem:[#allocation24_spill] sm:$0xff]  ;;  %v6267_v32 = vld [vmem:[#allocation23_spill] sm:$0xff]  ;;  %s4997_s24 = sld [smem:[#allocation2 + $0x23]] }
 0x173   :  { %v1019_v63 = vmul.f32 %v6256_v60, %v1012_v1  ;;  %v984_v26 = vadd.f32 %v982_v16, %v979_v9  ;;  %v6257_v24 = vstv %s3378_s27  ;;  %v1209_v50 = vrot.slane %v4080_v44, %v2835_v46  ;;  %v6283_v60 = vld [vmem:[#allocation29_spill] sm:$0xff]  ;;  %s4685_s27 = sld [smem:[#allocation2 + $0x1b]] }
 0x174   :  { %v1015_v25 = vmul.f32 %v6257_v24, %v1007_v54  ;;  %v6258_v31 = vmov %v6257_v24  ;;  %vm6259_vm4 = vcmask 1041409   ;;  %v962_v36 = vadd.f32 %v960_v33, %v925_v8 }
 0x175   :  { %v1016_v47 = vmul.f32 %v6258_v31, %v1006_v27  ;;  %v4437_v30 = vsel %vm6259_vm4, %v4072_v6, %v4007_v34  ;;  %v963_v29 = vadd.f32 %v961_v62, %v926_v53  ;;  %v6261_v39 = vrot.slane %v6260_v15, %v2832_v41  ;;  %v1122_v62 = vpop.permute.xlu1 %1121  ;;  %1742 = vrot.lane.b32.xlu0 %v2555_v59, %s2480_s20 }
 0x176   :  { %v6264_v11 = vrot.slane %v6260_v15, %v2835_v46  ;;  %v1049_v34 = vsel %vm1042_vm10, %v4296_v10, %v4302_v58  ;;  %v1050_v6 = vsel %vm1042_vm10, %v4302_v58, %v4296_v10  ;;  %v1020_v28 = vadd.f32 %v1018_v7, %v1015_v25  ;;  %1744 = vrot.lane.b32.xlu1 %v2577_v3, %s2480_s20 }
 0x177   :  { %vm4442_vm0 = vcmp.eq.s32.totalorder %v6261_v39, 1  ;;  %v1021_v1 = vadd.f32 %v1019_v63, %v1016_v47  ;;  %v6268_v4 = vrot.slane %v6267_v32, %v2832_v41  ;;  %v6271_v18 = vrot.slane %v6267_v32, %v2835_v46 }
 0x178   :  { %vm4449_vm5 = vcmp.eq.s32.totalorder %v6264_v11, 1  ;;  %vm6274_vm4 = vcmp.lt.s32.totalorder %v2844_v61, 3  ;;  %v997_v20 = vsel %vm4335_vm2, %v983_v13, 0.0  ;;  %v998_v48 = vsel %vm4342_vm9, %v984_v26, 0.0 }
 0x179   :  { %vm4466_vm7 = vcmp.eq.s32.totalorder %v6268_v4, 1  ;;  %vm4473_vm14 = vcmp.eq.s32.totalorder %v6271_v18, 1  ;;  %v1086_v10 = vsel %vm6274_vm4, %v1083_v56, %v1085_v37  ;;  %vm6275_vm12 = vmmov %vm6274_vm4  ;;  %v1043_v49 = vsel %vm1042_vm10, %v4223_v22, %v4237_v55  ;;  %1749 = vrot.lane.b32.xlu0 %v2544_v52, %s2480_s20 }
 0x17a   :  { %v1087_v58 = vsel %vm6275_vm12, %v1085_v37, %v1083_v56  ;;  %v1044_v9 = vsel %vm1042_vm10, %v4237_v55, %v4223_v22  ;;  %v1120_v56 = vpop.permute.xlu0 %1119  ;;  %v6276_v37 = vstv %s3536_s30  ;;  %vm6279_vm2 = vmmov %vm6274_vm4  ;;  %v6281_v22 = vstv %s3636_s7  ;;  %1751 = vrot.lane.b32.xlu1 %v2565_v0, %s2480_s20  ;;  %s4725_s30 = sld [smem:[#allocation2 + $0x1c]]  ;;  %s2483_s7 = smov 83  }
 0x17b   :  { %v1055_v27 = vmul.f32 %v6276_v37, %v1050_v6  ;;  %v6278_v54 = vmov %v6276_v37  ;;  %v1080_v12 = vsel %vm6279_vm2, %v4326_v17, %v4355_v40  ;;  %vm6280_vm9 = vmmov %vm6279_vm2  ;;  %v1092_v55 = vmul.f32 %v6281_v22, %v1087_v58  ;;  %v1152_v37 = vpop.permute.xlu1 %1151  ;;  %s5033_s20 = sld [smem:[#allocation2 + $0x55]] }
 0x17c   :  { %v1056_v35 = vmul.f32 %v6278_v54, %v1049_v34  ;;  %v1081_v33 = vsel %vm6280_vm9, %v4355_v40, %v4326_v17  ;;  %v6282_v2 = vmov %v6281_v22  ;;  %v6284_v63 = vrot.slane %v6283_v60, %v2832_v41 }
 0x17d   :  { %v1093_v7 = vmul.f32 %v6282_v2, %v1086_v10  ;;  %v6287_v53 = vrot.slane %v6283_v60, %v2835_v46  ;;  %v1123_v17 = vsel %vm1116_vm1, %v1120_v56, %v1122_v62  ;;  %v1124_v40 = vsel %vm1116_vm1, %v1122_v62, %v1120_v56  ;;  %1779 = vrot.lane.b32.xlu0 %v2555_v59, %s2481_s25 }
 0x17e   :  { %vm4514_vm10 = vcmp.eq.s32.totalorder %v6284_v63, 1  ;;  %v1034_v26 = vsel %vm4379_vm15, %v1020_v28, 0.0  ;;  %v1035_v24 = vsel %vm4386_vm11, %v1021_v1, 0.0  ;;  %v6290_v25 = vstv %s6277_s13  ;;  %v1150_v28 = vpop.permute.xlu0 %1149  ;;  %v6294_v1 = vld [vmem:[#allocation27_spill] sm:$0xff]  ;;  %1781 = vrot.lane.b32.xlu1 %v2577_v3, %s2481_s25  ;;  %s2489_s13 = smov 77  }
 0x17f   :  { %vm4521_vm12 = vcmp.eq.s32.totalorder %v6287_v53, 1  ;;  %v1052_v31 = vmul.f32 %v6290_v25, %v1044_v9  ;;  %v6291_v47 = vmov %v6290_v25  ;;  %v6292_v39 = vstv %s3603_s6  ;;  %s4739_s6 = sld [smem:[#allocation2 + $0x4d]] }
 0x180   :  { %v1053_v15 = vmul.f32 %v6291_v47, %v1043_v49  ;;  %v1089_v11 = vmul.f32 %v6292_v39, %v1081_v33  ;;  %v6293_v34 = vmov %v6292_v39  ;;  %v1117_v57 = vsel %vm1116_vm1, %v1113_v43, %v1115_v23 }
 0x181   :  { %v1090_v6 = vmul.f32 %v6293_v34, %v1080_v12  ;;  %v1118_v5 = vsel %vm1116_vm1, %v1115_v23, %v1113_v43  ;;  %v6295_v32 = vrot.slane %v6294_v1, %v2832_v41  ;;  %v6298_v18 = vrot.slane %v6294_v1, %v2835_v46  ;;  %1786 = vrot.lane.b32.xlu0 %v2544_v52, %s2481_s25 }
 0x182   :  { %v1057_v58 = vadd.f32 %v1055_v27, %v1052_v31  ;;  %v1058_v49 = vadd.f32 %v1056_v35, %v1053_v15  ;;  %v6301_v9 = vstv %s3696_s9  ;;  %v999_v54 = vadd.f32 %v997_v20, %v962_v36  ;;  %1788 = vrot.lane.b32.xlu1 %v2565_v0, %s2481_s25  ;;  %s4777_s9 = sld [smem:[#allocation2 + $0x4e]] }
 0x183   :  { %vm4551_vm15 = vcmp.eq.s32.totalorder %v6295_v32, 1  ;;  %vm4558_vm11 = vcmp.eq.s32.totalorder %v6298_v18, 1  ;;  %v1129_v43 = vmul.f32 %v6301_v9, %v1124_v40  ;;  %v6302_v23 = vmov %v6301_v9  ;;  %v1159_v40 = vpop.permute.xlu1 %1158  ;;  %s5073_s25 = sld [smem:[#allocation2 + $0x26]] }
 0x184   :  { %v1130_v56 = vmul.f32 %v6302_v23, %v1123_v17  ;;  %v1000_v12 = vadd.f32 %v998_v48, %v963_v29  ;;  %v1094_v33 = vadd.f32 %v1092_v55, %v1089_v11  ;;  %v1095_v62 = vadd.f32 %v1093_v7, %v1090_v6  ;;  %v1157_v7 = vpop.permute.xlu0 %1156 }
 0x185   :  { %v6303_v22 = vstv %s3666_s8  ;;  %v6305_v27 = vrot.slane %v4080_v44, %v2832_v41  ;;  %vm6308_vm2 = vcmask 1041409   ;;  %v1036_v20 = vadd.f32 %v1034_v26, %v999_v54  ;;  %1816 = vrot.lane.b32.xlu0 %v2555_v59, %s2482_s3  ;;  %s4768_s8 = sld [smem:[#allocation2 + $0x1d]] }
 0x186   :  { %v1126_v2 = vmul.f32 %v6303_v22, %v1118_v5  ;;  %v6304_v60 = vmov %v6303_v22  ;;  %v4586_v29 = vsel %vm6308_vm2, %v4158_v21, %v4009_v38  ;;  %v1037_v48 = vadd.f32 %v1035_v24, %v1000_v12  ;;  %vm1245_vm2 = vmand %vm3609_vm8, %vm2808_vm6  ;;  %1818 = vrot.lane.b32.xlu1 %v2577_v3, %s2482_s3 }
 0x187   :  { %v1127_v63 = vmul.f32 %v6304_v60, %v1117_v57  ;;  %vm4579_vm1 = vcmp.eq.s32.totalorder %v6305_v27, 1  ;;  %vm6309_vm9 = vcmp.lt.s32.totalorder %v2844_v61, 1  ;;  %v1071_v53 = vsel %vm4442_vm0, %v1057_v58, 0.0 }
 0x188   :  { %v1154_v35 = vsel %vm6309_vm9, %v1150_v28, %v1152_v37  ;;  %vm6310_vm4 = vmmov %vm6309_vm9  ;;  %v1072_v38 = vsel %vm4449_vm5, %v1058_v49, 0.0  ;;  %v1131_v21 = vadd.f32 %v1129_v43, %v1126_v2  ;;  %v1108_v24 = vsel %vm4466_vm7, %v1094_v33, 0.0  ;;  %v1225_v5 = vpop.permute.xlu0 %1224 }
 0x189   :  { %v1155_v55 = vsel %vm6310_vm4, %v1152_v37, %v1150_v28  ;;  %v1132_v17 = vadd.f32 %v1130_v56, %v1127_v63  ;;  %v1109_v25 = vsel %vm4473_vm14, %v1095_v62, 0.0  ;;  %v1160_v16 = vsel %vm6310_vm4, %v1157_v7, %v1159_v40  ;;  %vm6312_vm0 = vmmov %vm6310_vm4  ;;  %1823 = vrot.lane.b32.xlu0 %v2544_v52, %s2482_s3 }
 0x18a   :  { %v1161_v14 = vsel %vm6312_vm0, %v1159_v40, %v1157_v7  ;;  %v6313_v31 = vstv %s3714_s11  ;;  %v6315_v11 = vstv %s3732_s1  ;;  %v1073_v51 = vadd.f32 %v1071_v53, %v1036_v20  ;;  %vm1319_vm4 = vmand %vm3609_vm8, %vm2876_vm13  ;;  %1825 = vrot.lane.b32.xlu1 %v2565_v0, %s2482_s3  ;;  %s2484_s11 = smov 82   ;;  %s4806_s1 = sld [smem:[#allocation2 + $0x1e]] }
 0x18b   :  { %v1163_v47 = vmul.f32 %v6313_v31, %v1155_v55  ;;  %v6314_v15 = vmov %v6313_v31  ;;  %v1166_v34 = vmul.f32 %v6315_v11, %v1161_v14  ;;  %v6316_v19 = vmov %v6315_v11  ;;  %s5133_s3 = sld [smem:[#allocation2 + $0x58]] }
 0x18c   :  { %v1164_v39 = vmul.f32 %v6314_v15, %v1154_v35  ;;  %v1167_v6 = vmul.f32 %v6316_v19, %v1160_v16  ;;  %v1074_v57 = vadd.f32 %v1072_v38, %v1037_v48  ;;  %vm4621_vm5 = vcmp.eq.s32.totalorder %v1209_v50, 1  ;;  %v1227_v50 = vpop.permute.xlu1 %1226  ;;  %v1232_v22 = vpop.permute.xlu0 %1231 }
 0x18d   :  { %v1246_v1 = vsel %vm1245_vm2, 1, %v5894_v45  ;;  %v1145_v32 = vsel %vm4514_vm10, %v1131_v21, 0.0  ;;  %v1146_v18 = vsel %vm4521_vm12, %v1132_v17, 0.0  ;;  %v1168_v44 = vadd.f32 %v1166_v34, %v1163_v47  ;;  %vm1282_vm12 = vmand %vm3609_vm8, %vm2856_vm3  ;;  %1853 = vrot.lane.b32.xlu0 %v2555_v59, %s2483_s7 }
 0x18e   :  { %v1169_v58 = vadd.f32 %v1167_v6, %v1164_v39  ;;  %v1110_v49 = vadd.f32 %v1108_v24, %v1073_v51  ;;  %v1111_v9 = vadd.f32 %v1109_v25, %v1074_v57  ;;  %vm6319_vm7 = vcmp.lt.s32.totalorder %v2844_v61, 127  ;;  %v4697_v57 = vld [vmem:[#allocation6] sm:$0x3]  ;;  %1855 = vrot.lane.b32.xlu1 %v2577_v3, %s2483_s7 }
 0x18f   :  { %v1229_v43 = vsel %vm6319_vm7, %v1225_v5, %v1227_v50  ;;  %vm6320_vm14 = vmmov %vm6319_vm7  ;;  %v1182_v8 = vsel %vm4551_vm15, %v1168_v44, 0.0  ;;  %v1237_v56 = vstv %s4567_s29  ;;  %v1240_v37 = vstv %s4574_s12  ;;  %s5011_s29 = sld [smem:[#allocation2 + $0x54]] }
 0x190   :  { %v1230_v23 = vsel %vm6320_vm14, %v1227_v50, %v1225_v5  ;;  %v1183_v13 = vsel %vm4558_vm11, %v1169_v58, 0.0  ;;  %v1147_v54 = vadd.f32 %v1145_v32, %v1110_v49  ;;  %v1148_v12 = vadd.f32 %v1146_v18, %v1111_v9  ;;  %v1234_v2 = vpop.permute.xlu1 %1233  ;;  %vm6322_vm15 = vmmov %vm6319_vm7  ;;  %v1262_v53 = vpop.permute.xlu0 %1261  ;;  %s5029_s12 = sld [smem:[#allocation2 + $0x24]] }
 0x191   :  { %v1250_v33 = vrot.slane %v1246_v1, %v2832_v41  ;;  %v1254_v62 = vrot.slane %v1246_v1, %v2835_v46  ;;  %v1220_v4 = vsel %vm4579_vm1, %v4437_v30, 0.0  ;;  %v1221_v10 = vsel %vm4621_vm5, %v4586_v29, 0.0  ;;  %vm6323_vm11 = vmmov %vm6319_vm7  ;;  %1860 = vrot.lane.b32.xlu0 %v2544_v52, %s2483_s7 }
 0x192   :  { %vm1265_vm10 = vcmp.lt.s32.totalorder %v2844_v61, 126  ;;  %v1184_v63 = vadd.f32 %v1182_v8, %v1147_v54  ;;  %v1185_v27 = vadd.f32 %v1183_v13, %v1148_v12  ;;  %v1235_v20 = vsel %vm6322_vm15, %v1232_v22, %v1234_v2  ;;  %1862 = vrot.lane.b32.xlu1 %v2565_v0, %s2483_s7  ;;  %s5144_s7 = sld [smem:[#allocation2 + $0x29]] }
 0x193   :  { %v1236_v30 = vsel %vm6323_vm11, %v1234_v2, %v1232_v22  ;;  %v1238_v36 = vmul.f32 %v1237_v56, %v1229_v43  ;;  %v1239_v29 = vmul.f32 %v1237_v56, %v1230_v23  ;;  %v1241_v48 = vmul.f32 %v1240_v37, %v1235_v20 }
 0x194   :  { %v1242_v35 = vmul.f32 %v1240_v37, %v1236_v30  ;;  %vm4670_vm1 = vcmp.eq.s32.totalorder %v1250_v33, 1  ;;  %vm4674_vm9 = vcmp.eq.s32.totalorder %v1254_v62, 1  ;;  %v1283_v38 = vsel %vm1282_vm12, 1, %v5894_v45  ;;  %v1264_v40 = vpop.permute.xlu1 %1263  ;;  %v1269_v51 = vpop.permute.xlu0 %1268 }
 0x195   :  { %v1243_v21 = vadd.f32 %v1241_v48, %v1238_v36  ;;  %v1274_v24 = vstv %s4635_s26  ;;  %v1222_v25 = vadd.f32 %v1220_v4, %v1184_v63  ;;  %v1223_v16 = vadd.f32 %v1221_v10, %v1185_v27  ;;  %v6335_v48 = vld [vmem:[#allocation32_spill] sm:$0xff]  ;;  %1890 = vrot.lane.b32.xlu0 %v2555_v59, %s2484_s11  ;;  %s5051_s26 = sld [smem:[#allocation2 + $0x25]] }
 0x196   :  { %v1244_v17 = vadd.f32 %v1242_v35, %v1239_v29  ;;  %v1266_v14 = vsel %vm1265_vm10, %v1262_v53, %v1264_v40  ;;  %v1267_v31 = vsel %vm1265_vm10, %v1264_v40, %v1262_v53  ;;  %v1277_v39 = vstv %s4649_s2  ;;  %1892 = vrot.lane.b32.xlu1 %v2577_v3, %s2484_s11  ;;  %s5055_s2 = sld [smem:[#allocation2 + $0x56]] }
 0x197   :  { %v1257_v47 = vsel %vm4670_vm1, %v1243_v21, 0.0  ;;  %v1287_v11 = vrot.slane %v1283_v38, %v2832_v41  ;;  %v1291_v6 = vrot.slane %v1283_v38, %v2835_v46  ;;  %v157_v5 = vadd.s32 1, %v4697_v57 }
 0x198   :  { %v1258_v15 = vsel %vm4674_vm9, %v1244_v17, 0.0  ;;  %v1259_v34 = vadd.f32 %v1257_v47, %v1222_v25  ;;  %v1271_v28 = vpop.permute.xlu1 %1270  ;;  %vm1302_vm2 = vcmp.lt.s32.totalorder %v2844_v61, 125  ;;  %v1275_v44 = vmul.f32 %v1274_v24, %v1266_v14  ;;  %v1299_v23 = vpop.permute.xlu0 %1298 }
 0x199   :  { %v1260_v19 = vadd.f32 %v1258_v15, %v1223_v16  ;;  %v1272_v1 = vsel %vm1265_vm10, %v1269_v51, %v1271_v28  ;;  %v1273_v32 = vsel %vm1265_vm10, %v1271_v28, %v1269_v51  ;;  %v1276_v58 = vmul.f32 %v1274_v24, %v1267_v31  ;;  %1897 = vrot.lane.b32.xlu0 %v2544_v52, %s2484_s11 }
 0x19a   :  { %v1278_v50 = vmul.f32 %v1277_v39, %v1272_v1  ;;  %v1279_v49 = vmul.f32 %v1277_v39, %v1273_v32  ;;  %vm4711_vm0 = vcmp.eq.s32.totalorder %v1287_v11, 1  ;;  %vm4715_vm5 = vcmp.eq.s32.totalorder %v1291_v6, 1  ;;  %1899 = vrot.lane.b32.xlu1 %v2565_v0, %s2484_s11  ;;  %s5162_s11 = sld [smem:[#allocation2 + $0x5b]] }
 0x19b   :  { %vm158_vm7 = vcmp.ge.s32.totalorder %v157_v5, 0  ;;  %vm159_vm14 = vcmp.lt.s32.totalorder %v157_v5, 16  ;;  %v1320_v56 = vsel %vm1319_vm4, 1, %v5894_v45  ;;  %v1311_v62 = vstv %s4685_s27  ;;  %s5077_s27 = sld [smem:[#allocation2 + $0x57]] }
 0x19c   :  { %v1280_v42 = vadd.f32 %v1278_v50, %v1275_v44  ;;  %v1281_v8 = vadd.f32 %v1279_v49, %v1276_v58  ;;  %v1301_v13 = vpop.permute.xlu1 %1300  ;;  %v1314_v22 = vstv %s4694_s28  ;;  %vm4735_vm8 = vmand %vm158_vm7, %vm159_vm14  ;;  %v1324_v63 = vrot.slane %v1320_v56, %v2832_v41  ;;  %v1306_v20 = vpop.permute.xlu0 %1305  ;;  %v6341_v44 = vld [vmem:[#allocation30_spill] sm:$0xff]  ;;  %s5131_s28 = sld [smem:[#allocation2 + $0x27]] }
 0x19d   :  { %v1303_v37 = vsel %vm1302_vm2, %v1299_v23, %v1301_v13  ;;  %v1304_v54 = vsel %vm1302_vm2, %v1301_v13, %v1299_v23  ;;  %v1328_v27 = vrot.slane %v1320_v56, %v2835_v46  ;;  %vm1339_vm10 = vcmp.lt.s32.totalorder %v2844_v61, 115  ;;  %1927 = vrot.lane.b32.xlu0 %v2555_v59, %s2485_s5 }
 0x19e   :  { %v1294_v12 = vsel %vm4711_vm0, %v1280_v42, 0.0  ;;  %v1295_v33 = vsel %vm4715_vm5, %v1281_v8, 0.0  ;;  %vm6336_vm12 = vnez %v6335_v48  ;;  %v1312_v35 = vmul.f32 %v1311_v62, %v1303_v37  ;;  %1929 = vrot.lane.b32.xlu1 %v2577_v3, %s2485_s5 }
 0x19f   :  { %v1296_v4 = vadd.f32 %v1294_v12, %v1259_v34  ;;  %v1297_v10 = vadd.f32 %v1295_v33, %v1260_v19  ;;  %vm1356_vm15 = vmand %vm4735_vm8, %vm6336_vm12  ;;  %v1313_v55 = vmul.f32 %v1311_v62, %v1304_v54  ;;  %vm4754_vm11 = vcmp.eq.s32.totalorder %v1324_v63, 1 }
 0x1a0   :  { %v1308_v30 = vpop.permute.xlu1 %1307  ;;  %vm4758_vm1 = vcmp.eq.s32.totalorder %v1328_v27, 1  ;;  %v1336_v17 = vpop.permute.xlu0 %1335  ;;  %v1357_v16 = vsel %vm1356_vm15, 1, %v5894_v45  ;;  %v1348_v39 = vstv %s4725_s30  ;;  %v1351_v11 = vstv %s4739_s6  ;;  %s5138_s30 = sld [smem:[#allocation2 + $0x28]] }
 0x1a1   :  { %v1309_v36 = vsel %vm1302_vm2, %v1306_v20, %v1308_v30  ;;  %v1310_v29 = vsel %vm1302_vm2, %v1308_v30, %v1306_v20  ;;  %v1361_v6 = vrot.slane %v1357_v16, %v2832_v41  ;;  %v1365_v51 = vrot.slane %v1357_v16, %v2835_v46  ;;  %1934 = vrot.lane.b32.xlu0 %v2544_v52, %s2485_s5  ;;  %s5142_s6 = sld [smem:[#allocation2 + $0x59]] }
 0x1a2   :  { %v1315_v7 = vmul.f32 %v1314_v22, %v1309_v36  ;;  %v1316_v53 = vmul.f32 %v1314_v22, %v1310_v29  ;;  %vm1376_vm9 = vcmp.lt.s32.totalorder %v2844_v61, 114  ;;  %vm6342_vm2 = vnez %v6341_v44  ;;  %1936 = vrot.lane.b32.xlu1 %v2565_v0, %s2485_s5  ;;  %s5181_s5 = sld [smem:[#allocation2 + $0x2c]] }
 0x1a3   :  { %vm1393_vm4 = vmand %vm4735_vm8, %vm6342_vm2  ;;  %vm4792_vm0 = vcmp.eq.s32.totalorder %v1361_v6, 1  ;;  %vm4796_vm5 = vcmp.eq.s32.totalorder %v1365_v51, 1  ;;  %v1385_v22 = vstv %s4768_s8  ;;  %vm1413_vm7 = vcmp.lt.s32.totalorder %v2844_v61, 113  ;;  %s5146_s8 = sld [smem:[#allocation2 + $0x5a]] }
 0x1a4   :  { %v1317_v40 = vadd.f32 %v1315_v7, %v1312_v35  ;;  %v1318_v24 = vadd.f32 %v1316_v53, %v1313_v55  ;;  %v1338_v25 = vpop.permute.xlu1 %1337  ;;  %v1343_v5 = vpop.permute.xlu0 %1342  ;;  %v1394_v37 = vsel %vm1393_vm4, 1, %v5894_v45  ;;  %v6347_v55 = vld [vmem:[#allocation35_spill] sm:$0xff] }
 0x1a5   :  { %v1340_v14 = vsel %vm1339_vm10, %v1336_v17, %v1338_v25  ;;  %v1341_v31 = vsel %vm1339_vm10, %v1338_v25, %v1336_v17  ;;  %v1398_v27 = vrot.slane %v1394_v37, %v2832_v41  ;;  %v1402_v20 = vrot.slane %v1394_v37, %v2835_v46  ;;  %1964 = vrot.lane.b32.xlu0 %v2555_v59, %s2486_s15 }
 0x1a6   :  { %v1331_v47 = vsel %vm4754_vm11, %v1317_v40, 0.0  ;;  %v1332_v15 = vsel %vm4758_vm1, %v1318_v24, 0.0  ;;  %v1349_v58 = vmul.f32 %v1348_v39, %v1340_v14  ;;  %v1350_v50 = vmul.f32 %v1348_v39, %v1341_v31  ;;  %1966 = vrot.lane.b32.xlu1 %v2577_v3, %s2486_s15 }
 0x1a7   :  { %v1333_v34 = vadd.f32 %v1331_v47, %v1296_v4  ;;  %v1334_v19 = vadd.f32 %v1332_v15, %v1297_v10  ;;  %v1388_v4 = vstv %s4777_s9  ;;  %vm6348_vm14 = vnez %v6347_v55  ;;  %s5154_s9 = sld [smem:[#allocation2 + $0x2a]] }
 0x1a8   :  { %v1345_v28 = vpop.permute.xlu1 %1344  ;;  %v1373_v42 = vpop.permute.xlu0 %1372  ;;  %vm4830_vm15 = vcmp.eq.s32.totalorder %v1398_v27, 1  ;;  %vm4834_vm11 = vcmp.eq.s32.totalorder %v1402_v20, 1  ;;  %vm1450_vm1 = vcmp.lt.s32.totalorder %v2844_v61, 112  ;;  %v1462_v27 = vstv %s4853_s10  ;;  %s5200_s10 = sld [smem:[#allocation2 + $0x2d]] }
 0x1a9   :  { %v1346_v1 = vsel %vm1339_vm10, %v1343_v5, %v1345_v28  ;;  %v1347_v32 = vsel %vm1339_vm10, %v1345_v28, %v1343_v5  ;;  %vm1430_vm10 = vmand %vm4735_vm8, %vm6348_vm14  ;;  %1971 = vrot.lane.b32.xlu0 %v2544_v52, %s2486_s15 }
 0x1aa   :  { %v1352_v49 = vmul.f32 %v1351_v11, %v1346_v1  ;;  %v1353_v9 = vmul.f32 %v1351_v11, %v1347_v32  ;;  %v1431_v31 = vsel %vm1430_vm10, 1, %v5894_v45  ;;  %1973 = vrot.lane.b32.xlu1 %v2565_v0, %s2486_s15  ;;  %vm1504_vm10 = vmand %vm4735_vm8, %vm2808_vm6  ;;  %s5212_s15 = sld [smem:[#allocation2 + $0x5e]] }
 0x1ab   :  { %v1435_v5 = vrot.slane %v1431_v31, %v2832_v41  ;;  %v1439_v28 = vrot.slane %v1431_v31, %v2835_v46 }
 0x1ac   :  { %v1354_v8 = vadd.f32 %v1352_v49, %v1349_v58  ;;  %v1355_v13 = vadd.f32 %v1353_v9, %v1350_v50  ;;  %v1375_v56 = vpop.permute.xlu1 %1374  ;;  %v1380_v30 = vpop.permute.xlu0 %1379  ;;  %v6353_v49 = vld [vmem:[#allocation38_spill] sm:$0xff] }
 0x1ad   :  { %v1377_v54 = vsel %vm1376_vm9, %v1373_v42, %v1375_v56  ;;  %v1378_v12 = vsel %vm1376_vm9, %v1375_v56, %v1373_v42  ;;  %2001 = vrot.lane.b32.xlu0 %v2555_v59, %s2487_s19 }
 0x1ae   :  { %v1368_v33 = vsel %vm4792_vm0, %v1354_v8, 0.0  ;;  %v1369_v62 = vsel %vm4796_vm5, %v1355_v13, 0.0  ;;  %v1386_v7 = vmul.f32 %v1385_v22, %v1377_v54  ;;  %v1387_v53 = vmul.f32 %v1385_v22, %v1378_v12  ;;  %2003 = vrot.lane.b32.xlu1 %v2577_v3, %s2487_s19 }
 0x1af   :  { %v1370_v10 = vadd.f32 %v1368_v33, %v1333_v34  ;;  %v1371_v63 = vadd.f32 %v1369_v62, %v1334_v19  ;;  %v1422_v34 = vstv %s4806_s1  ;;  %v1425_v19 = vstv %s4815_s16  ;;  %s5168_s1 = sld [smem:[#allocation2 + $0x2b]] }
 0x1b0   :  { %v1382_v36 = vpop.permute.xlu1 %1381  ;;  %v1410_v24 = vpop.permute.xlu0 %1409  ;;  %vm4868_vm0 = vcmp.eq.s32.totalorder %v1435_v5, 1  ;;  %vm4872_vm5 = vcmp.eq.s32.totalorder %v1439_v28, 1  ;;  %v1499_v5 = vstv %s4891_s18  ;;  %s5176_s16 = sld [smem:[#allocation2 + $0x5c]] }
 0x1b1   :  { %v1383_v29 = vsel %vm1376_vm9, %v1380_v30, %v1382_v36  ;;  %v1384_v35 = vsel %vm1376_vm9, %v1382_v36, %v1380_v30  ;;  %vm6354_vm9 = vnez %v6353_v49  ;;  %2008 = vrot.lane.b32.xlu0 %v2544_v52, %s2487_s19  ;;  %s5266_s18 = sld [smem:[#allocation2 + $0x5f]] }
 0x1b2   :  { %v1389_v38 = vmul.f32 %v1388_v4, %v1383_v29  ;;  %v1390_v21 = vmul.f32 %v1388_v4, %v1384_v35  ;;  %vm1467_vm4 = vmand %vm4735_vm8, %vm6354_vm9  ;;  %2010 = vrot.lane.b32.xlu1 %v2565_v0, %s2487_s19  ;;  %s5357_s19 = sld [smem:[#allocation2 + $0x2f]] }
 0x1b3   :  { %v1468_v33 = vsel %vm1467_vm4, 1, %v5894_v45  ;;  %vm1524_vm4 = vcmp.lt.s32.totalorder %v2844_v61, 110 }
 0x1b4   :  { %v1391_v25 = vadd.f32 %v1389_v38, %v1386_v7  ;;  %v1392_v16 = vadd.f32 %v1390_v21, %v1387_v53  ;;  %v1412_v14 = vpop.permute.xlu1 %1411  ;;  %v1417_v1 = vpop.permute.xlu0 %1416  ;;  %v1472_v36 = vrot.slane %v1468_v33, %v2832_v41  ;;  %v1476_v29 = vrot.slane %v1468_v33, %v2835_v46 }
 0x1b5   :  { %v1414_v47 = vsel %vm1413_vm7, %v1410_v24, %v1412_v14  ;;  %v1415_v15 = vsel %vm1413_vm7, %v1412_v14, %v1410_v24  ;;  %2038 = vrot.lane.b32.xlu0 %v2555_v59, %s2488_s4 }
 0x1b6   :  { %v1405_v39 = vsel %vm4830_vm15, %v1391_v25, 0.0  ;;  %v1406_v11 = vsel %vm4834_vm11, %v1392_v16, 0.0  ;;  %v1423_v9 = vmul.f32 %v1422_v34, %v1414_v47  ;;  %v1424_v43 = vmul.f32 %v1422_v34, %v1415_v15  ;;  %2040 = vrot.lane.b32.xlu1 %v2577_v3, %s2488_s4 }
 0x1b7   :  { %v1407_v6 = vadd.f32 %v1405_v39, %v1370_v10  ;;  %v1408_v51 = vadd.f32 %v1406_v11, %v1371_v63  ;;  %v1459_v63 = vstv %s4844_s14  ;;  %vm4906_vm15 = vcmp.eq.s32.totalorder %v1472_v36, 1  ;;  %s5188_s14 = sld [smem:[#allocation2 + $0x5d]] }
 0x1b8   :  { %v1419_v32 = vpop.permute.xlu1 %1418  ;;  %v1447_v56 = vpop.permute.xlu0 %1446  ;;  %vm4910_vm11 = vcmp.eq.s32.totalorder %v1476_v29, 1  ;;  %v1505_v39 = vsel %vm1504_vm10, 1, %v5894_v45  ;;  %v1536_v36 = vstv %s4929_s22  ;;  %vm1578_vm10 = vmand %vm4735_vm8, %vm2876_vm13  ;;  %s5617_s22 = sld [smem:[#allocation2 + $0x30]] }
 0x1b9   :  { %v1420_v58 = vsel %vm1413_vm7, %v1417_v1, %v1419_v32  ;;  %v1421_v50 = vsel %vm1413_vm7, %v1419_v32, %v1417_v1  ;;  %vm1487_vm7 = vcmp.lt.s32.totalorder %v2844_v61, 111  ;;  %v1509_v32 = vrot.slane %v1505_v39, %v2832_v41  ;;  %2045 = vrot.lane.b32.xlu0 %v2544_v52, %s2488_s4 }
 0x1ba   :  { %v1426_v23 = vmul.f32 %v1425_v19, %v1420_v58  ;;  %v1427_v42 = vmul.f32 %v1425_v19, %v1421_v50  ;;  %v1513_v58 = vrot.slane %v1505_v39, %v2835_v46  ;;  %2047 = vrot.lane.b32.xlu1 %v2565_v0, %s2488_s4  ;;  %s5631_s4 = sld [smem:[#allocation2 + $0x61]] }
 0x1bc   :  { %v1428_v37 = vadd.f32 %v1426_v23, %v1423_v9  ;;  %v1429_v54 = vadd.f32 %v1427_v42, %v1424_v43  ;;  %v1449_v12 = vpop.permute.xlu1 %1448  ;;  %v1454_v35 = vpop.permute.xlu0 %1453 }
 0x1bd   :  { %v1451_v62 = vsel %vm1450_vm1, %v1447_v56, %v1449_v12  ;;  %v1452_v22 = vsel %vm1450_vm1, %v1449_v12, %v1447_v56  ;;  %2075 = vrot.lane.b32.xlu0 %v2555_v59, %s2489_s13 }
 0x1be   :  { %v1442_v4 = vsel %vm4868_vm0, %v1428_v37, 0.0  ;;  %v1443_v10 = vsel %vm4872_vm5, %v1429_v54, 0.0  ;;  %v1460_v21 = vmul.f32 %v1459_v63, %v1451_v62  ;;  %v1461_v17 = vmul.f32 %v1459_v63, %v1452_v22  ;;  %2077 = vrot.lane.b32.xlu1 %v2577_v3, %s2489_s13 }
 0x1bf   :  { %v1444_v20 = vadd.f32 %v1442_v4, %v1407_v6  ;;  %v1445_v30 = vadd.f32 %v1443_v10, %v1408_v51  ;;  %v1496_v51 = vstv %s4882_s17  ;;  %vm4944_vm0 = vcmp.eq.s32.totalorder %v1509_v32, 1  ;;  %s5227_s17 = sld [smem:[#allocation2 + $0x2e]] }
 0x1c0   :  { %v1456_v7 = vpop.permute.xlu1 %1455  ;;  %v1484_v14 = vpop.permute.xlu0 %1483  ;;  %vm4948_vm5 = vcmp.eq.s32.totalorder %v1513_v58, 1  ;;  %v1533_v10 = vstv %s4920_s21  ;;  %s5488_s21 = sld [smem:[#allocation2 + $0x60]] }
 0x1c1   :  { %v1457_v53 = vsel %vm1450_vm1, %v1454_v35, %v1456_v7  ;;  %v1458_v38 = vsel %vm1450_vm1, %v1456_v7, %v1454_v35  ;;  %vm1541_vm1 = vmand %vm4735_vm8, %vm2856_vm3  ;;  %2082 = vrot.lane.b32.xlu0 %v2544_v52, %s2489_s13 }
 0x1c2   :  { %v1463_v40 = vmul.f32 %v1462_v27, %v1457_v53  ;;  %v1464_v24 = vmul.f32 %v1462_v27, %v1458_v38  ;;  %v1542_v33 = vsel %vm1541_vm1, 1, %v5894_v45  ;;  %2084 = vrot.lane.b32.xlu1 %v2565_v0, %s2489_s13 }
 0x1c3   :  { %v1546_v29 = vrot.slane %v1542_v33, %v2832_v41  ;;  %v1550_v53 = vrot.slane %v1542_v33, %v2835_v46 }
 0x1c4   :  { %v1465_v31 = vadd.f32 %v1463_v40, %v1460_v21  ;;  %v1466_v47 = vadd.f32 %v1464_v24, %v1461_v17  ;;  %v1486_v15 = vpop.permute.xlu1 %1485  ;;  %v1491_v50 = vpop.permute.xlu0 %1490  ;;  %v165_v21 = vadd.s32 2, %v4697_v57 }
 0x1c5   :  { %v1488_v11 = vsel %vm1487_vm7, %v1484_v14, %v1486_v15  ;;  %v1489_v34 = vsel %vm1487_vm7, %v1486_v15, %v1484_v14 }
 0x1c6   :  { %v1479_v19 = vsel %vm4906_vm15, %v1465_v31, 0.0  ;;  %v1480_v6 = vsel %vm4910_vm11, %v1466_v47, 0.0  ;;  %v1497_v42 = vmul.f32 %v1496_v51, %v1488_v11  ;;  %v1498_v8 = vmul.f32 %v1496_v51, %v1489_v34 }
 0x1c7   :  { %v1481_v28 = vadd.f32 %v1479_v19, %v1444_v20  ;;  %v1482_v1 = vadd.f32 %v1480_v6, %v1445_v30  ;;  %vm4983_vm15 = vcmp.eq.s32.totalorder %v1546_v29, 1  ;;  %vm4987_vm11 = vcmp.eq.s32.totalorder %v1550_v53, 1 }
 0x1c8   :  { %v1493_v9 = vpop.permute.xlu1 %1492  ;;  %v1521_v12 = vpop.permute.xlu0 %1520  ;;  %vm166_vm1 = vcmp.ge.s32.totalorder %v165_v21, 0  ;;  %v1579_v34 = vsel %vm1578_vm10, 1, %v5894_v45 }
 0x1c9   :  { %v1494_v43 = vsel %vm1487_vm7, %v1491_v50, %v1493_v9  ;;  %v1495_v23 = vsel %vm1487_vm7, %v1493_v9, %v1491_v50  ;;  %vm1561_vm7 = vcmp.lt.s32.totalorder %v2844_v61, 109  ;;  %v1583_v58 = vrot.slane %v1579_v34, %v2832_v41 }
 0x1ca   :  { %v1500_v13 = vmul.f32 %v1499_v5, %v1494_v43  ;;  %v1501_v56 = vmul.f32 %v1499_v5, %v1495_v23  ;;  %v1570_v5 = vstv %s4959_s23  ;;  %v1587_v50 = vrot.slane %v1579_v34, %v2835_v46  ;;  %s2491_s23 = smov [#allocation9]  }
 0x1cb   :  { %vm1588_vm10 = vcmp.eq.s32.totalorder %v1583_v58, 1  ;;  %v1644_v34 = vstv %s5029_s12 }
 0x1cc   :  { %v1502_v62 = vadd.f32 %v1500_v13, %v1497_v42  ;;  %v1503_v22 = vadd.f32 %v1501_v56, %v1498_v8  ;;  %v1523_v4 = vpop.permute.xlu1 %1522  ;;  %v1528_v38 = vpop.permute.xlu0 %1527 }
 0x1cd   :  { %v1525_v63 = vsel %vm1524_vm4, %v1521_v12, %v1523_v4  ;;  %v1526_v27 = vsel %vm1524_vm4, %v1523_v4, %v1521_v12 }
 0x1ce   :  { %v1516_v20 = vsel %vm4944_vm0, %v1502_v62, 0.0  ;;  %v1517_v30 = vsel %vm4948_vm5, %v1503_v22, 0.0  ;;  %v1534_v25 = vmul.f32 %v1533_v10, %v1525_v63  ;;  %v1535_v16 = vmul.f32 %v1533_v10, %v1526_v27 }
 0x1cf   :  { %v1518_v35 = vadd.f32 %v1516_v20, %v1481_v28  ;;  %v1519_v7 = vadd.f32 %v1517_v30, %v1482_v1  ;;  %v1573_v28 = vstv %s4968_s0  ;;  %vm1598_vm0 = vcmp.lt.s32.totalorder %v2844_v61, 99  ;;  %s2178_s0 = sshll.u32 %s2491_s23, 4  ;;  %s2179_s0 = int_to_ptr.vmem [resolvable:$true] %s2178_s0 }
 0x1d0   :  { %v1530_v17 = vpop.permute.xlu1 %1529  ;;  %v1558_v15 = vpop.permute.xlu0 %1557  ;;  %v1607_v27 = vstv %s4997_s24  ;;  %v1610_v20 = vstv %s5011_s29  ;;  %v1755_v1 = vstv %s5131_s28  ;;  %s2408_s13 = scalar_lea.vmem %s2179_s0, 256  ;;  %p2413_p11 = scmp.lt.s32.totalorder %s2179_s0, %s2179_s0 }
 0x1d1   :  { %v1531_v40 = vsel %vm1524_vm4, %v1528_v38, %v1530_v17  ;;  %v1532_v24 = vsel %vm1524_vm4, %v1530_v17, %v1528_v38  ;;  %vm167_vm4 = vcmp.lt.s32.totalorder %v165_v21, 16  ;;  %p2409_p10 = scmp.ne.s32.totalorder %s2179_s0, %s2408_s13  ;;  %p2414_p12 = scmp.lt.s32.totalorder %s2408_s13, %s2408_s13 }
 0x1d2   :  { %v1537_v14 = vmul.f32 %v1536_v36, %v1531_v40  ;;  %v1538_v31 = vmul.f32 %v1536_v36, %v1532_v24  ;;  %vm5007_vm8 = vmand %vm166_vm1, %vm167_vm4 }
 0x1d3   :  { %vm1615_vm5 = vmand %vm5007_vm8, %vm6336_vm12  ;;  %p2415_p13 = por %p2414_p12, %p2413_p11 }
 0x1d4   :  { %v1539_v2 = vadd.f32 %v1537_v14, %v1534_v25  ;;  %v1540_v39 = vadd.f32 %v1538_v31, %v1535_v16  ;;  %v1560_v11 = vpop.permute.xlu1 %1559  ;;  %v1565_v9 = vpop.permute.xlu0 %1564  ;;  %v1616_v62 = vsel %vm1615_vm5, 1, %v5894_v45  ;;  %vm1689_vm5 = vmand %vm5007_vm8, %vm6348_vm14 }
 0x1d5   :  { %v1562_v3 = vsel %vm1561_vm7, %v1558_v15, %v1560_v11  ;;  %v1563_v19 = vsel %vm1561_vm7, %v1560_v11, %v1558_v15  ;;  %v1620_v29 = vrot.slane %v1616_v62, %v2832_v41  ;;  %p2416_p0 = pnand %p2415_p13, %p2409_p10 }
 0x1d6   :  { %v1553_v6 = vsel %vm4983_vm15, %v1539_v2, 0.0  ;;  %v1554_v51 = vsel %vm4987_vm11, %v1540_v39, 0.0  ;;  %v1571_v42 = vmul.f32 %v1570_v5, %v1562_v3  ;;  %v1572_v8 = vmul.f32 %v1570_v5, %v1563_v19  ;;  %vm1652_vm11 = vmand %vm5007_vm8, %vm6342_vm2 }
 0x1d7   :  { %v1555_v52 = vadd.f32 %v1553_v6, %v1518_v35  ;;  %v1556_v32 = vadd.f32 %v1554_v51, %v1519_v7  ;;  %vm1589_vm15 = vcmp.eq.s32.totalorder %v1587_v50, 1  ;;  %v1624_v35 = vrot.slane %v1616_v62, %v2835_v46 }
 0x1d8   :  { %v1567_v43 = vpop.permute.xlu1 %1566  ;;  %v1595_v37 = vpop.permute.xlu0 %1594  ;;  %vm1625_vm1 = vcmp.eq.s32.totalorder %v1620_v29, 1  ;;  %v1653_v59 = vsel %vm1652_vm11, 1, %v5894_v45  ;;  %v1647_v3 = vstv %s5033_s20  ;;  %v1681_v62 = vstv %s5051_s26  ;;  %vm1726_vm11 = vmand %vm5007_vm8, %vm6354_vm9 }
 0x1d9   :  { %v1568_v23 = vsel %vm1561_vm7, %v1565_v9, %v1567_v43  ;;  %v1569_v0 = vsel %vm1561_vm7, %v1567_v43, %v1565_v9  ;;  %vm1635_vm7 = vcmp.lt.s32.totalorder %v2844_v61, 98  ;;  %vm1626_vm4 = vcmp.eq.s32.totalorder %v1624_v35, 1 }
 0x1da   :  { %v1574_v13 = vmul.f32 %v1573_v28, %v1568_v23  ;;  %v1575_v56 = vmul.f32 %v1573_v28, %v1569_v0  ;;  %v1657_v51 = vrot.slane %v1653_v59, %v2832_v41  ;;  %v1661_v5 = vrot.slane %v1653_v59, %v2835_v46 }
 0x1db   :  { %v1718_v59 = vstv %s5073_s25 }
 0x1dc   :  { %v1576_v54 = vadd.f32 %v1574_v13, %v1571_v42  ;;  %v1577_v12 = vadd.f32 %v1575_v56, %v1572_v8  ;;  %v1597_v33 = vpop.permute.xlu1 %1596  ;;  %v1602_v7 = vpop.permute.xlu0 %1601  ;;  %v1690_v56 = vsel %vm1689_vm5, 1, %v5894_v45 }
 0x1dd   :  { %v1599_v22 = vsel %vm1598_vm0, %v1595_v37, %v1597_v33  ;;  %v1600_v4 = vsel %vm1598_vm0, %v1597_v33, %v1595_v37 }
 0x1de   :  { %v1590_v10 = vsel %vm1588_vm10, %v1576_v54, 0.0  ;;  %v1591_v63 = vsel %vm1589_vm15, %v1577_v12, 0.0  ;;  %v1608_v17 = vmul.f32 %v1607_v27, %v1599_v22  ;;  %v1609_v40 = vmul.f32 %v1607_v27, %v1600_v4 }
 0x1df   :  { %v1592_v30 = vadd.f32 %v1590_v10, %v1555_v52  ;;  %v1593_v36 = vadd.f32 %v1591_v63, %v1556_v32  ;;  %vm1662_vm10 = vcmp.eq.s32.totalorder %v1657_v51, 1  ;;  %vm1663_vm15 = vcmp.eq.s32.totalorder %v1661_v5, 1 }
 0x1e0   :  { %v1604_v53 = vpop.permute.xlu1 %1603  ;;  %v1632_v16 = vpop.permute.xlu0 %1631  ;;  %v1684_v22 = vstv %s5055_s2  ;;  %v1694_v63 = vrot.slane %v1690_v56, %v2832_v41  ;;  %v1698_v27 = vrot.slane %v1690_v56, %v2835_v46 }
 0x1e1   :  { %v1605_v38 = vsel %vm1598_vm0, %v1602_v7, %v1604_v53  ;;  %v1606_v21 = vsel %vm1598_vm0, %v1604_v53, %v1602_v7  ;;  %vm1672_vm0 = vcmp.lt.s32.totalorder %v2844_v61, 97 }
 0x1e2   :  { %v1611_v24 = vmul.f32 %v1610_v20, %v1605_v38  ;;  %v1612_v25 = vmul.f32 %v1610_v20, %v1606_v21 }
 0x1e4   :  { %v1613_v14 = vadd.f32 %v1611_v24, %v1608_v17  ;;  %v1614_v31 = vadd.f32 %v1612_v25, %v1609_v40  ;;  %v1634_v47 = vpop.permute.xlu1 %1633  ;;  %v1639_v28 = vpop.permute.xlu0 %1638  ;;  %v1727_v25 = vsel %vm1726_vm11, 1, %v5894_v45  ;;  %vm1800_vm11 = vmand %vm5007_vm8, %vm2856_vm3 }
 0x1e5   :  { %v1636_v15 = vsel %vm1635_vm7, %v1632_v16, %v1634_v47  ;;  %v1637_v2 = vsel %vm1635_vm7, %v1634_v47, %v1632_v16 }
 0x1e6   :  { %v1627_v39 = vsel %vm1625_vm1, %v1613_v14, 0.0  ;;  %v1628_v11 = vsel %vm1626_vm4, %v1614_v31, 0.0  ;;  %v1645_v50 = vmul.f32 %v1644_v34, %v1636_v15  ;;  %v1646_v9 = vmul.f32 %v1644_v34, %v1637_v2 }
 0x1e7   :  { %v1629_v19 = vadd.f32 %v1627_v39, %v1592_v30  ;;  %v1630_v6 = vadd.f32 %v1628_v11, %v1593_v36  ;;  %vm1699_vm1 = vcmp.eq.s32.totalorder %v1694_v63, 1  ;;  %vm1700_vm4 = vcmp.eq.s32.totalorder %v1698_v27, 1 }
 0x1e8   :  { %v1641_v52 = vpop.permute.xlu1 %1640  ;;  %v1669_v0 = vpop.permute.xlu0 %1668  ;;  %v1721_v15 = vstv %s5077_s27  ;;  %v1731_v11 = vrot.slane %v1727_v25, %v2832_v41  ;;  %v1735_v34 = vrot.slane %v1727_v25, %v2835_v46  ;;  %v173_v27 = vadd.s32 3, %v4697_v57 }
 0x1e9   :  { %v1642_v32 = vsel %vm1635_vm7, %v1639_v28, %v1641_v52  ;;  %v1643_v58 = vsel %vm1635_vm7, %v1641_v52, %v1639_v28  ;;  %vm1709_vm7 = vcmp.lt.s32.totalorder %v2844_v61, 96 }
 0x1ea   :  { %v1648_v43 = vmul.f32 %v1647_v3, %v1642_v32  ;;  %v1649_v23 = vmul.f32 %v1647_v3, %v1643_v58  ;;  %vm1737_vm5 = vcmp.eq.s32.totalorder %v1735_v34, 1  ;;  %v1866_v34 = vstv %s5154_s9 }
 0x1ec   :  { %v1650_v42 = vadd.f32 %v1648_v43, %v1645_v50  ;;  %v1651_v8 = vadd.f32 %v1649_v23, %v1646_v9  ;;  %v1671_v13 = vpop.permute.xlu1 %1670  ;;  %v1676_v20 = vpop.permute.xlu0 %1675 }
 0x1ed   :  { %v1673_v37 = vsel %vm1672_vm0, %v1669_v0, %v1671_v13  ;;  %v1674_v54 = vsel %vm1672_vm0, %v1671_v13, %v1669_v0 }
 0x1ee   :  { %v1664_v12 = vsel %vm1662_vm10, %v1650_v42, 0.0  ;;  %v1665_v33 = vsel %vm1663_vm15, %v1651_v8, 0.0  ;;  %v1682_v35 = vmul.f32 %v1681_v62, %v1673_v37  ;;  %v1683_v7 = vmul.f32 %v1681_v62, %v1674_v54 }
 0x1ef   :  { %v1666_v4 = vadd.f32 %v1664_v12, %v1629_v19  ;;  %v1667_v10 = vadd.f32 %v1665_v33, %v1630_v6  ;;  %vm174_vm10 = vcmp.ge.s32.totalorder %v173_v27, 0  ;;  %vm175_vm15 = vcmp.lt.s32.totalorder %v173_v27, 16 }
 0x1f0   :  { %v1678_v30 = vpop.permute.xlu1 %1677  ;;  %v1706_v21 = vpop.permute.xlu0 %1705 }
 0x1f1   :  { %v1679_v36 = vsel %vm1672_vm0, %v1676_v20, %v1678_v30  ;;  %v1680_v29 = vsel %vm1672_vm0, %v1678_v30, %v1676_v20  ;;  %vm1736_vm0 = vcmp.eq.s32.totalorder %v1731_v11, 1 }
 0x1f2   :  { %v1685_v53 = vmul.f32 %v1684_v22, %v1679_v36  ;;  %v1686_v38 = vmul.f32 %v1684_v22, %v1680_v29 }
 0x1f4   :  { %v1687_v17 = vadd.f32 %v1685_v53, %v1682_v35  ;;  %v1688_v40 = vadd.f32 %v1686_v38, %v1683_v7  ;;  %v1708_v24 = vpop.permute.xlu1 %1707  ;;  %v1713_v3 = vpop.permute.xlu0 %1712  ;;  %v1801_v53 = vsel %vm1800_vm11, 1, %v5894_v45  ;;  %v1758_v38 = vstv %s5133_s3 }
 0x1f5   :  { %v1710_v16 = vsel %vm1709_vm7, %v1706_v21, %v1708_v24  ;;  %v1711_v14 = vsel %vm1709_vm7, %v1708_v24, %v1706_v21  ;;  %v1792_v24 = vstv %s5138_s30 }
 0x1f6   :  { %v1701_v31 = vsel %vm1699_vm1, %v1687_v17, 0.0  ;;  %v1702_v47 = vsel %vm1700_vm4, %v1688_v40, 0.0  ;;  %v1719_v5 = vmul.f32 %v1718_v59, %v1710_v16  ;;  %v1720_v28 = vmul.f32 %v1718_v59, %v1711_v14  ;;  %vm5164_vm1 = vmand %vm174_vm10, %vm175_vm15 }
 0x1f7   :  { %v1703_v2 = vadd.f32 %v1701_v31, %v1666_v4  ;;  %v1704_v39 = vadd.f32 %v1702_v47, %v1667_v10  ;;  %vm1837_vm4 = vmand %vm5007_vm8, %vm2876_vm13  ;;  %vm1783_vm10 = vcmp.lt.s32.totalorder %v2844_v61, 94  ;;  %v1795_v16 = vstv %s5142_s6 }
 0x1f8   :  { %v1715_v19 = vpop.permute.xlu1 %1714  ;;  %v5103_v58 = vpop.permute.xlu0 %1742  ;;  %v5194_v21 = vsel %vm1837_vm4, 1, %v5894_v45  ;;  %vm1948_vm15 = vmand %vm5164_vm1, %vm6348_vm14  ;;  %v1805_v14 = vrot.slane %v1801_v53, %v2832_v41  ;;  %v1809_v31 = vrot.slane %v1801_v53, %v2835_v46 }
 0x1f9   :  { %v1716_v6 = vsel %vm1709_vm7, %v1713_v3, %v1715_v19  ;;  %v1717_v51 = vsel %vm1709_vm7, %v1715_v19, %v1713_v3  ;;  %vm1763_vm7 = vmand %vm5007_vm8, %vm2808_vm6  ;;  %vm1746_vm8 = vcmp.lt.s32.totalorder %v2844_v61, 95  ;;  %v1846_v11 = vrot.slane %v5194_v21, %v2835_v46 }
 0x1fa   :  { %v1722_v52 = vmul.f32 %v1721_v15, %v1716_v6  ;;  %v1723_v32 = vmul.f32 %v1721_v15, %v1717_v51  ;;  %v1764_v35 = vsel %vm1763_vm7, 1, %v5894_v45  ;;  %vm1820_vm7 = vcmp.lt.s32.totalorder %v2844_v61, 93 }
 0x1fb   :  { %v1768_v17 = vrot.slane %v1764_v35, %v2832_v41  ;;  %v1772_v40 = vrot.slane %v1764_v35, %v2835_v46  ;;  %v1829_v15 = vstv %s5144_s7  ;;  %v1869_v3 = vstv %s5162_s11 }
 0x1fc   :  { %v1724_v50 = vadd.f32 %v1722_v52, %v1719_v5  ;;  %v1725_v9 = vadd.f32 %v1723_v32, %v1720_v28  ;;  %v5105_v43 = vpop.permute.xlu1 %1744  ;;  %v5111_v13 = vpop.permute.xlu0 %1749  ;;  %v5252_v19 = vsel %vm1948_vm15, 1, %v5894_v45  ;;  %v1903_v51 = vstv %s5168_s1 }
 0x1fd   :  { %v1906_v5 = vstv %s5176_s16  ;;  %vm5283_vm14 = vcmp.eq.s32.totalorder %v1768_v17, 1  ;;  %vm5287_vm11 = vcmp.eq.s32.totalorder %v1772_v40, 1  ;;  %v1747_v53 = vsel %vm1746_vm8, %v5103_v58, %v5105_v43 }
 0x1fe   :  { %v1738_v23 = vsel %vm1736_vm0, %v1724_v50, 0.0  ;;  %v1739_v0 = vsel %vm1737_vm5, %v1725_v9, 0.0  ;;  %vm1874_vm0 = vmand %vm5164_vm1, %vm6336_vm12  ;;  %v1957_v17 = vrot.slane %v5252_v19, %v2835_v46  ;;  %vm5328_vm4 = vcmp.eq.s32.totalorder %v1809_v31, 1 }
 0x1ff   :  { %v5107_v42 = vadd.f32 %v1738_v23, %v1703_v2  ;;  %v5109_v8 = vadd.f32 %v1739_v0, %v1704_v39  ;;  %vm1911_vm5 = vmand %vm5164_vm1, %vm6342_vm2  ;;  %v5223_v47 = vsel %vm1874_vm0, 1, %v5894_v45  ;;  %v1832_v2 = vstv %s5146_s8 }
 0x200   :  { %v5113_v56 = vpop.permute.xlu1 %1751  ;;  %v5115_v37 = vpop.permute.xlu0 %1779  ;;  %v1842_v39 = vrot.slane %v5194_v21, %v2832_v41  ;;  %v5240_v48 = vsel %vm1911_vm5, 1, %v5894_v45  ;;  %vm1985_vm12 = vmand %vm5164_vm1, %vm6354_vm9  ;;  %v1879_v44 = vrot.slane %v5223_v47, %v2832_v41  ;;  %v1883_v6 = vrot.slane %v5223_v47, %v2835_v46 }
 0x201   :  { %v1753_v55 = vsel %vm1746_vm8, %v5111_v13, %v5113_v56  ;;  %v1754_v52 = vsel %vm1746_vm8, %v5113_v56, %v5111_v13  ;;  %vm1857_vm2 = vcmp.lt.s32.totalorder %v2844_v61, 83  ;;  %v1916_v32 = vrot.slane %v5240_v48, %v2832_v41  ;;  %vm2022_vm0 = vmand %vm5164_vm1, %vm2808_vm6 }
 0x202   :  { %v1920_v50 = vrot.slane %v5240_v48, %v2835_v46  ;;  %v5301_v35 = vsel %vm1985_vm12, 1, %v5894_v45  ;;  %v1748_v21 = vsel %vm1746_vm8, %v5105_v43, %v5103_v58  ;;  %v1759_v40 = vmul.f32 %v1758_v38, %v1753_v55  ;;  %vm2059_vm12 = vmand %vm5164_vm1, %vm2856_vm3 }
 0x203   :  { %v1760_v47 = vmul.f32 %v1758_v38, %v1754_v52  ;;  %vm5324_vm9 = vcmp.eq.s32.totalorder %v1805_v14, 1  ;;  %v1757_v14 = vmul.f32 %v1755_v1, %v1748_v21  ;;  %vm1894_vm8 = vcmp.lt.s32.totalorder %v2844_v61, 82 }
 0x204   :  { %v5117_v54 = vpop.permute.xlu1 %1781  ;;  %v5119_v12 = vpop.permute.xlu0 %1786  ;;  %vm5359_vm5 = vcmp.eq.s32.totalorder %v1842_v39, 1  ;;  %vm5363_vm15 = vcmp.eq.s32.totalorder %v1846_v11, 1  ;;  %v5384_v11 = vsel %vm2022_vm0, 1, %v5894_v45  ;;  %vm5404_vm6 = vcmp.eq.s32.totalorder %v1879_v44, 1 }
 0x205   :  { %v1784_v31 = vsel %vm1783_vm10, %v5115_v37, %v5117_v54  ;;  %vm1968_vm3 = vcmp.lt.s32.totalorder %v2844_v61, 80  ;;  %vm5540_vm0 = vcmp.eq.s32.totalorder %v1957_v17, 1  ;;  %v6402_v36 = vrot.slane %v5301_v35, %v2832_v41 }
 0x206   :  { %v1793_v49 = vmul.f32 %v1792_v24, %v1784_v31 }
 0x208   :  { %v5121_v33 = vpop.permute.xlu1 %1788  ;;  %v5123_v62 = vpop.permute.xlu0 %1816 }
 0x209   :  { %v1790_v27 = vsel %vm1783_vm10, %v5119_v12, %v5121_v33  ;;  %v1791_v13 = vsel %vm1783_vm10, %v5121_v33, %v5119_v12  ;;  %v1756_v33 = vmul.f32 %v1755_v1, %v1747_v53  ;;  %v1785_v12 = vsel %vm1783_vm10, %v5117_v54, %v5115_v37 }
 0x20a   :  { %v1796_v55 = vmul.f32 %v1795_v16, %v1790_v27  ;;  %v1797_v53 = vmul.f32 %v1795_v16, %v1791_v13  ;;  %v1762_v27 = vadd.f32 %v1760_v47, %v1757_v14  ;;  %v2017_v13 = vstv %s5266_s18 }
 0x20b   :  { %v1761_v16 = vadd.f32 %v1759_v40, %v1756_v33  ;;  %v1794_v52 = vmul.f32 %v1792_v24, %v1785_v12  ;;  %vm5408_vm10 = vcmp.eq.s32.totalorder %v1883_v6, 1  ;;  %v2027_v6 = vrot.slane %v5384_v11, %v2832_v41 }
 0x20c   :  { %v5125_v22 = vpop.permute.xlu1 %1818  ;;  %v5127_v4 = vpop.permute.xlu0 %1823  ;;  %v2031_v33 = vrot.slane %v5384_v11, %v2835_v46 }
 0x20d   :  { %v1799_v44 = vadd.f32 %v1797_v53, %v1794_v52  ;;  %v1776_v52 = vsel %vm5287_vm11, %v1762_v27, 0.0  ;;  %vm2005_vm11 = vcmp.lt.s32.totalorder %v2844_v61, 79 }
 0x210   :  { %v5129_v10 = vpop.permute.xlu1 %1825  ;;  %v5135_v63 = vpop.permute.xlu0 %1853 }
 0x211   :  { %v1827_v37 = vsel %vm1820_vm7, %v5127_v4, %v5129_v10  ;;  %v1828_v54 = vsel %vm1820_vm7, %v5129_v10, %v5127_v4  ;;  %v1821_v4 = vsel %vm1820_vm7, %v5123_v62, %v5125_v22  ;;  %v1822_v10 = vsel %vm1820_vm7, %v5125_v22, %v5123_v62 }
 0x212   :  { %v1833_v40 = vmul.f32 %v1832_v2, %v1827_v37  ;;  %v1834_v47 = vmul.f32 %v1832_v2, %v1828_v54  ;;  %v1798_v2 = vadd.f32 %v1796_v55, %v1793_v49  ;;  %vm1931_vm7 = vcmp.lt.s32.totalorder %v2844_v61, 81 }
 0x213   :  { %v1830_v14 = vmul.f32 %v1829_v15, %v1821_v4  ;;  %v1775_v55 = vsel %vm5283_vm14, %v1761_v16, 0.0  ;;  %v2051_v4 = vstv %s5357_s19  ;;  %v1778_v16 = vadd.f32 %v1776_v52, %v5109_v8 }
 0x214   :  { %v5140_v20 = vpop.permute.xlu1 %1855  ;;  %v5148_v30 = vpop.permute.xlu0 %1860  ;;  %v1777_v0 = vadd.f32 %v1775_v55, %v5107_v42  ;;  %v1812_v27 = vsel %vm5324_vm9, %v1798_v2, 0.0  ;;  %vm5482_vm14 = vcmp.eq.s32.totalorder %v1920_v50, 1  ;;  %vm2042_vm9 = vcmp.lt.s32.totalorder %v2844_v61, 78 }
 0x215   :  { %v1859_v49 = vsel %vm1857_vm2, %v5140_v20, %v5135_v63  ;;  %v1835_v37 = vadd.f32 %v1833_v40, %v1830_v14  ;;  %v6395_v55 = vrot.slane %v5252_v19, %v2832_v41 }
 0x217   :  { %v1849_v58 = vsel %vm5359_vm5, %v1835_v37, 0.0  ;;  %vm2079_vm5 = vcmp.lt.s32.totalorder %v2844_v61, 77 }
 0x218   :  { %v5156_v57 = vpop.permute.xlu1 %1862  ;;  %v5174_v29 = vpop.permute.xlu0 %1890 }
 0x219   :  { %v1864_v62 = vsel %vm1857_vm2, %v5148_v30, %v5156_v57  ;;  %v1865_v22 = vsel %vm1857_vm2, %v5156_v57, %v5148_v30  ;;  %v1831_v30 = vmul.f32 %v1829_v15, %v1822_v10  ;;  %v1858_v57 = vsel %vm1857_vm2, %v5135_v63, %v5140_v20 }
 0x21a   :  { %v1870_v31 = vmul.f32 %v1869_v3, %v1864_v62  ;;  %v1871_v15 = vmul.f32 %v1869_v3, %v1865_v22  ;;  %v5452_v10 = vsel %vm2059_vm12, 1, %v5894_v45  ;;  %v1867_v63 = vmul.f32 %v1866_v34, %v1858_v57 }
 0x21b   :  { %v1836_v54 = vadd.f32 %v1834_v47, %v1831_v30  ;;  %v1868_v20 = vmul.f32 %v1866_v34, %v1859_v49  ;;  %v1813_v34 = vsel %vm5328_vm4, %v1799_v44, 0.0  ;;  %vm5475_vm2 = vcmp.eq.s32.totalorder %v1916_v32, 1 }
 0x21c   :  { %v5179_v7 = vpop.permute.xlu1 %1892  ;;  %v5206_v25 = vpop.permute.xlu0 %1897  ;;  %v1814_v22 = vadd.f32 %v1812_v27, %v1777_v0  ;;  %v1815_v2 = vadd.f32 %v1813_v34, %v1778_v16  ;;  %vm5533_vm4 = vcmp.eq.s32.totalorder %v6395_v55, 1  ;;  %v2054_v0 = vstv %s5488_s21 }
 0x21d   :  { %v1895_v32 = vsel %vm1894_vm8, %v5174_v29, %v5179_v7  ;;  %v1896_v48 = vsel %vm1894_vm8, %v5179_v7, %v5174_v29  ;;  %v1850_v43 = vsel %vm5363_vm15, %v1836_v54, 0.0  ;;  %v2064_v29 = vrot.slane %v5452_v10, %v2832_v41 }
 0x21e   :  { %v2068_v7 = vrot.slane %v5452_v10, %v2835_v46  ;;  %v1904_v1 = vmul.f32 %v1903_v51, %v1895_v32  ;;  %v1905_v44 = vmul.f32 %v1903_v51, %v1896_v48  ;;  %v1851_v30 = vadd.f32 %v1849_v58, %v1814_v22 }
 0x21f   :  { %v1852_v57 = vadd.f32 %v1850_v43, %v1815_v2  ;;  %v6405_v10 = vrot.slane %v5301_v35, %v2835_v46  ;;  %v6408_v27 = vstv %s5181_s5  ;;  %vm5602_vm15 = vcmp.eq.s32.totalorder %v2027_v6, 1 }
 0x220   :  { %v5225_v59 = vpop.permute.xlu1 %1899  ;;  %v5264_v28 = vpop.permute.xlu0 %1927  ;;  %v6409_v34 = vmov %v6408_v27 }
 0x221   :  { %v1901_v23 = vsel %vm1894_vm8, %v5206_v25, %v5225_v59  ;;  %v1902_v3 = vsel %vm1894_vm8, %v5225_v59, %v5206_v25  ;;  %v1872_v25 = vadd.f32 %v1870_v31, %v1867_v63  ;;  %v1873_v59 = vadd.f32 %v1871_v15, %v1868_v20  ;;  %vm2096_vm8 = vmand %vm5164_vm1, %vm2876_vm13 }
 0x222   :  { %v1907_v47 = vmul.f32 %v1906_v5, %v1901_v23  ;;  %v1908_v62 = vmul.f32 %v1906_v5, %v1902_v3  ;;  %v6400_v31 = vstv %s5188_s14  ;;  %vm5563_vm13 = vcmp.eq.s32.totalorder %v6402_v36, 1 }
 0x223   :  { %v1886_v49 = vsel %vm5404_vm6, %v1872_v25, 0.0  ;;  %v1887_v51 = vsel %vm5408_vm10, %v1873_v59, 0.0  ;;  %v6401_v18 = vmov %v6400_v31  ;;  %vm5570_vm1 = vcmp.eq.s32.totalorder %v6405_v10, 1 }
 0x224   :  { %v5281_v9 = vpop.permute.xlu1 %1929  ;;  %v5322_v56 = vpop.permute.xlu0 %1934  ;;  %v1909_v24 = vadd.f32 %v1907_v47, %v1904_v1  ;;  %v1910_v12 = vadd.f32 %v1908_v62, %v1905_v44  ;;  %v1888_v20 = vadd.f32 %v1886_v49, %v1851_v30  ;;  %v1889_v23 = vadd.f32 %v1887_v51, %v1852_v57 }
 0x225   :  { %v1932_v19 = vsel %vm1931_vm7, %v5264_v28, %v5281_v9  ;;  %v1933_v17 = vsel %vm1931_vm7, %v5281_v9, %v5264_v28  ;;  %v5580_v16 = vsel %vm2096_vm8, 1, %v5894_v45  ;;  %v6410_v45 = vstv %s5212_s15 }
 0x226   :  { %v1941_v35 = vmul.f32 %v6408_v27, %v1932_v19  ;;  %v1942_v25 = vmul.f32 %v6409_v34, %v1933_v17  ;;  %v6411_v48 = vmov %v6410_v45  ;;  %vm5609_vm6 = vcmp.eq.s32.totalorder %v2031_v33, 1 }
 0x227   :  { %v1923_v6 = vsel %vm5475_vm2, %v1909_v24, 0.0  ;;  %v1924_v11 = vsel %vm5482_vm14, %v1910_v12, 0.0  ;;  %vm5623_vm10 = vcmp.eq.s32.totalorder %v2064_v29, 1  ;;  %v6420_v1 = vstv %s5200_s10 }
 0x228   :  { %v5332_v38 = vpop.permute.xlu1 %1936  ;;  %v5375_v39 = vpop.permute.xlu0 %1964  ;;  %v6421_v44 = vmov %v6420_v1  ;;  %v1925_v10 = vadd.f32 %v1923_v6, %v1888_v20  ;;  %v2105_v54 = vrot.slane %v5580_v16, %v2835_v46 }
 0x229   :  { %v1938_v5 = vsel %vm1931_vm7, %v5322_v56, %v5332_v38  ;;  %v1939_v21 = vsel %vm1931_vm7, %v5332_v38, %v5322_v56  ;;  %vm5627_vm7 = vcmp.eq.s32.totalorder %v2068_v7, 1 }
 0x22a   :  { %v1944_v15 = vmul.f32 %v6400_v31, %v1938_v5  ;;  %v1945_v37 = vmul.f32 %v6401_v18, %v1939_v21 }
 0x22c   :  { %v5398_v26 = vpop.permute.xlu1 %1966  ;;  %v1972_v60 = vpop.permute.xlu0 %1971  ;;  %v1946_v33 = vadd.f32 %v1944_v15, %v1941_v35  ;;  %v1947_v62 = vadd.f32 %v1945_v37, %v1942_v25 }
 0x22d   :  { %v1969_v59 = vsel %vm1968_vm3, %v5375_v39, %v5398_v26 }
 0x22e   :  { %v1978_v40 = vmul.f32 %v6420_v1, %v1969_v59  ;;  %v1960_v31 = vsel %vm5533_vm4, %v1946_v33, 0.0  ;;  %v1961_v15 = vsel %vm5540_vm0, %v1947_v62, 0.0  ;;  %v2088_v59 = vstv %s5617_s22 }
 0x22f   :  { %v1962_v34 = vadd.f32 %v1960_v31, %v1925_v10 }
 0x230   :  { %v1974_v53 = vpop.permute.xlu1 %1973  ;;  %v5486_v8 = vpop.permute.xlu0 %2001 }
 0x231   :  { %v1975_v28 = vsel %vm1968_vm3, %v1972_v60, %v1974_v53  ;;  %v1976_v9 = vsel %vm1968_vm3, %v1974_v53, %v1972_v60  ;;  %v1970_v60 = vsel %vm1968_vm3, %v5398_v26, %v5375_v39  ;;  %vm2107_vm3 = vcmp.eq.s32.totalorder %v2105_v54, 1 }
 0x232   :  { %v1981_v32 = vmul.f32 %v6410_v45, %v1975_v28  ;;  %v1982_v58 = vmul.f32 %v6411_v48, %v1976_v9  ;;  %v1979_v5 = vmul.f32 %v6421_v44, %v1970_v60  ;;  %v1926_v28 = vadd.f32 %v1924_v11, %v1889_v23 }
 0x233   :  { %v2091_v60 = vstv %s5631_s4  ;;  %v2101_v23 = vrot.slane %v5580_v16, %v2832_v41 }
 0x234   :  { %v5498_v50 = vpop.permute.xlu1 %2003  ;;  %v2009_v14 = vpop.permute.xlu0 %2008  ;;  %v1983_v51 = vadd.f32 %v1981_v32, %v1978_v40  ;;  %v1984_v55 = vadd.f32 %v1982_v58, %v1979_v5  ;;  %v1963_v25 = vadd.f32 %v1961_v15, %v1926_v28 }
 0x235   :  { %v2006_v42 = vsel %vm2005_vm11, %v5486_v8, %v5498_v50  ;;  %v2007_v29 = vsel %vm2005_vm11, %v5498_v50, %v5486_v8  ;;  %v6422_v50 = vstv %s5227_s17  ;;  %vm2106_vm12 = vcmp.eq.s32.totalorder %v2101_v23, 1 }
 0x236   :  { %v2015_v24 = vmul.f32 %v6422_v50, %v2006_v42  ;;  %v6423_v12 = vmov %v6422_v50  ;;  %v1998_v52 = vsel %vm5570_vm1, %v1984_v55, 0.0  ;;  %v6424_v50 = vld [vmem:[#allocation37_spill] sm:$0xff] }
 0x237   :  { %v2016_v19 = vmul.f32 %v6423_v12, %v2007_v29  ;;  %v2000_v45 = vadd.f32 %v1998_v52, %v1963_v25 }
 0x238   :  { %v2011_v38 = vpop.permute.xlu1 %2010  ;;  %v2039_v3 = vpop.permute.xlu0 %2038 }
 0x239   :  { %v2012_v26 = vsel %vm2005_vm11, %v2009_v14, %v2011_v38  ;;  %v2013_v47 = vsel %vm2005_vm11, %v2011_v38, %v2009_v14 }
 0x23a   :  { %v2018_v21 = vmul.f32 %v2017_v13, %v2012_v26  ;;  %v2019_v14 = vmul.f32 %v2017_v13, %v2013_v47 }
 0x23c   :  { %v2041_v53 = vpop.permute.xlu1 %2040  ;;  %v2046_v7 = vpop.permute.xlu0 %2045  ;;  %v2020_v9 = vadd.f32 %v2018_v21, %v2015_v24 }
 0x23d   :  { %v2043_v30 = vsel %vm2042_vm9, %v2039_v3, %v2041_v53  ;;  %v2044_v57 = vsel %vm2042_vm9, %v2041_v53, %v2039_v3  ;;  %v2021_v3 = vadd.f32 %v2019_v14, %v2016_v19 }
 0x23e   :  { %v2052_v18 = vmul.f32 %v2051_v4, %v2043_v30  ;;  %v2053_v37 = vmul.f32 %v2051_v4, %v2044_v57  ;;  %v2034_v32 = vsel %vm5602_vm15, %v2020_v9, 0.0 }
 0x23f   :  { %v2035_v48 = vsel %vm5609_vm6, %v2021_v3, 0.0  ;;  %v2358_v3 = vld [vmem:[#allocation7] sm:$0xff] }
 0x240   :  { %v2048_v49 = vpop.permute.xlu1 %2047  ;;  %v2076_v36 = vpop.permute.xlu0 %2075  ;;  %v2037_v39 = vadd.f32 %v2035_v48, %v2000_v45 }
 0x241   :  { %v2049_v38 = vsel %vm2042_vm9, %v2046_v7, %v2048_v49  ;;  %v2050_v8 = vsel %vm2042_vm9, %v2048_v49, %v2046_v7 }
 0x242   :  { %v2055_v13 = vmul.f32 %v2054_v0, %v2049_v38  ;;  %v2056_v17 = vmul.f32 %v2054_v0, %v2050_v8  ;;  %v1997_v0 = vsel %vm5563_vm13, %v1983_v51, 0.0  ;;  %v2490_v51 = vmov 1966171168  }
 0x243   :  { %v1999_v53 = vadd.f32 %v1997_v0, %v1962_v34  ;;  %v2128_v55 = vunpack.c.l.s4 %v2490_v51  ;;  %v2359_v0 = vld [vmem:[#allocation7 + $0x8] sm:$0xff] }
 0x244   :  { %v2078_v27 = vpop.permute.xlu1 %2077  ;;  %v2057_v56 = vadd.f32 %v2055_v13, %v2052_v18  ;;  %v2058_v35 = vadd.f32 %v2056_v17, %v2053_v37  ;;  %v2083_v63 = vpop.permute.xlu0 %2082 }
 0x245   :  { %v2080_v4 = vsel %vm2079_vm5, %v2076_v36, %v2078_v27  ;;  %v2081_v20 = vsel %vm2079_vm5, %v2078_v27, %v2076_v36  ;;  %v2036_v1 = vadd.f32 %v2034_v32, %v1999_v53  ;;  %v2129_v38 = vunpack.c.0.s8 %v2128_v55 }
 0x246   :  { %v2071_v26 = vsel %vm5623_vm10, %v2057_v56, 0.0  ;;  %v2072_v47 = vsel %vm5627_vm7, %v2058_v35, 0.0  ;;  %v2089_v11 = vmul.f32 %v2088_v59, %v2080_v4  ;;  %v2090_v33 = vmul.f32 %v2088_v59, %v2081_v20 }
 0x247   :  { %v2073_v44 = vadd.f32 %v2071_v26, %v2036_v1  ;;  %v2074_v5 = vadd.f32 %v2072_v47, %v2037_v39  ;;  %v2132_v24 = vsub.s32 %v2129_v38, %v6424_v50 }
 0x248   :  { %v2085_v58 = vpop.permute.xlu1 %2084 }
 0x249   :  { %v2086_v6 = vsel %vm2079_vm5, %v2083_v63, %v2085_v58  ;;  %v2087_v16 = vsel %vm2079_vm5, %v2085_v58, %v2083_v63 }
 0x24a   :  { %v2092_v43 = vmul.f32 %v2091_v60, %v2086_v6  ;;  %v2093_v62 = vmul.f32 %v2091_v60, %v2087_v16 }
 0x24c   :  { %v2094_v40 = vadd.f32 %v2092_v43, %v2089_v11  ;;  %v2095_v22 = vadd.f32 %v2093_v62, %v2090_v33 }
 0x24e   :  { %v2108_v2 = vsel %vm2106_vm12, %v2094_v40, 0.0  ;;  %v2109_v42 = vsel %vm2107_vm3, %v2095_v22, 0.0 }
 0x24f   :  { %v2110_v29 = vadd.f32 %v2108_v2, %v2073_v44  ;;  %v2111_v7 = vadd.f32 %v2109_v42, %v2074_v5 }
 0x251   :  { %v2289_v21 = vmul.f32 -1.442695, %v2110_v29  ;;  %v2290_v14 = vmul.f32 -1.442695, %v2111_v7 }
 0x253   :  { %2349 = vpow2.f32 %v2289_v21 }
 0x254   :  { %2351 = vpow2.f32 %v2290_v14 }
 0x260   :  { %v2350_v61 = vpop.eup %2349 }
 0x261   :  { %v2352_v30 = vpop.eup %2351  ;;  %v2118_v57 = vadd.f32 1.0, %v2350_v61 }
 0x262   :  { %v2119_v49 = vadd.f32 1.0, %v2352_v30 }
 0x263   :  { %2353 = vrcp.f32 %v2118_v57 }
 0x264   :  { %2355 = vrcp.f32 %v2119_v49 }
 0x270   :  { %v2354_v8 = vpop.eup %2353 }
 0x271   :  { %v2356_v12 = vpop.eup %2355 }
 0x272   :  { %v2126_v19 = vcombine.low %v2354_v8, %v2356_v12 }
 0x274   :  { %v2133_v13 = vrot.slane %v2126_v19, %v2132_v24 }
 0x276   :  { %v2134_v17 = vcombine.high %v2133_v13, %v2133_v13  ;;  %v2141_v31 = vrot.slane %v2133_v13, %v2132_v24 }
 0x278   :  { %v2148_v15 = vrot.slane %v2134_v17, %v2132_v24  ;;  %v2152_v18 = vrot.slane %v2141_v31, %v2832_v41  ;;  %v2156_v37 = vrot.slane %v2141_v31, %v2835_v46 }
 0x27a   :  { %v2160_v36 = vrot.slane %v2148_v15, %v2832_v41  ;;  %v2164_v10 = vrot.slane %v2148_v15, %v2835_v46  ;;  %v2165_v28 = vcombine.low %v2152_v18, %v2156_v37 }
 0x27c   :  { %v2166_v9 = vcombine.low %v2160_v36, %v2164_v10  ;;  %v2169_v27 = vmul.f32 %v2358_v3, %v2165_v28 }
 0x27e   :  { %v2170_v52 = vmul.f32 %v2359_v0, %v2166_v9  ;;  %2171 = vst [vmem:[#allocation9] sm:$0xff] %v2169_v27 }
 0x280   :  { %2172 = vst [vmem:[#allocation9 + $0x8] sm:$0xff] %v2170_v52 }
 0x281   :  { %2419 = shalt.err (!%p2416_p0)
}
 0x282   :  { %s6425_s24 = smov 8   ;;  %s6426_s29 = smov 128  }
 0x283   :  { %s6427_s26 = sld [smem:[#allocation76_spill]] }
 0x289   :  { %2184 = dma.vmem_to_hbm [thread:$0]  %s2179_s0, 256, %s6427_s26, [#allocation4], %s6426_s29, %s6426_s29, %s6425_s24  }
 0x28a   :  { %2434 = dma.done.wait [#allocation4], 256  }
 0x28b   :  { %2435 = vsyncadd [#allocation4], 4294967040 }
 0x28c   :  { %2188 = vsyncpa [#allocation3], 1 }
 0x28d   :  { %2189 = vsyncpa [#allocation8], 1 }
 0x28e   :  { %2190 = vsyncpa [#allocation4], 1 }
 0x28f   :  { %2191 = vsyncpa [#allocation5], 1 }

</bundles_post_ra>
